<compile_context>
chip_gen: v5e
topology: v5e:2x2
jax: 0.10.0
libtpu: 0.0.40
codegen_flags: <defaults>
</compile_context>

<pallas_src>
import functools

import numpy as np
import jax
import jax.numpy as jnp
from jax.experimental import pallas as pl
from jax.experimental.pallas import tpu as pltpu

HEAD_DIM = 8
NUM_CLASSES = 10
_NEG = -1e30
_LANE = 128
# stage_configs = [("C", 1, 8, True), ("M", 1, 16, True), ("T", 1, 32, True)]

_VMEM = functools.partial(pl.BlockSpec, memory_space=pltpu.MemorySpace.VMEM)


# ----------------------------------------------------------------------------
# host-side (numpy / trace-time) constant builders
# ----------------------------------------------------------------------------
def _conv_out(n, k, s, p):
    return (n - k + 2 * p) // s + 1


def _window_select_np(B, H, W, stride, pad_mode):
    """3x3 / pad-1 window "tap gather" matrices for a (b, h, w)-major [B*H*W, C]
    row layout.  sel[k] is [B*Ho*Wo, B*H*W] with 0/1 entries.

    pad_mode:
      "center": padded taps select the (always valid) centre pixel instead
                -> max over the 9 taps equals the max over valid taps only
                   (exactly MaxPool2d(3, stride, 1) semantics, no -inf bias).
      "zero":   padded taps are all-zero rows (zero padding, for depthwise conv).
    """
    Ho, Wo = _conv_out(H, 3, stride, 1), _conv_out(W, 3, stride, 1)
    sel = np.zeros((9, B * Ho * Wo, B * H * W), np.float32)
    for kh in range(3):
        for kw in range(3):
            k = kh * 3 + kw
            for b in range(B):
                for i in range(Ho):
                    for j in range(Wo):
                        o = (b * Ho + i) * Wo + j
                        hi, wi = i * stride + kh - 1, j * stride + kw - 1
                        if 0 <= hi < H and 0 <= wi < W:
                            sel[k, o, (b * H + hi) * W + wi] = 1.0
                        elif pad_mode == "center":
                            ci, cj = i * stride, j * stride
                            sel[k, o, (b * H + ci) * W + cj] = 1.0
    return sel


def _batch_indicator_np(B, N):
    """[B, B*N] 0/1 indicator of which rows belong to which batch element."""
    m = np.zeros((B, B * N), np.float32)
    for b in range(B):
        m[b, b * N:(b + 1) * N] = 1.0
    return m


def _pack_cols(entries, dtype):
    """Concatenate [rows, n_i] arrays column-wise into one slab.

    Every chunk is padded to a 128-lane boundary so all in-kernel carve-outs
    are static, lane-tile-aligned slices (zero-cost views, no relayout).
    Returns (slab, {name: (start, n)}).
    """
    cols, off, pos = [], {}, 0
    for name, a in entries:
        a = jnp.asarray(a, dtype)
        n = int(a.shape[-1])
        off[name] = (pos, n)
        padn = (-n) % _LANE
        if padn:
            a = jnp.pad(a, ((0, 0), (0, padn)))
        cols.append(a)
        pos += n + padn
    return jnp.concatenate(cols, axis=-1), off


# ----------------------------------------------------------------------------
# in-kernel math helpers
# ----------------------------------------------------------------------------
def _mm(a, b):
    """bf16 x bf16 MXU matmul with f32 accumulation."""
    return jnp.dot(a.astype(jnp.bfloat16), b.astype(jnp.bfloat16),
                   preferred_element_type=jnp.float32)


def _mm_nt(a, b):
    """a @ b.T (bf16 operands, f32 accumulation) without materializing b.T."""
    return jax.lax.dot_general(a.astype(jnp.bfloat16), b.astype(jnp.bfloat16),
                               (((1,), (1,)), ((), ())),
                               preferred_element_type=jnp.float32)


def _gelu(x):
    # exact (erf) GELU via Abramowitz-Stegun 7.1.26; exp -> EUP, poly -> VPU.
    z = x * 0.7071067811865476
    sgn = jnp.where(z >= 0.0, 1.0, -1.0)
    az = jnp.abs(z)
    t = 1.0 / (1.0 + 0.3275911 * az)
    poly = ((((1.061405429 * t - 1.453152027) * t + 1.421413741) * t
             - 0.284496736) * t + 0.254829592) * t
    erf = sgn * (1.0 - poly * jnp.exp(-az * az))
    return 0.5 * x * (1.0 + erf)


def _bn(x, g, b):
    # training-mode BatchNorm over rows; single pass (var = E[x^2] - mean^2).
    mean = jnp.mean(x, axis=0, keepdims=True)
    var = jnp.maximum(jnp.mean(x * x, axis=0, keepdims=True) - mean * mean, 0.0)
    return (x - mean) * jax.lax.rsqrt(var + 1e-5) * g + b


def _ln(x, g, b):
    mean = jnp.mean(x, axis=-1, keepdims=True)
    var = jnp.maximum(jnp.mean(x * x, axis=-1, keepdims=True) - mean * mean, 0.0)
    return (x - mean) * jax.lax.rsqrt(var + 1e-5) * g + b


def _tree_reduce(vals, op):
    # log-depth reduction so the 9 independent MXU pops overlap with VPU work.
    vals = list(vals)
    while len(vals) > 1:
        nxt = [op(vals[i], vals[i + 1]) for i in range(0, len(vals) - 1, 2)]
        if len(vals) % 2:
            nxt.append(vals[-1])
        vals = nxt
    return vals[0]


def _maxpool3x3(x, sel_ref):
    # MaxPool2d(3, stride, 1): padded taps replicate the centre tap in sel,
    # so a plain max over the 9 tap-gather results is exact (no -inf bias).
    xb = x.astype(jnp.bfloat16)
    taps = [jnp.dot(sel_ref[k], xb, preferred_element_type=jnp.float32)
            for k in range(9)]
    return _tree_reduce(taps, jnp.maximum)


def _depthwise3x3(x, sel_ref, w):
    # depthwise 3x3 stride-1 pad-1; zero padding handled by all-zero sel rows.
    xb = x.astype(jnp.bfloat16)
    taps = [jnp.dot(sel_ref[k], xb, preferred_element_type=jnp.float32) * w[k]
            for k in range(9)]
    return _tree_reduce(taps, lambda a, b: a + b)


# ----------------------------------------------------------------------------
# the single fused kernel
# ----------------------------------------------------------------------------
def _coatnet_kernel(stem_p, mb_sel, dw_sel, ct_sel, stem_w,
                    w8, w16, w32, ffn_w2, pool, bexp, vec, attn_bias,
                    out_ref,
                    *, off, n_heads, scale, inv_n2, inv_n3):
    # static, lane-tile-aligned carve-outs of the packed operand slabs
    def _s(ref, key):
        s, n = off[key]
        return ref[:, s:s + n]

    V = lambda k: _s(vec, "v:" + k)      # f32 [1, n] rows (gamma/beta/bias/dw_w)
    W8 = lambda k: _s(w8, "w8:" + k)     # bf16 [8,  n] weights
    W16 = lambda k: _s(w16, "w16:" + k)  # bf16 [16, n] weights
    W32 = lambda k: _s(w32, "w32:" + k)  # bf16 [32, n] weights
    P = lambda k: _s(pool, "p:" + k)     # bf16 [B,  n] batch-pool indicators

    # ---------------- stage 0: ConvStem (conv3x3 s2 as im2col matmul) -------
    x = _gelu(_bn(_mm(stem_p[...], stem_w[...]), V("stem_g"), V("stem_b")))  # [B*64, 8]

    # ---------------- stage 1: MBConv (stride 2, expand 4, SE 0.25) ---------
    r = _maxpool3x3(x, mb_sel)                                     # [B*16, 8]
    r = _mm(r, W8("mb_proj")) + V("mb_proj_b")                     # proj 1x1 -> [B*16, 16]

    # pre-norm: stats at full resolution (training semantics), affine applied
    # only to the rows surviving the stride-2 centre-tap subsample.
    mean = jnp.mean(x, axis=0, keepdims=True)
    var = jnp.maximum(jnp.mean(x * x, axis=0, keepdims=True) - mean * mean, 0.0)
    h = _mm(mb_sel[4], x)                                          # 1x1 stride-2 == centre tap
    h = (h - mean) * jax.lax.rsqrt(var + 1e-5) * V("pre_g") + V("pre_b")
    h = _gelu(_bn(_mm(h, W8("conv_a")), V("bn_a_g"), V("bn_a_b")))  # conv_a -> [B*16, 32]
    dw_w = [V("dw_w%d" % k) for k in range(9)]
    h = _gelu(_bn(_depthwise3x3(h, dw_sel, dw_w), V("bn_dw_g"), V("bn_dw_b")))

    s = _mm(P("bmat"), h) * inv_n2                                 # SE: global avg -> [B, 32]
    s = _gelu(_mm(s, W32("se1")) + V("se1_b"))
    s = _mm(s, W8("se2")) + V("se2_b")
    s = pl.reciprocal(1.0 + jnp.exp(-s), approx=True)              # sigmoid (EUP)
    h = h * _mm(bexp[...], s)                                      # broadcast scale to rows

    h = _mm(h, W32("conv_b")) + V("conv_b_b")                      # conv_b 1x1 -> [B*16, 16]
    x = r + h                                                      # fused residual add

    # ---------------- stage 2: ConvTransformer (downsample, rel MHSA, FFN) --
    r = _maxpool3x3(x, ct_sel)                                     # proj branch
    r = _mm(r, W16("ct_proj")) + V("ct_proj_b")                    # [B*4, 32]

    a = _ln(x, V("ln1_g"), V("ln1_b"))                             # attn branch: LN @ full res
    a = _maxpool3x3(a, ct_sel)                                     # [B*4, 16]

    dim = n_heads * HEAD_DIM
    qkv = _mm(a, W16("qkv")) + V("qkv_b")                          # fused QKV: [B*4, 3*dim]
    bias = attn_bias[...]                                          # rel-pos bias + batch mask
    o = None
    for hd in range(n_heads):
        lo = hd * HEAD_DIM
        q = qkv[:, lo:lo + HEAD_DIM]
        k = qkv[:, dim + lo:dim + lo + HEAD_DIM]
        v = qkv[:, 2 * dim + lo:2 * dim + lo + HEAD_DIM]
        sc = _mm_nt(q, k) * scale + bias                           # [B*4, B*4]
        sc = sc - jnp.max(sc, axis=-1, keepdims=True)
        e = jnp.exp(sc)
        p = e * pl.reciprocal(jnp.sum(e, axis=-1, keepdims=True), approx=True)
        oh = _mm(_mm(p, v), W8("merge_h%d" % hd))                  # per-head merge partial
        o = oh if o is None else o + oh
    o = o + V("merge_b")                                           # [B*4, 32]
    x = r + o                                                      # fused residual add

    t = _ln(x, V("ln2_g"), V("ln2_b"))                             # FFN branch
    t = _gelu(_mm(t, W32("ffn_w1")) + V("ffn_b1"))
    t = _mm(t, ffn_w2[...]) + V("ffn_b2")
    x = x + t                                                      # fused residual add

    # ---------------- head: AdaptiveAvgPool2d(1) + Linear -------------------
    pooled = _mm(P("hmat"), x) * inv_n3                            # [B, 32]
    out_ref[...] = _mm(pooled, W32("fc")) + V("fc_b")              # [B, 10]


# ----------------------------------------------------------------------------
# forward wrapper (one pallas_call; tiny XLA glue for im2col + operand packing)
# ----------------------------------------------------------------------------
def coatnet_forward(params, x_nchw):
    p0, p1, p2 = params["s0"], params["s1"], params["s2"]
    B, c_in, H, W = map(int, x_nchw.shape)

    # static stage geometry
    H1, W1 = _conv_out(H, 3, 2, 1), _conv_out(W, 3, 2, 1)      # stem   16x16 -> 8x8
    H2, W2 = _conv_out(H1, 3, 2, 1), _conv_out(W1, 3, 2, 1)    # MBConv  8x8 -> 4x4
    H3, W3 = _conv_out(H2, 3, 2, 1), _conv_out(W2, 3, 2, 1)    # ConvT   4x4 -> 2x2
    N2, N3 = H2 * W2, H3 * W3
    c2_in = int(p2["ln1_g"].shape[1])
    n_heads = c2_in // HEAD_DIM
    dim = n_heads * HEAD_DIM
    scale = float(dim) ** -0.5

    # ---- shape-only numpy constants ----------------------------------------
    mb_sel = _window_select_np(B, H1, W1, 2, "center")   # MBConv pool + s2 subsample
    dw_sel = _window_select_np(B, H2, W2, 1, "zero")     # depthwise 3x3 (zero pad)
    ct_sel = _window_select_np(B, H2, W2, 2, "center")   # ConvTransformer max-pools
    bmat = _batch_indicator_np(B, N2)                    # SE pool / broadcast
    hmat = _batch_indicator_np(B, N3)                    # head avg-pool
    bexp = np.ascontiguousarray(bmat.T)                  # [B*N2, B] row broadcast
    xmask = np.full((B * N3, B * N3), _NEG, np.float32)  # cross-batch softmax mask
    for b in range(B):
        xmask[b * N3:(b + 1) * N3, b * N3:(b + 1) * N3] = 0.0

    # ---- traced glue: NCHW->NHWC, stem im2col, attention bias tiling -------
    x = jnp.transpose(x_nchw, (0, 2, 3, 1)).astype(jnp.float32)
    xp = jnp.pad(x, ((0, 0), (1, 1), (1, 1), (0, 0)))
    taps = [xp[:, kh:kh + 2 * (H1 - 1) + 1:2, kw:kw + 2 * (W1 - 1) + 1:2, :]
            for kh in range(3) for kw in range(3)]
    stem_p = jnp.stack(taps, axis=3).reshape(B * H1 * W1, 9 * c_in).astype(jnp.bfloat16)
    attn_bias = (jnp.tile(p2["bias2d"], (B, B)) + jnp.asarray(xmask)).astype(jnp.float32)

    # ---- packed operand slabs (cuts ~50 small DMAs down to 13) -------------
    vec_entries = [
        ("stem_g", p0["bn_g"]), ("stem_b", p0["bn_b"]),
        ("mb_proj_b", p1["proj_b"]), ("pre_g", p1["pre_g"]), ("pre_b", p1["pre_b"]),
        ("bn_a_g", p1["bn_a_g"]), ("bn_a_b", p1["bn_a_b"]),
    ]
    vec_entries += [("dw_w%d" % k, p1["dw_w"][k:k + 1, :]) for k in range(9)]
    vec_entries += [
        ("bn_dw_g", p1["bn_dw_g"]), ("bn_dw_b", p1["bn_dw_b"]),
        ("se1_b", p1["se1_b"]), ("se2_b", p1["se2_b"]),
        ("conv_b_b", p1["conv_b_b"]),
        ("ct_proj_b", p2["proj_b"]), ("ln1_g", p2["ln1_g"]), ("ln1_b", p2["ln1_b"]),
        ("qkv_b", p2["qkv_b"]), ("merge_b", p2["merge_b"]),
        ("ln2_g", p2["ln2_g"]), ("ln2_b", p2["ln2_b"]),
        ("ffn_b1", p2["ffn_b1"]), ("ffn_b2", p2["ffn_b2"]),
        ("fc_b", params["fc_b"]),
    ]
    vec, voff = _pack_cols(vec_entries, jnp.float32)        # VPU math stays f32 (v5e-safe)

    w8_entries = [("mb_proj", p1["proj_w"]), ("conv_a", p1["conv_a_w"]),
                  ("se2", p1["se2_w"])]
    w8_entries += [("merge_h%d" % hd,
                    p2["merge_w"][hd * HEAD_DIM:(hd + 1) * HEAD_DIM, :])
                   for hd in range(n_heads)]
    w8, w8off = _pack_cols(w8_entries, jnp.bfloat16)

    w16, w16off = _pack_cols([("ct_proj", p2["proj_w"]), ("qkv", p2["qkv_w"])],
                             jnp.bfloat16)
    w32, w32off = _pack_cols([("se1", p1["se1_w"]), ("conv_b", p1["conv_b_w"]),
                              ("ffn_w1", p2["ffn_w1"]), ("fc", params["fc_w"])],
                             jnp.bfloat16)
    pool, poff = _pack_cols([("bmat", bmat), ("hmat", hmat)], jnp.bfloat16)

    off = {}
    off.update({"v:" + k: v for k, v in voff.items()})
    off.update({"w8:" + k: v for k, v in w8off.items()})
    off.update({"w16:" + k: v for k, v in w16off.items()})
    off.update({"w32:" + k: v for k, v in w32off.items()})
    off.update({"p:" + k: v for k, v in poff.items()})

    operands = [
        stem_p,                                     # bf16 im2col patches [B*H1*W1, 9*c_in]
        jnp.asarray(mb_sel, jnp.bfloat16),          # 0/1 tap-gather matrices
        jnp.asarray(dw_sel, jnp.bfloat16),
        jnp.asarray(ct_sel, jnp.bfloat16),
        jnp.asarray(p0["conv_w"], jnp.bfloat16),    # stem im2col weight [36, 8]
        w8, w16, w32,                               # packed bf16 weight slabs
        jnp.asarray(p2["ffn_w2"], jnp.bfloat16),    # [128, 32]
        pool,                                       # packed pooling indicators
        jnp.asarray(bexp, jnp.bfloat16),            # [B*N2, B] SE broadcast
        vec,                                        # packed f32 vector slab
        attn_bias,                                  # f32 rel-pos bias + batch mask
    ]

    kernel = functools.partial(_coatnet_kernel, off=off, n_heads=n_heads,
                               scale=scale, inv_n2=1.0 / N2, inv_n3=1.0 / N3)
    # NOTE: grid=() keeps the whole net on one TensorCore; a batch-parallel
    # grid (v7x second core) would need cross-core BatchNorm statistics.
    return pl.pallas_call(
        kernel,
        out_shape=jax.ShapeDtypeStruct((B, NUM_CLASSES), jnp.float32),
        in_specs=[_VMEM() for _ in operands],
        out_specs=_VMEM(),
    )(*operands)


# ----------------------------------------------------------------------------
# deterministic parameter init (kernel-ready layouts)
# ----------------------------------------------------------------------------
def relative_position_index(h, w):
    coords = np.stack(np.meshgrid(np.arange(h), np.arange(w), indexing="ij"))
    coords_flat = coords.reshape(2, -1)
    rel = coords_flat[:, :, None] - coords_flat[:, None, :]
    rel = rel.transpose(1, 2, 0).astype(np.int64).copy()
    rel[:, :, 0] += h - 1
    rel[:, :, 1] += w - 1
    rel[:, :, 0] *= 2 * w - 1
    return rel.sum(-1).reshape(-1)


def init_params(seed=42):
    base = jax.random.PRNGKey(seed)
    ctr = [0]

    def rnd(shape, scale=0.05):
        ctr[0] += 1
        return scale * jax.random.normal(jax.random.fold_in(base, ctr[0]),
                                         shape, jnp.float32)

    ones = lambda n: jnp.ones((1, n), jnp.float32)
    zeros = lambda n: jnp.zeros((1, n), jnp.float32)
    row = lambda n: rnd((1, n))

    params = {}

    # stage 0: ConvStem 4 -> 8, stride 2.  HWIO [3,3,4,8] reshaped to the
    # im2col weight [9*Cin, Cout] with rows ordered (kh, kw, cin).
    params["s0"] = dict(conv_w=rnd((3, 3, 4, 8)).reshape(36, 8),
                        bn_g=ones(8), bn_b=zeros(8))

    # stage 1: MBConv 8 -> 16 (expand 4 -> mid 32, SE squeeze 8, stride 2)
    params["s1"] = dict(
        proj_w=rnd((8, 16)), proj_b=row(16),
        pre_g=ones(8), pre_b=zeros(8),
        conv_a_w=rnd((8, 32)), bn_a_g=ones(32), bn_a_b=zeros(32),
        dw_w=rnd((9, 32)),                        # [tap, channel], tap = kh*3+kw
        bn_dw_g=ones(32), bn_dw_b=zeros(32),
        se1_w=rnd((32, 8)), se1_b=row(8),
        se2_w=rnd((8, 32)), se2_b=row(32),
        conv_b_w=rnd((32, 16)), conv_b_b=row(16),
    )

    # stage 2: ConvTransformer 16 -> 32, head_dim 8 -> 2 heads, 4x4 -> 2x2
    h = w = 2
    n_heads = 16 // HEAD_DIM
    dim = n_heads * HEAD_DIM

    # reproduces torch.gather(table, 0, index[:, None]): only column (head) 0
    # is ever read; precompute the [N, N] bias once at init.
    table = rnd(((2 * h - 1) * (2 * w - 1), n_heads)) * (0.02 / 0.05)
    idx = relative_position_index(h, w)
    bias2d = table[idx, 0].reshape(h * w, h * w)

    params["s2"] = dict(
        proj_w=rnd((16, 32)), proj_b=row(32),
        ln1_g=ones(16), ln1_b=zeros(16),
        qkv_w=rnd((16, 3 * dim)), qkv_b=row(3 * dim),
        bias2d=bias2d,
        merge_w=rnd((16, 32)), merge_b=row(32),
        ln2_g=ones(32), ln2_b=zeros(32),
        ffn_w1=rnd((32, 128)), ffn_b1=row(128),
        ffn_w2=rnd((128, 32)), ffn_b2=row(32),
    )

    # classification head
    params["fc_w"] = rnd((32, NUM_CLASSES))
    params["fc_b"] = row(NUM_CLASSES)
    return params


if __name__ == "__main__":
    params = init_params()
    x = jax.random.normal(jax.random.PRNGKey(0), (2, 4, 16, 16), jnp.float32)
    logits = jax.jit(coatnet_forward)(params, x)
    jax.block_until_ready(logits)
    assert logits.shape == (2, NUM_CLASSES), logits.shape
    assert bool(jnp.all(jnp.isfinite(logits)))
    print("KERNEL_OK")
</pallas_src>

<mosaic_0001>
module attributes {stable_mosaic.version = 11 : i64} {
  func.func @_coatnet_kernel(%arg0: memref<128x36xbf16, #tpu.memory_space<vmem>>, %arg1: memref<9x32x128xbf16, #tpu.memory_space<vmem>>, %arg2: memref<9x32x32xbf16, #tpu.memory_space<vmem>>, %arg3: memref<9x8x32xbf16, #tpu.memory_space<vmem>>, %arg4: memref<36x8xbf16, #tpu.memory_space<vmem>>, %arg5: memref<8x640xbf16, #tpu.memory_space<vmem>>, %arg6: memref<16x256xbf16, #tpu.memory_space<vmem>>, %arg7: memref<32x512xbf16, #tpu.memory_space<vmem>>, %arg8: memref<128x32xbf16, #tpu.memory_space<vmem>>, %arg9: memref<2x256xbf16, #tpu.memory_space<vmem>>, %arg10: memref<32x2xbf16, #tpu.memory_space<vmem>>, %arg11: memref<1x3968xf32, #tpu.memory_space<vmem>>, %arg12: memref<8x8xf32, #tpu.memory_space<vmem>>, %arg13: memref<2x10xf32, #tpu.memory_space<vmem>>) attributes {dimension_semantics = [], scalar_prefetch = 0 : i64, scratch_operands = 0 : i64, tpu.core_type = #tpu.core_type<tc>} {
    %c0 = arith.constant 0 : index
    %c0_0 = arith.constant 0 : index
    %0 = vector.load %arg0[%c0, %c0_0] : memref<128x36xbf16, #tpu.memory_space<vmem>>, vector<128x36xbf16>
    %c0_1 = arith.constant 0 : index
    %c0_2 = arith.constant 0 : index
    %1 = vector.load %arg4[%c0_1, %c0_2] : memref<36x8xbf16, #tpu.memory_space<vmem>>, vector<36x8xbf16>
    %cst = arith.constant dense<0.000000e+00> : vector<128x8xf32>
    %2 = tpu.matmul %0, %1, %cst {dimension_numbers = #tpu.dot_dimension_numbers<[1], [0], [0], [1], [0, 0, 1, 1], [], []>} : vector<128x36xbf16>, vector<36x8xbf16>, vector<128x8xf32> -> vector<128x8xf32>
    %c0_3 = arith.constant 0 : index
    %c0_4 = arith.constant 0 : index
    %3 = vector.load %arg11[%c0_3, %c0_4] : memref<1x3968xf32, #tpu.memory_space<vmem>>, vector<1x8xf32>
    %c0_5 = arith.constant 0 : index
    %c128 = arith.constant 128 : index
    %4 = vector.load %arg11[%c0_5, %c128] : memref<1x3968xf32, #tpu.memory_space<vmem>>, vector<1x8xf32>
    %cst_6 = arith.constant dense<0.000000e+00> : vector<8xf32>
    %5 = vector.multi_reduction <add>, %2, %cst_6 [0] : vector<128x8xf32> to vector<8xf32>
    %6 = vector.shape_cast %5 : vector<8xf32> to vector<1x8xf32>
    %cst_7 = arith.constant 1.280000e+02 : f32
    %7 = vector.broadcast %cst_7 : f32 to vector<1x8xf32>
    %8 = arith.divf %6, %7 : vector<1x8xf32>
    %9 = arith.mulf %2, %2 : vector<128x8xf32>
    %cst_8 = arith.constant dense<0.000000e+00> : vector<8xf32>
    %10 = vector.multi_reduction <add>, %9, %cst_8 [0] : vector<128x8xf32> to vector<8xf32>
    %11 = vector.shape_cast %10 : vector<8xf32> to vector<1x8xf32>
    %cst_9 = arith.constant 1.280000e+02 : f32
    %12 = vector.broadcast %cst_9 : f32 to vector<1x8xf32>
    %13 = arith.divf %11, %12 : vector<1x8xf32>
    %14 = arith.mulf %8, %8 : vector<1x8xf32>
    %15 = arith.subf %13, %14 : vector<1x8xf32>
    %cst_10 = arith.constant 0.000000e+00 : f32
    %16 = vector.broadcast %cst_10 : f32 to vector<1x8xf32>
    %17 = arith.maximumf %15, %16 : vector<1x8xf32>
    %18 = vector.broadcast %8 : vector<1x8xf32> to vector<128x8xf32>
    %19 = arith.subf %2, %18 : vector<128x8xf32>
    %cst_11 = arith.constant 9.99999974E-6 : f32
    %20 = vector.broadcast %cst_11 : f32 to vector<1x8xf32>
    %21 = arith.addf %17, %20 : vector<1x8xf32>
    %22 = math.rsqrt %21 : vector<1x8xf32>
    %23 = vector.broadcast %22 : vector<1x8xf32> to vector<128x8xf32>
    %24 = arith.mulf %19, %23 : vector<128x8xf32>
    %25 = vector.broadcast %3 : vector<1x8xf32> to vector<128x8xf32>
    %26 = arith.mulf %24, %25 : vector<128x8xf32>
    %27 = vector.broadcast %4 : vector<1x8xf32> to vector<128x8xf32>
    %28 = arith.addf %26, %27 : vector<128x8xf32>
    %cst_12 = arith.constant 0.707106769 : f32
    %29 = vector.broadcast %cst_12 : f32 to vector<128x8xf32>
    %30 = arith.mulf %28, %29 : vector<128x8xf32>
    %cst_13 = arith.constant 0.000000e+00 : f32
    %31 = vector.broadcast %cst_13 : f32 to vector<128x8xf32>
    %32 = arith.cmpf oge, %30, %31 : vector<128x8xf32>
    %cst_14 = arith.constant 1.000000e+00 : f32
    %cst_15 = arith.constant -1.000000e+00 : f32
    %33 = vector.broadcast %cst_14 : f32 to vector<128x8xf32>
    %34 = vector.broadcast %cst_15 : f32 to vector<128x8xf32>
    %35 = arith.select %32, %33, %34 : vector<128x8xi1>, vector<128x8xf32>
    %36 = math.absf %30 : vector<128x8xf32>
    %cst_16 = arith.constant 0.327591091 : f32
    %37 = vector.broadcast %cst_16 : f32 to vector<128x8xf32>
    %38 = arith.mulf %37, %36 : vector<128x8xf32>
    %cst_17 = arith.constant 1.000000e+00 : f32
    %39 = vector.broadcast %cst_17 : f32 to vector<128x8xf32>
    %40 = arith.addf %39, %38 : vector<128x8xf32>
    %cst_18 = arith.constant 1.000000e+00 : f32
    %41 = vector.broadcast %cst_18 : f32 to vector<128x8xf32>
    %42 = arith.divf %41, %40 : vector<128x8xf32>
    %cst_19 = arith.constant 1.06140542 : f32
    %43 = vector.broadcast %cst_19 : f32 to vector<128x8xf32>
    %44 = arith.mulf %43, %42 : vector<128x8xf32>
    %cst_20 = arith.constant 1.45315206 : f32
    %45 = vector.broadcast %cst_20 : f32 to vector<128x8xf32>
    %46 = arith.subf %44, %45 : vector<128x8xf32>
    %47 = arith.mulf %46, %42 : vector<128x8xf32>
    %cst_21 = arith.constant 1.42141378 : f32
    %48 = vector.broadcast %cst_21 : f32 to vector<128x8xf32>
    %49 = arith.addf %47, %48 : vector<128x8xf32>
    %50 = arith.mulf %49, %42 : vector<128x8xf32>
    %cst_22 = arith.constant 0.284496725 : f32
    %51 = vector.broadcast %cst_22 : f32 to vector<128x8xf32>
    %52 = arith.subf %50, %51 : vector<128x8xf32>
    %53 = arith.mulf %52, %42 : vector<128x8xf32>
    %cst_23 = arith.constant 0.254829586 : f32
    %54 = vector.broadcast %cst_23 : f32 to vector<128x8xf32>
    %55 = arith.addf %53, %54 : vector<128x8xf32>
    %56 = arith.mulf %55, %42 : vector<128x8xf32>
    %cst_24 = arith.constant 0.000000e+00 : f32
    %57 = vector.broadcast %cst_24 : f32 to vector<128x8xf32>
    %58 = arith.subf %57, %36 : vector<128x8xf32>
    %59 = arith.mulf %58, %36 : vector<128x8xf32>
    %60 = math.exp %59 : vector<128x8xf32>
    %61 = arith.mulf %56, %60 : vector<128x8xf32>
    %cst_25 = arith.constant 1.000000e+00 : f32
    %62 = vector.broadcast %cst_25 : f32 to vector<128x8xf32>
    %63 = arith.subf %62, %61 : vector<128x8xf32>
    %64 = arith.mulf %35, %63 : vector<128x8xf32>
    %cst_26 = arith.constant 5.000000e-01 : f32
    %65 = vector.broadcast %cst_26 : f32 to vector<128x8xf32>
    %66 = arith.mulf %65, %28 : vector<128x8xf32>
    %cst_27 = arith.constant 1.000000e+00 : f32
    %67 = vector.broadcast %cst_27 : f32 to vector<128x8xf32>
    %68 = arith.addf %67, %64 : vector<128x8xf32>
    %69 = arith.mulf %66, %68 : vector<128x8xf32>
    %70 = arith.truncf %69 : vector<128x8xf32> to vector<128x8xbf16>
    %c0_28 = arith.constant 0 : index
    %c0_29 = arith.constant 0 : index
    %c0_30 = arith.constant 0 : index
    %71 = vector.load %arg1[%c0_28, %c0_29, %c0_30] : memref<9x32x128xbf16, #tpu.memory_space<vmem>>, vector<1x32x128xbf16>
    %72 = vector.shape_cast %71 : vector<1x32x128xbf16> to vector<32x128xbf16>
    %cst_31 = arith.constant dense<0.000000e+00> : vector<32x8xf32>
    %73 = tpu.matmul %72, %70, %cst_31 {dimension_numbers = #tpu.dot_dimension_numbers<[1], [0], [0], [1], [0, 0, 1, 1], [], []>} : vector<32x128xbf16>, vector<128x8xbf16>, vector<32x8xf32> -> vector<32x8xf32>
    %c1 = arith.constant 1 : index
    %c0_32 = arith.constant 0 : index
    %c0_33 = arith.constant 0 : index
    %74 = vector.load %arg1[%c1, %c0_32, %c0_33] : memref<9x32x128xbf16, #tpu.memory_space<vmem>>, vector<1x32x128xbf16>
    %75 = vector.shape_cast %74 : vector<1x32x128xbf16> to vector<32x128xbf16>
    %cst_34 = arith.constant dense<0.000000e+00> : vector<32x8xf32>
    %76 = tpu.matmul %75, %70, %cst_34 {dimension_numbers = #tpu.dot_dimension_numbers<[1], [0], [0], [1], [0, 0, 1, 1], [], []>} : vector<32x128xbf16>, vector<128x8xbf16>, vector<32x8xf32> -> vector<32x8xf32>
    %c2 = arith.constant 2 : index
    %c0_35 = arith.constant 0 : index
    %c0_36 = arith.constant 0 : index
    %77 = vector.load %arg1[%c2, %c0_35, %c0_36] : memref<9x32x128xbf16, #tpu.memory_space<vmem>>, vector<1x32x128xbf16>
    %78 = vector.shape_cast %77 : vector<1x32x128xbf16> to vector<32x128xbf16>
    %cst_37 = arith.constant dense<0.000000e+00> : vector<32x8xf32>
    %79 = tpu.matmul %78, %70, %cst_37 {dimension_numbers = #tpu.dot_dimension_numbers<[1], [0], [0], [1], [0, 0, 1, 1], [], []>} : vector<32x128xbf16>, vector<128x8xbf16>, vector<32x8xf32> -> vector<32x8xf32>
    %c3 = arith.constant 3 : index
    %c0_38 = arith.constant 0 : index
    %c0_39 = arith.constant 0 : index
    %80 = vector.load %arg1[%c3, %c0_38, %c0_39] : memref<9x32x128xbf16, #tpu.memory_space<vmem>>, vector<1x32x128xbf16>
    %81 = vector.shape_cast %80 : vector<1x32x128xbf16> to vector<32x128xbf16>
    %cst_40 = arith.constant dense<0.000000e+00> : vector<32x8xf32>
    %82 = tpu.matmul %81, %70, %cst_40 {dimension_numbers = #tpu.dot_dimension_numbers<[1], [0], [0], [1], [0, 0, 1, 1], [], []>} : vector<32x128xbf16>, vector<128x8xbf16>, vector<32x8xf32> -> vector<32x8xf32>
    %c4 = arith.constant 4 : index
    %c0_41 = arith.constant 0 : index
    %c0_42 = arith.constant 0 : index
    %83 = vector.load %arg1[%c4, %c0_41, %c0_42] : memref<9x32x128xbf16, #tpu.memory_space<vmem>>, vector<1x32x128xbf16>
    %84 = vector.shape_cast %83 : vector<1x32x128xbf16> to vector<32x128xbf16>
    %cst_43 = arith.constant dense<0.000000e+00> : vector<32x8xf32>
    %85 = tpu.matmul %84, %70, %cst_43 {dimension_numbers = #tpu.dot_dimension_numbers<[1], [0], [0], [1], [0, 0, 1, 1], [], []>} : vector<32x128xbf16>, vector<128x8xbf16>, vector<32x8xf32> -> vector<32x8xf32>
    %c5 = arith.constant 5 : index
    %c0_44 = arith.constant 0 : index
    %c0_45 = arith.constant 0 : index
    %86 = vector.load %arg1[%c5, %c0_44, %c0_45] : memref<9x32x128xbf16, #tpu.memory_space<vmem>>, vector<1x32x128xbf16>
    %87 = vector.shape_cast %86 : vector<1x32x128xbf16> to vector<32x128xbf16>
    %cst_46 = arith.constant dense<0.000000e+00> : vector<32x8xf32>
    %88 = tpu.matmul %87, %70, %cst_46 {dimension_numbers = #tpu.dot_dimension_numbers<[1], [0], [0], [1], [0, 0, 1, 1], [], []>} : vector<32x128xbf16>, vector<128x8xbf16>, vector<32x8xf32> -> vector<32x8xf32>
    %c6 = arith.constant 6 : index
    %c0_47 = arith.constant 0 : index
    %c0_48 = arith.constant 0 : index
    %89 = vector.load %arg1[%c6, %c0_47, %c0_48] : memref<9x32x128xbf16, #tpu.memory_space<vmem>>, vector<1x32x128xbf16>
    %90 = vector.shape_cast %89 : vector<1x32x128xbf16> to vector<32x128xbf16>
    %cst_49 = arith.constant dense<0.000000e+00> : vector<32x8xf32>
    %91 = tpu.matmul %90, %70, %cst_49 {dimension_numbers = #tpu.dot_dimension_numbers<[1], [0], [0], [1], [0, 0, 1, 1], [], []>} : vector<32x128xbf16>, vector<128x8xbf16>, vector<32x8xf32> -> vector<32x8xf32>
    %c7 = arith.constant 7 : index
    %c0_50 = arith.constant 0 : index
    %c0_51 = arith.constant 0 : index
    %92 = vector.load %arg1[%c7, %c0_50, %c0_51] : memref<9x32x128xbf16, #tpu.memory_space<vmem>>, vector<1x32x128xbf16>
    %93 = vector.shape_cast %92 : vector<1x32x128xbf16> to vector<32x128xbf16>
    %cst_52 = arith.constant dense<0.000000e+00> : vector<32x8xf32>
    %94 = tpu.matmul %93, %70, %cst_52 {dimension_numbers = #tpu.dot_dimension_numbers<[1], [0], [0], [1], [0, 0, 1, 1], [], []>} : vector<32x128xbf16>, vector<128x8xbf16>, vector<32x8xf32> -> vector<32x8xf32>
    %c8 = arith.constant 8 : index
    %c0_53 = arith.constant 0 : index
    %c0_54 = arith.constant 0 : index
    %95 = vector.load %arg1[%c8, %c0_53, %c0_54] : memref<9x32x128xbf16, #tpu.memory_space<vmem>>, vector<1x32x128xbf16>
    %96 = vector.shape_cast %95 : vector<1x32x128xbf16> to vector<32x128xbf16>
    %cst_55 = arith.constant dense<0.000000e+00> : vector<32x8xf32>
    %97 = tpu.matmul %96, %70, %cst_55 {dimension_numbers = #tpu.dot_dimension_numbers<[1], [0], [0], [1], [0, 0, 1, 1], [], []>} : vector<32x128xbf16>, vector<128x8xbf16>, vector<32x8xf32> -> vector<32x8xf32>
    %98 = arith.maximumf %73, %76 : vector<32x8xf32>
    %99 = arith.maximumf %79, %82 : vector<32x8xf32>
    %100 = arith.maximumf %85, %88 : vector<32x8xf32>
    %101 = arith.maximumf %91, %94 : vector<32x8xf32>
    %102 = arith.maximumf %98, %99 : vector<32x8xf32>
    %103 = arith.maximumf %100, %101 : vector<32x8xf32>
    %104 = arith.maximumf %102, %103 : vector<32x8xf32>
    %105 = arith.maximumf %104, %97 : vector<32x8xf32>
    %c0_56 = arith.constant 0 : index
    %c0_57 = arith.constant 0 : index
    %106 = vector.load %arg5[%c0_56, %c0_57] : memref<8x640xbf16, #tpu.memory_space<vmem>>, vector<8x16xbf16>
    %107 = arith.truncf %105 : vector<32x8xf32> to vector<32x8xbf16>
    %cst_58 = arith.constant dense<0.000000e+00> : vector<32x16xf32>
    %108 = tpu.matmul %107, %106, %cst_58 {dimension_numbers = #tpu.dot_dimension_numbers<[1], [0], [0], [1], [0, 0, 1, 1], [], []>} : vector<32x8xbf16>, vector<8x16xbf16>, vector<32x16xf32> -> vector<32x16xf32>
    %c0_59 = arith.constant 0 : index
    %c256 = arith.constant 256 : index
    %109 = vector.load %arg11[%c0_59, %c256] : memref<1x3968xf32, #tpu.memory_space<vmem>>, vector<1x16xf32>
    %110 = vector.broadcast %109 : vector<1x16xf32> to vector<32x16xf32>
    %111 = arith.addf %108, %110 : vector<32x16xf32>
    %cst_60 = arith.constant dense<0.000000e+00> : vector<8xf32>
    %112 = vector.multi_reduction <add>, %69, %cst_60 [0] : vector<128x8xf32> to vector<8xf32>
    %113 = vector.shape_cast %112 : vector<8xf32> to vector<1x8xf32>
    %cst_61 = arith.constant 1.280000e+02 : f32
    %114 = vector.broadcast %cst_61 : f32 to vector<1x8xf32>
    %115 = arith.divf %113, %114 : vector<1x8xf32>
    %116 = arith.mulf %69, %69 : vector<128x8xf32>
    %cst_62 = arith.constant dense<0.000000e+00> : vector<8xf32>
    %117 = vector.multi_reduction <add>, %116, %cst_62 [0] : vector<128x8xf32> to vector<8xf32>
    %118 = vector.shape_cast %117 : vector<8xf32> to vector<1x8xf32>
    %cst_63 = arith.constant 1.280000e+02 : f32
    %119 = vector.broadcast %cst_63 : f32 to vector<1x8xf32>
    %120 = arith.divf %118, %119 : vector<1x8xf32>
    %121 = arith.mulf %115, %115 : vector<1x8xf32>
    %122 = arith.subf %120, %121 : vector<1x8xf32>
    %cst_64 = arith.constant 0.000000e+00 : f32
    %123 = vector.broadcast %cst_64 : f32 to vector<1x8xf32>
    %124 = arith.maximumf %122, %123 : vector<1x8xf32>
    %c4_65 = arith.constant 4 : index
    %c0_66 = arith.constant 0 : index
    %c0_67 = arith.constant 0 : index
    %125 = vector.load %arg1[%c4_65, %c0_66, %c0_67] : memref<9x32x128xbf16, #tpu.memory_space<vmem>>, vector<1x32x128xbf16>
    %126 = vector.shape_cast %125 : vector<1x32x128xbf16> to vector<32x128xbf16>
    %127 = arith.truncf %69 : vector<128x8xf32> to vector<128x8xbf16>
    %cst_68 = arith.constant dense<0.000000e+00> : vector<32x8xf32>
    %128 = tpu.matmul %126, %127, %cst_68 {dimension_numbers = #tpu.dot_dimension_numbers<[1], [0], [0], [1], [0, 0, 1, 1], [], []>} : vector<32x128xbf16>, vector<128x8xbf16>, vector<32x8xf32> -> vector<32x8xf32>
    %129 = vector.broadcast %115 : vector<1x8xf32> to vector<32x8xf32>
    %130 = arith.subf %128, %129 : vector<32x8xf32>
    %cst_69 = arith.constant 9.99999974E-6 : f32
    %131 = vector.broadcast %cst_69 : f32 to vector<1x8xf32>
    %132 = arith.addf %124, %131 : vector<1x8xf32>
    %133 = math.rsqrt %132 : vector<1x8xf32>
    %134 = vector.broadcast %133 : vector<1x8xf32> to vector<32x8xf32>
    %135 = arith.mulf %130, %134 : vector<32x8xf32>
    %c0_70 = arith.constant 0 : index
    %c384 = arith.constant 384 : index
    %136 = vector.load %arg11[%c0_70, %c384] : memref<1x3968xf32, #tpu.memory_space<vmem>>, vector<1x8xf32>
    %137 = vector.broadcast %136 : vector<1x8xf32> to vector<32x8xf32>
    %138 = arith.mulf %135, %137 : vector<32x8xf32>
    %c0_71 = arith.constant 0 : index
    %c512 = arith.constant 512 : index
    %139 = vector.load %arg11[%c0_71, %c512] : memref<1x3968xf32, #tpu.memory_space<vmem>>, vector<1x8xf32>
    %140 = vector.broadcast %139 : vector<1x8xf32> to vector<32x8xf32>
    %141 = arith.addf %138, %140 : vector<32x8xf32>
    %c0_72 = arith.constant 0 : index
    %c128_73 = arith.constant 128 : index
    %142 = vector.load %arg5[%c0_72, %c128_73] : memref<8x640xbf16, #tpu.memory_space<vmem>>, vector<8x32xbf16>
    %143 = arith.truncf %141 : vector<32x8xf32> to vector<32x8xbf16>
    %cst_74 = arith.constant dense<0.000000e+00> : vector<32x32xf32>
    %144 = tpu.matmul %143, %142, %cst_74 {dimension_numbers = #tpu.dot_dimension_numbers<[1], [0], [0], [1], [0, 0, 1, 1], [], []>} : vector<32x8xbf16>, vector<8x32xbf16>, vector<32x32xf32> -> vector<32x32xf32>
    %c0_75 = arith.constant 0 : index
    %c640 = arith.constant 640 : index
    %145 = vector.load %arg11[%c0_75, %c640] : memref<1x3968xf32, #tpu.memory_space<vmem>>, vector<1x32xf32>
    %c0_76 = arith.constant 0 : index
    %c768 = arith.constant 768 : index
    %146 = vector.load %arg11[%c0_76, %c768] : memref<1x3968xf32, #tpu.memory_space<vmem>>, vector<1x32xf32>
    %cst_77 = arith.constant dense<0.000000e+00> : vector<32xf32>
    %147 = vector.multi_reduction <add>, %144, %cst_77 [0] : vector<32x32xf32> to vector<32xf32>
    %148 = vector.shape_cast %147 : vector<32xf32> to vector<1x32xf32>
    %cst_78 = arith.constant 3.200000e+01 : f32
    %149 = vector.broadcast %cst_78 : f32 to vector<1x32xf32>
    %150 = arith.divf %148, %149 : vector<1x32xf32>
    %151 = arith.mulf %144, %144 : vector<32x32xf32>
    %cst_79 = arith.constant dense<0.000000e+00> : vector<32xf32>
    %152 = vector.multi_reduction <add>, %151, %cst_79 [0] : vector<32x32xf32> to vector<32xf32>
    %153 = vector.shape_cast %152 : vector<32xf32> to vector<1x32xf32>
    %cst_80 = arith.constant 3.200000e+01 : f32
    %154 = vector.broadcast %cst_80 : f32 to vector<1x32xf32>
    %155 = arith.divf %153, %154 : vector<1x32xf32>
    %156 = arith.mulf %150, %150 : vector<1x32xf32>
    %157 = arith.subf %155, %156 : vector<1x32xf32>
    %cst_81 = arith.constant 0.000000e+00 : f32
    %158 = vector.broadcast %cst_81 : f32 to vector<1x32xf32>
    %159 = arith.maximumf %157, %158 : vector<1x32xf32>
    %160 = vector.broadcast %150 : vector<1x32xf32> to vector<32x32xf32>
    %161 = arith.subf %144, %160 : vector<32x32xf32>
    %cst_82 = arith.constant 9.99999974E-6 : f32
    %162 = vector.broadcast %cst_82 : f32 to vector<1x32xf32>
    %163 = arith.addf %159, %162 : vector<1x32xf32>
    %164 = math.rsqrt %163 : vector<1x32xf32>
    %165 = vector.broadcast %164 : vector<1x32xf32> to vector<32x32xf32>
    %166 = arith.mulf %161, %165 : vector<32x32xf32>
    %167 = vector.broadcast %145 : vector<1x32xf32> to vector<32x32xf32>
    %168 = arith.mulf %166, %167 : vector<32x32xf32>
    %169 = vector.broadcast %146 : vector<1x32xf32> to vector<32x32xf32>
    %170 = arith.addf %168, %169 : vector<32x32xf32>
    %cst_83 = arith.constant 0.707106769 : f32
    %171 = vector.broadcast %cst_83 : f32 to vector<32x32xf32>
    %172 = arith.mulf %170, %171 : vector<32x32xf32>
    %cst_84 = arith.constant 0.000000e+00 : f32
    %173 = vector.broadcast %cst_84 : f32 to vector<32x32xf32>
    %174 = arith.cmpf oge, %172, %173 : vector<32x32xf32>
    %cst_85 = arith.constant 1.000000e+00 : f32
    %cst_86 = arith.constant -1.000000e+00 : f32
    %175 = vector.broadcast %cst_85 : f32 to vector<32x32xf32>
    %176 = vector.broadcast %cst_86 : f32 to vector<32x32xf32>
    %177 = arith.select %174, %175, %176 : vector<32x32xi1>, vector<32x32xf32>
    %178 = math.absf %172 : vector<32x32xf32>
    %cst_87 = arith.constant 0.327591091 : f32
    %179 = vector.broadcast %cst_87 : f32 to vector<32x32xf32>
    %180 = arith.mulf %179, %178 : vector<32x32xf32>
    %cst_88 = arith.constant 1.000000e+00 : f32
    %181 = vector.broadcast %cst_88 : f32 to vector<32x32xf32>
    %182 = arith.addf %181, %180 : vector<32x32xf32>
    %cst_89 = arith.constant 1.000000e+00 : f32
    %183 = vector.broadcast %cst_89 : f32 to vector<32x32xf32>
    %184 = arith.divf %183, %182 : vector<32x32xf32>
    %cst_90 = arith.constant 1.06140542 : f32
    %185 = vector.broadcast %cst_90 : f32 to vector<32x32xf32>
    %186 = arith.mulf %185, %184 : vector<32x32xf32>
    %cst_91 = arith.constant 1.45315206 : f32
    %187 = vector.broadcast %cst_91 : f32 to vector<32x32xf32>
    %188 = arith.subf %186, %187 : vector<32x32xf32>
    %189 = arith.mulf %188, %184 : vector<32x32xf32>
    %cst_92 = arith.constant 1.42141378 : f32
    %190 = vector.broadcast %cst_92 : f32 to vector<32x32xf32>
    %191 = arith.addf %189, %190 : vector<32x32xf32>
    %192 = arith.mulf %191, %184 : vector<32x32xf32>
    %cst_93 = arith.constant 0.284496725 : f32
    %193 = vector.broadcast %cst_93 : f32 to vector<32x32xf32>
    %194 = arith.subf %192, %193 : vector<32x32xf32>
    %195 = arith.mulf %194, %184 : vector<32x32xf32>
    %cst_94 = arith.constant 0.254829586 : f32
    %196 = vector.broadcast %cst_94 : f32 to vector<32x32xf32>
    %197 = arith.addf %195, %196 : vector<32x32xf32>
    %198 = arith.mulf %197, %184 : vector<32x32xf32>
    %cst_95 = arith.constant 0.000000e+00 : f32
    %199 = vector.broadcast %cst_95 : f32 to vector<32x32xf32>
    %200 = arith.subf %199, %178 : vector<32x32xf32>
    %201 = arith.mulf %200, %178 : vector<32x32xf32>
    %202 = math.exp %201 : vector<32x32xf32>
    %203 = arith.mulf %198, %202 : vector<32x32xf32>
    %cst_96 = arith.constant 1.000000e+00 : f32
    %204 = vector.broadcast %cst_96 : f32 to vector<32x32xf32>
    %205 = arith.subf %204, %203 : vector<32x32xf32>
    %206 = arith.mulf %177, %205 : vector<32x32xf32>
    %cst_97 = arith.constant 5.000000e-01 : f32
    %207 = vector.broadcast %cst_97 : f32 to vector<32x32xf32>
    %208 = arith.mulf %207, %170 : vector<32x32xf32>
    %cst_98 = arith.constant 1.000000e+00 : f32
    %209 = vector.broadcast %cst_98 : f32 to vector<32x32xf32>
    %210 = arith.addf %209, %206 : vector<32x32xf32>
    %211 = arith.mulf %208, %210 : vector<32x32xf32>
    %c0_99 = arith.constant 0 : index
    %c896 = arith.constant 896 : index
    %212 = vector.load %arg11[%c0_99, %c896] : memref<1x3968xf32, #tpu.memory_space<vmem>>, vector<1x32xf32>
    %c0_100 = arith.constant 0 : index
    %c1024 = arith.constant 1024 : index
    %213 = vector.load %arg11[%c0_100, %c1024] : memref<1x3968xf32, #tpu.memory_space<vmem>>, vector<1x32xf32>
    %c0_101 = arith.constant 0 : index
    %c1152 = arith.constant 1152 : index
    %214 = vector.load %arg11[%c0_101, %c1152] : memref<1x3968xf32, #tpu.memory_space<vmem>>, vector<1x32xf32>
    %c0_102 = arith.constant 0 : index
    %c1280 = arith.constant 1280 : index
    %215 = vector.load %arg11[%c0_102, %c1280] : memref<1x3968xf32, #tpu.memory_space<vmem>>, vector<1x32xf32>
    %c0_103 = arith.constant 0 : index
    %c1408 = arith.constant 1408 : index
    %216 = vector.load %arg11[%c0_103, %c1408] : memref<1x3968xf32, #tpu.memory_space<vmem>>, vector<1x32xf32>
    %c0_104 = arith.constant 0 : index
    %c1536 = arith.constant 1536 : index
    %217 = vector.load %arg11[%c0_104, %c1536] : memref<1x3968xf32, #tpu.memory_space<vmem>>, vector<1x32xf32>
    %c0_105 = arith.constant 0 : index
    %c1664 = arith.constant 1664 : index
    %218 = vector.load %arg11[%c0_105, %c1664] : memref<1x3968xf32, #tpu.memory_space<vmem>>, vector<1x32xf32>
    %c0_106 = arith.constant 0 : index
    %c1792 = arith.constant 1792 : index
    %219 = vector.load %arg11[%c0_106, %c1792] : memref<1x3968xf32, #tpu.memory_space<vmem>>, vector<1x32xf32>
    %c0_107 = arith.constant 0 : index
    %c1920 = arith.constant 1920 : index
    %220 = vector.load %arg11[%c0_107, %c1920] : memref<1x3968xf32, #tpu.memory_space<vmem>>, vector<1x32xf32>
    %221 = arith.truncf %211 : vector<32x32xf32> to vector<32x32xbf16>
    %c0_108 = arith.constant 0 : index
    %c0_109 = arith.constant 0 : index
    %c0_110 = arith.constant 0 : index
    %222 = vector.load %arg2[%c0_108, %c0_109, %c0_110] : memref<9x32x32xbf16, #tpu.memory_space<vmem>>, vector<1x32x32xbf16>
    %223 = vector.shape_cast %222 : vector<1x32x32xbf16> to vector<32x32xbf16>
    %cst_111 = arith.constant dense<0.000000e+00> : vector<32x32xf32>
    %224 = tpu.matmul %223, %221, %cst_111 {dimension_numbers = #tpu.dot_dimension_numbers<[1], [0], [0], [1], [0, 0, 1, 1], [], []>} : vector<32x32xbf16>, vector<32x32xbf16>, vector<32x32xf32> -> vector<32x32xf32>
    %225 = vector.broadcast %212 : vector<1x32xf32> to vector<32x32xf32>
    %226 = arith.mulf %224, %225 : vector<32x32xf32>
    %c1_112 = arith.constant 1 : index
    %c0_113 = arith.constant 0 : index
    %c0_114 = arith.constant 0 : index
    %227 = vector.load %arg2[%c1_112, %c0_113, %c0_114] : memref<9x32x32xbf16, #tpu.memory_space<vmem>>, vector<1x32x32xbf16>
    %228 = vector.shape_cast %227 : vector<1x32x32xbf16> to vector<32x32xbf16>
    %cst_115 = arith.constant dense<0.000000e+00> : vector<32x32xf32>
    %229 = tpu.matmul %228, %221, %cst_115 {dimension_numbers = #tpu.dot_dimension_numbers<[1], [0], [0], [1], [0, 0, 1, 1], [], []>} : vector<32x32xbf16>, vector<32x32xbf16>, vector<32x32xf32> -> vector<32x32xf32>
    %230 = vector.broadcast %213 : vector<1x32xf32> to vector<32x32xf32>
    %231 = arith.mulf %229, %230 : vector<32x32xf32>
    %c2_116 = arith.constant 2 : index
    %c0_117 = arith.constant 0 : index
    %c0_118 = arith.constant 0 : index
    %232 = vector.load %arg2[%c2_116, %c0_117, %c0_118] : memref<9x32x32xbf16, #tpu.memory_space<vmem>>, vector<1x32x32xbf16>
    %233 = vector.shape_cast %232 : vector<1x32x32xbf16> to vector<32x32xbf16>
    %cst_119 = arith.constant dense<0.000000e+00> : vector<32x32xf32>
    %234 = tpu.matmul %233, %221, %cst_119 {dimension_numbers = #tpu.dot_dimension_numbers<[1], [0], [0], [1], [0, 0, 1, 1], [], []>} : vector<32x32xbf16>, vector<32x32xbf16>, vector<32x32xf32> -> vector<32x32xf32>
    %235 = vector.broadcast %214 : vector<1x32xf32> to vector<32x32xf32>
    %236 = arith.mulf %234, %235 : vector<32x32xf32>
    %c3_120 = arith.constant 3 : index
    %c0_121 = arith.constant 0 : index
    %c0_122 = arith.constant 0 : index
    %237 = vector.load %arg2[%c3_120, %c0_121, %c0_122] : memref<9x32x32xbf16, #tpu.memory_space<vmem>>, vector<1x32x32xbf16>
    %238 = vector.shape_cast %237 : vector<1x32x32xbf16> to vector<32x32xbf16>
    %cst_123 = arith.constant dense<0.000000e+00> : vector<32x32xf32>
    %239 = tpu.matmul %238, %221, %cst_123 {dimension_numbers = #tpu.dot_dimension_numbers<[1], [0], [0], [1], [0, 0, 1, 1], [], []>} : vector<32x32xbf16>, vector<32x32xbf16>, vector<32x32xf32> -> vector<32x32xf32>
    %240 = vector.broadcast %215 : vector<1x32xf32> to vector<32x32xf32>
    %241 = arith.mulf %239, %240 : vector<32x32xf32>
    %c4_124 = arith.constant 4 : index
    %c0_125 = arith.constant 0 : index
    %c0_126 = arith.constant 0 : index
    %242 = vector.load %arg2[%c4_124, %c0_125, %c0_126] : memref<9x32x32xbf16, #tpu.memory_space<vmem>>, vector<1x32x32xbf16>
    %243 = vector.shape_cast %242 : vector<1x32x32xbf16> to vector<32x32xbf16>
    %cst_127 = arith.constant dense<0.000000e+00> : vector<32x32xf32>
    %244 = tpu.matmul %243, %221, %cst_127 {dimension_numbers = #tpu.dot_dimension_numbers<[1], [0], [0], [1], [0, 0, 1, 1], [], []>} : vector<32x32xbf16>, vector<32x32xbf16>, vector<32x32xf32> -> vector<32x32xf32>
    %245 = vector.broadcast %216 : vector<1x32xf32> to vector<32x32xf32>
    %246 = arith.mulf %244, %245 : vector<32x32xf32>
    %c5_128 = arith.constant 5 : index
    %c0_129 = arith.constant 0 : index
    %c0_130 = arith.constant 0 : index
    %247 = vector.load %arg2[%c5_128, %c0_129, %c0_130] : memref<9x32x32xbf16, #tpu.memory_space<vmem>>, vector<1x32x32xbf16>
    %248 = vector.shape_cast %247 : vector<1x32x32xbf16> to vector<32x32xbf16>
    %cst_131 = arith.constant dense<0.000000e+00> : vector<32x32xf32>
    %249 = tpu.matmul %248, %221, %cst_131 {dimension_numbers = #tpu.dot_dimension_numbers<[1], [0], [0], [1], [0, 0, 1, 1], [], []>} : vector<32x32xbf16>, vector<32x32xbf16>, vector<32x32xf32> -> vector<32x32xf32>
    %250 = vector.broadcast %217 : vector<1x32xf32> to vector<32x32xf32>
    %251 = arith.mulf %249, %250 : vector<32x32xf32>
    %c6_132 = arith.constant 6 : index
    %c0_133 = arith.constant 0 : index
    %c0_134 = arith.constant 0 : index
    %252 = vector.load %arg2[%c6_132, %c0_133, %c0_134] : memref<9x32x32xbf16, #tpu.memory_space<vmem>>, vector<1x32x32xbf16>
    %253 = vector.shape_cast %252 : vector<1x32x32xbf16> to vector<32x32xbf16>
    %cst_135 = arith.constant dense<0.000000e+00> : vector<32x32xf32>
    %254 = tpu.matmul %253, %221, %cst_135 {dimension_numbers = #tpu.dot_dimension_numbers<[1], [0], [0], [1], [0, 0, 1, 1], [], []>} : vector<32x32xbf16>, vector<32x32xbf16>, vector<32x32xf32> -> vector<32x32xf32>
    %255 = vector.broadcast %218 : vector<1x32xf32> to vector<32x32xf32>
    %256 = arith.mulf %254, %255 : vector<32x32xf32>
    %c7_136 = arith.constant 7 : index
    %c0_137 = arith.constant 0 : index
    %c0_138 = arith.constant 0 : index
    %257 = vector.load %arg2[%c7_136, %c0_137, %c0_138] : memref<9x32x32xbf16, #tpu.memory_space<vmem>>, vector<1x32x32xbf16>
    %258 = vector.shape_cast %257 : vector<1x32x32xbf16> to vector<32x32xbf16>
    %cst_139 = arith.constant dense<0.000000e+00> : vector<32x32xf32>
    %259 = tpu.matmul %258, %221, %cst_139 {dimension_numbers = #tpu.dot_dimension_numbers<[1], [0], [0], [1], [0, 0, 1, 1], [], []>} : vector<32x32xbf16>, vector<32x32xbf16>, vector<32x32xf32> -> vector<32x32xf32>
    %260 = vector.broadcast %219 : vector<1x32xf32> to vector<32x32xf32>
    %261 = arith.mulf %259, %260 : vector<32x32xf32>
    %c8_140 = arith.constant 8 : index
    %c0_141 = arith.constant 0 : index
    %c0_142 = arith.constant 0 : index
    %262 = vector.load %arg2[%c8_140, %c0_141, %c0_142] : memref<9x32x32xbf16, #tpu.memory_space<vmem>>, vector<1x32x32xbf16>
    %263 = vector.shape_cast %262 : vector<1x32x32xbf16> to vector<32x32xbf16>
    %cst_143 = arith.constant dense<0.000000e+00> : vector<32x32xf32>
    %264 = tpu.matmul %263, %221, %cst_143 {dimension_numbers = #tpu.dot_dimension_numbers<[1], [0], [0], [1], [0, 0, 1, 1], [], []>} : vector<32x32xbf16>, vector<32x32xbf16>, vector<32x32xf32> -> vector<32x32xf32>
    %265 = vector.broadcast %220 : vector<1x32xf32> to vector<32x32xf32>
    %266 = arith.mulf %264, %265 : vector<32x32xf32>
    %267 = arith.addf %226, %231 : vector<32x32xf32>
    %268 = arith.addf %236, %241 : vector<32x32xf32>
    %269 = arith.addf %246, %251 : vector<32x32xf32>
    %270 = arith.addf %256, %261 : vector<32x32xf32>
    %271 = arith.addf %267, %268 : vector<32x32xf32>
    %272 = arith.addf %269, %270 : vector<32x32xf32>
    %273 = arith.addf %271, %272 : vector<32x32xf32>
    %274 = arith.addf %273, %266 : vector<32x32xf32>
    %c0_144 = arith.constant 0 : index
    %c2048 = arith.constant 2048 : index
    %275 = vector.load %arg11[%c0_144, %c2048] : memref<1x3968xf32, #tpu.memory_space<vmem>>, vector<1x32xf32>
    %c0_145 = arith.constant 0 : index
    %c2176 = arith.constant 2176 : index
    %276 = vector.load %arg11[%c0_145, %c2176] : memref<1x3968xf32, #tpu.memory_space<vmem>>, vector<1x32xf32>
    %cst_146 = arith.constant dense<0.000000e+00> : vector<32xf32>
    %277 = vector.multi_reduction <add>, %274, %cst_146 [0] : vector<32x32xf32> to vector<32xf32>
    %278 = vector.shape_cast %277 : vector<32xf32> to vector<1x32xf32>
    %cst_147 = arith.constant 3.200000e+01 : f32
    %279 = vector.broadcast %cst_147 : f32 to vector<1x32xf32>
    %280 = arith.divf %278, %279 : vector<1x32xf32>
    %281 = arith.mulf %274, %274 : vector<32x32xf32>
    %cst_148 = arith.constant dense<0.000000e+00> : vector<32xf32>
    %282 = vector.multi_reduction <add>, %281, %cst_148 [0] : vector<32x32xf32> to vector<32xf32>
    %283 = vector.shape_cast %282 : vector<32xf32> to vector<1x32xf32>
    %cst_149 = arith.constant 3.200000e+01 : f32
    %284 = vector.broadcast %cst_149 : f32 to vector<1x32xf32>
    %285 = arith.divf %283, %284 : vector<1x32xf32>
    %286 = arith.mulf %280, %280 : vector<1x32xf32>
    %287 = arith.subf %285, %286 : vector<1x32xf32>
    %cst_150 = arith.constant 0.000000e+00 : f32
    %288 = vector.broadcast %cst_150 : f32 to vector<1x32xf32>
    %289 = arith.maximumf %287, %288 : vector<1x32xf32>
    %290 = vector.broadcast %280 : vector<1x32xf32> to vector<32x32xf32>
    %291 = arith.subf %274, %290 : vector<32x32xf32>
    %cst_151 = arith.constant 9.99999974E-6 : f32
    %292 = vector.broadcast %cst_151 : f32 to vector<1x32xf32>
    %293 = arith.addf %289, %292 : vector<1x32xf32>
    %294 = math.rsqrt %293 : vector<1x32xf32>
    %295 = vector.broadcast %294 : vector<1x32xf32> to vector<32x32xf32>
    %296 = arith.mulf %291, %295 : vector<32x32xf32>
    %297 = vector.broadcast %275 : vector<1x32xf32> to vector<32x32xf32>
    %298 = arith.mulf %296, %297 : vector<32x32xf32>
    %299 = vector.broadcast %276 : vector<1x32xf32> to vector<32x32xf32>
    %300 = arith.addf %298, %299 : vector<32x32xf32>
    %cst_152 = arith.constant 0.707106769 : f32
    %301 = vector.broadcast %cst_152 : f32 to vector<32x32xf32>
    %302 = arith.mulf %300, %301 : vector<32x32xf32>
    %cst_153 = arith.constant 0.000000e+00 : f32
    %303 = vector.broadcast %cst_153 : f32 to vector<32x32xf32>
    %304 = arith.cmpf oge, %302, %303 : vector<32x32xf32>
    %cst_154 = arith.constant 1.000000e+00 : f32
    %cst_155 = arith.constant -1.000000e+00 : f32
    %305 = vector.broadcast %cst_154 : f32 to vector<32x32xf32>
    %306 = vector.broadcast %cst_155 : f32 to vector<32x32xf32>
    %307 = arith.select %304, %305, %306 : vector<32x32xi1>, vector<32x32xf32>
    %308 = math.absf %302 : vector<32x32xf32>
    %cst_156 = arith.constant 0.327591091 : f32
    %309 = vector.broadcast %cst_156 : f32 to vector<32x32xf32>
    %310 = arith.mulf %309, %308 : vector<32x32xf32>
    %cst_157 = arith.constant 1.000000e+00 : f32
    %311 = vector.broadcast %cst_157 : f32 to vector<32x32xf32>
    %312 = arith.addf %311, %310 : vector<32x32xf32>
    %cst_158 = arith.constant 1.000000e+00 : f32
    %313 = vector.broadcast %cst_158 : f32 to vector<32x32xf32>
    %314 = arith.divf %313, %312 : vector<32x32xf32>
    %cst_159 = arith.constant 1.06140542 : f32
    %315 = vector.broadcast %cst_159 : f32 to vector<32x32xf32>
    %316 = arith.mulf %315, %314 : vector<32x32xf32>
    %cst_160 = arith.constant 1.45315206 : f32
    %317 = vector.broadcast %cst_160 : f32 to vector<32x32xf32>
    %318 = arith.subf %316, %317 : vector<32x32xf32>
    %319 = arith.mulf %318, %314 : vector<32x32xf32>
    %cst_161 = arith.constant 1.42141378 : f32
    %320 = vector.broadcast %cst_161 : f32 to vector<32x32xf32>
    %321 = arith.addf %319, %320 : vector<32x32xf32>
    %322 = arith.mulf %321, %314 : vector<32x32xf32>
    %cst_162 = arith.constant 0.284496725 : f32
    %323 = vector.broadcast %cst_162 : f32 to vector<32x32xf32>
    %324 = arith.subf %322, %323 : vector<32x32xf32>
    %325 = arith.mulf %324, %314 : vector<32x32xf32>
    %cst_163 = arith.constant 0.254829586 : f32
    %326 = vector.broadcast %cst_163 : f32 to vector<32x32xf32>
    %327 = arith.addf %325, %326 : vector<32x32xf32>
    %328 = arith.mulf %327, %314 : vector<32x32xf32>
    %cst_164 = arith.constant 0.000000e+00 : f32
    %329 = vector.broadcast %cst_164 : f32 to vector<32x32xf32>
    %330 = arith.subf %329, %308 : vector<32x32xf32>
    %331 = arith.mulf %330, %308 : vector<32x32xf32>
    %332 = math.exp %331 : vector<32x32xf32>
    %333 = arith.mulf %328, %332 : vector<32x32xf32>
    %cst_165 = arith.constant 1.000000e+00 : f32
    %334 = vector.broadcast %cst_165 : f32 to vector<32x32xf32>
    %335 = arith.subf %334, %333 : vector<32x32xf32>
    %336 = arith.mulf %307, %335 : vector<32x32xf32>
    %cst_166 = arith.constant 5.000000e-01 : f32
    %337 = vector.broadcast %cst_166 : f32 to vector<32x32xf32>
    %338 = arith.mulf %337, %300 : vector<32x32xf32>
    %cst_167 = arith.constant 1.000000e+00 : f32
    %339 = vector.broadcast %cst_167 : f32 to vector<32x32xf32>
    %340 = arith.addf %339, %336 : vector<32x32xf32>
    %341 = arith.mulf %338, %340 : vector<32x32xf32>
    %c0_168 = arith.constant 0 : index
    %c0_169 = arith.constant 0 : index
    %342 = vector.load %arg9[%c0_168, %c0_169] : memref<2x256xbf16, #tpu.memory_space<vmem>>, vector<2x32xbf16>
    %343 = arith.truncf %341 : vector<32x32xf32> to vector<32x32xbf16>
    %cst_170 = arith.constant dense<0.000000e+00> : vector<2x32xf32>
    %344 = tpu.matmul %342, %343, %cst_170 {dimension_numbers = #tpu.dot_dimension_numbers<[1], [0], [0], [1], [0, 0, 1, 1], [], []>} : vector<2x32xbf16>, vector<32x32xbf16>, vector<2x32xf32> -> vector<2x32xf32>
    %cst_171 = arith.constant 6.250000e-02 : f32
    %345 = vector.broadcast %cst_171 : f32 to vector<2x32xf32>
    %346 = arith.mulf %344, %345 : vector<2x32xf32>
    %c0_172 = arith.constant 0 : index
    %c0_173 = arith.constant 0 : index
    %347 = vector.load %arg7[%c0_172, %c0_173] : memref<32x512xbf16, #tpu.memory_space<vmem>>, vector<32x8xbf16>
    %348 = arith.truncf %346 : vector<2x32xf32> to vector<2x32xbf16>
    %cst_174 = arith.constant dense<0.000000e+00> : vector<2x8xf32>
    %349 = tpu.matmul %348, %347, %cst_174 {dimension_numbers = #tpu.dot_dimension_numbers<[1], [0], [0], [1], [0, 0, 1, 1], [], []>} : vector<2x32xbf16>, vector<32x8xbf16>, vector<2x8xf32> -> vector<2x8xf32>
    %c0_175 = arith.constant 0 : index
    %c2304 = arith.constant 2304 : index
    %350 = vector.load %arg11[%c0_175, %c2304] : memref<1x3968xf32, #tpu.memory_space<vmem>>, vector<1x8xf32>
    %351 = vector.broadcast %350 : vector<1x8xf32> to vector<2x8xf32>
    %352 = arith.addf %349, %351 : vector<2x8xf32>
    %cst_176 = arith.constant 0.707106769 : f32
    %353 = vector.broadcast %cst_176 : f32 to vector<2x8xf32>
    %354 = arith.mulf %352, %353 : vector<2x8xf32>
    %cst_177 = arith.constant 0.000000e+00 : f32
    %355 = vector.broadcast %cst_177 : f32 to vector<2x8xf32>
    %356 = arith.cmpf oge, %354, %355 : vector<2x8xf32>
    %cst_178 = arith.constant 1.000000e+00 : f32
    %cst_179 = arith.constant -1.000000e+00 : f32
    %357 = vector.broadcast %cst_178 : f32 to vector<2x8xf32>
    %358 = vector.broadcast %cst_179 : f32 to vector<2x8xf32>
    %359 = arith.select %356, %357, %358 : vector<2x8xi1>, vector<2x8xf32>
    %360 = math.absf %354 : vector<2x8xf32>
    %cst_180 = arith.constant 0.327591091 : f32
    %361 = vector.broadcast %cst_180 : f32 to vector<2x8xf32>
    %362 = arith.mulf %361, %360 : vector<2x8xf32>
    %cst_181 = arith.constant 1.000000e+00 : f32
    %363 = vector.broadcast %cst_181 : f32 to vector<2x8xf32>
    %364 = arith.addf %363, %362 : vector<2x8xf32>
    %cst_182 = arith.constant 1.000000e+00 : f32
    %365 = vector.broadcast %cst_182 : f32 to vector<2x8xf32>
    %366 = arith.divf %365, %364 : vector<2x8xf32>
    %cst_183 = arith.constant 1.06140542 : f32
    %367 = vector.broadcast %cst_183 : f32 to vector<2x8xf32>
    %368 = arith.mulf %367, %366 : vector<2x8xf32>
    %cst_184 = arith.constant 1.45315206 : f32
    %369 = vector.broadcast %cst_184 : f32 to vector<2x8xf32>
    %370 = arith.subf %368, %369 : vector<2x8xf32>
    %371 = arith.mulf %370, %366 : vector<2x8xf32>
    %cst_185 = arith.constant 1.42141378 : f32
    %372 = vector.broadcast %cst_185 : f32 to vector<2x8xf32>
    %373 = arith.addf %371, %372 : vector<2x8xf32>
    %374 = arith.mulf %373, %366 : vector<2x8xf32>
    %cst_186 = arith.constant 0.284496725 : f32
    %375 = vector.broadcast %cst_186 : f32 to vector<2x8xf32>
    %376 = arith.subf %374, %375 : vector<2x8xf32>
    %377 = arith.mulf %376, %366 : vector<2x8xf32>
    %cst_187 = arith.constant 0.254829586 : f32
    %378 = vector.broadcast %cst_187 : f32 to vector<2x8xf32>
    %379 = arith.addf %377, %378 : vector<2x8xf32>
    %380 = arith.mulf %379, %366 : vector<2x8xf32>
    %cst_188 = arith.constant 0.000000e+00 : f32
    %381 = vector.broadcast %cst_188 : f32 to vector<2x8xf32>
    %382 = arith.subf %381, %360 : vector<2x8xf32>
    %383 = arith.mulf %382, %360 : vector<2x8xf32>
    %384 = math.exp %383 : vector<2x8xf32>
    %385 = arith.mulf %380, %384 : vector<2x8xf32>
    %cst_189 = arith.constant 1.000000e+00 : f32
    %386 = vector.broadcast %cst_189 : f32 to vector<2x8xf32>
    %387 = arith.subf %386, %385 : vector<2x8xf32>
    %388 = arith.mulf %359, %387 : vector<2x8xf32>
    %cst_190 = arith.constant 5.000000e-01 : f32
    %389 = vector.broadcast %cst_190 : f32 to vector<2x8xf32>
    %390 = arith.mulf %389, %352 : vector<2x8xf32>
    %cst_191 = arith.constant 1.000000e+00 : f32
    %391 = vector.broadcast %cst_191 : f32 to vector<2x8xf32>
    %392 = arith.addf %391, %388 : vector<2x8xf32>
    %393 = arith.mulf %390, %392 : vector<2x8xf32>
    %c0_192 = arith.constant 0 : index
    %c256_193 = arith.constant 256 : index
    %394 = vector.load %arg5[%c0_192, %c256_193] : memref<8x640xbf16, #tpu.memory_space<vmem>>, vector<8x32xbf16>
    %395 = arith.truncf %393 : vector<2x8xf32> to vector<2x8xbf16>
    %cst_194 = arith.constant dense<0.000000e+00> : vector<2x32xf32>
    %396 = tpu.matmul %395, %394, %cst_194 {dimension_numbers = #tpu.dot_dimension_numbers<[1], [0], [0], [1], [0, 0, 1, 1], [], []>} : vector<2x8xbf16>, vector<8x32xbf16>, vector<2x32xf32> -> vector<2x32xf32>
    %c0_195 = arith.constant 0 : index
    %c2432 = arith.constant 2432 : index
    %397 = vector.load %arg11[%c0_195, %c2432] : memref<1x3968xf32, #tpu.memory_space<vmem>>, vector<1x32xf32>
    %398 = vector.broadcast %397 : vector<1x32xf32> to vector<2x32xf32>
    %399 = arith.addf %396, %398 : vector<2x32xf32>
    %cst_196 = arith.constant 0.000000e+00 : f32
    %400 = vector.broadcast %cst_196 : f32 to vector<2x32xf32>
    %401 = arith.subf %400, %399 : vector<2x32xf32>
    %402 = math.exp %401 : vector<2x32xf32>
    %cst_197 = arith.constant 1.000000e+00 : f32
    %403 = vector.broadcast %cst_197 : f32 to vector<2x32xf32>
    %404 = arith.addf %403, %402 : vector<2x32xf32>
    %405 = tpu.reciprocal %404 {approx = true} : vector<2x32xf32> -> vector<2x32xf32>
    %c0_198 = arith.constant 0 : index
    %c0_199 = arith.constant 0 : index
    %406 = vector.load %arg10[%c0_198, %c0_199] : memref<32x2xbf16, #tpu.memory_space<vmem>>, vector<32x2xbf16>
    %407 = arith.truncf %405 : vector<2x32xf32> to vector<2x32xbf16>
    %cst_200 = arith.constant dense<0.000000e+00> : vector<32x32xf32>
    %408 = tpu.matmul %406, %407, %cst_200 {dimension_numbers = #tpu.dot_dimension_numbers<[1], [0], [0], [1], [0, 0, 1, 1], [], []>} : vector<32x2xbf16>, vector<2x32xbf16>, vector<32x32xf32> -> vector<32x32xf32>
    %409 = arith.mulf %341, %408 : vector<32x32xf32>
    %c0_201 = arith.constant 0 : index
    %c128_202 = arith.constant 128 : index
    %410 = vector.load %arg7[%c0_201, %c128_202] : memref<32x512xbf16, #tpu.memory_space<vmem>>, vector<32x16xbf16>
    %411 = arith.truncf %409 : vector<32x32xf32> to vector<32x32xbf16>
    %cst_203 = arith.constant dense<0.000000e+00> : vector<32x16xf32>
    %412 = tpu.matmul %411, %410, %cst_203 {dimension_numbers = #tpu.dot_dimension_numbers<[1], [0], [0], [1], [0, 0, 1, 1], [], []>} : vector<32x32xbf16>, vector<32x16xbf16>, vector<32x16xf32> -> vector<32x16xf32>
    %c0_204 = arith.constant 0 : index
    %c2560 = arith.constant 2560 : index
    %413 = vector.load %arg11[%c0_204, %c2560] : memref<1x3968xf32, #tpu.memory_space<vmem>>, vector<1x16xf32>
    %414 = vector.broadcast %413 : vector<1x16xf32> to vector<32x16xf32>
    %415 = arith.addf %412, %414 : vector<32x16xf32>
    %416 = arith.addf %111, %415 : vector<32x16xf32>
    %417 = arith.truncf %416 : vector<32x16xf32> to vector<32x16xbf16>
    %c0_205 = arith.constant 0 : index
    %c0_206 = arith.constant 0 : index
    %c0_207 = arith.constant 0 : index
    %418 = vector.load %arg3[%c0_205, %c0_206, %c0_207] : memref<9x8x32xbf16, #tpu.memory_space<vmem>>, vector<1x8x32xbf16>
    %419 = vector.shape_cast %418 : vector<1x8x32xbf16> to vector<8x32xbf16>
    %cst_208 = arith.constant dense<0.000000e+00> : vector<8x16xf32>
    %420 = tpu.matmul %419, %417, %cst_208 {dimension_numbers = #tpu.dot_dimension_numbers<[1], [0], [0], [1], [0, 0, 1, 1], [], []>} : vector<8x32xbf16>, vector<32x16xbf16>, vector<8x16xf32> -> vector<8x16xf32>
    %c1_209 = arith.constant 1 : index
    %c0_210 = arith.constant 0 : index
    %c0_211 = arith.constant 0 : index
    %421 = vector.load %arg3[%c1_209, %c0_210, %c0_211] : memref<9x8x32xbf16, #tpu.memory_space<vmem>>, vector<1x8x32xbf16>
    %422 = vector.shape_cast %421 : vector<1x8x32xbf16> to vector<8x32xbf16>
    %cst_212 = arith.constant dense<0.000000e+00> : vector<8x16xf32>
    %423 = tpu.matmul %422, %417, %cst_212 {dimension_numbers = #tpu.dot_dimension_numbers<[1], [0], [0], [1], [0, 0, 1, 1], [], []>} : vector<8x32xbf16>, vector<32x16xbf16>, vector<8x16xf32> -> vector<8x16xf32>
    %c2_213 = arith.constant 2 : index
    %c0_214 = arith.constant 0 : index
    %c0_215 = arith.constant 0 : index
    %424 = vector.load %arg3[%c2_213, %c0_214, %c0_215] : memref<9x8x32xbf16, #tpu.memory_space<vmem>>, vector<1x8x32xbf16>
    %425 = vector.shape_cast %424 : vector<1x8x32xbf16> to vector<8x32xbf16>
    %cst_216 = arith.constant dense<0.000000e+00> : vector<8x16xf32>
    %426 = tpu.matmul %425, %417, %cst_216 {dimension_numbers = #tpu.dot_dimension_numbers<[1], [0], [0], [1], [0, 0, 1, 1], [], []>} : vector<8x32xbf16>, vector<32x16xbf16>, vector<8x16xf32> -> vector<8x16xf32>
    %c3_217 = arith.constant 3 : index
    %c0_218 = arith.constant 0 : index
    %c0_219 = arith.constant 0 : index
    %427 = vector.load %arg3[%c3_217, %c0_218, %c0_219] : memref<9x8x32xbf16, #tpu.memory_space<vmem>>, vector<1x8x32xbf16>
    %428 = vector.shape_cast %427 : vector<1x8x32xbf16> to vector<8x32xbf16>
    %cst_220 = arith.constant dense<0.000000e+00> : vector<8x16xf32>
    %429 = tpu.matmul %428, %417, %cst_220 {dimension_numbers = #tpu.dot_dimension_numbers<[1], [0], [0], [1], [0, 0, 1, 1], [], []>} : vector<8x32xbf16>, vector<32x16xbf16>, vector<8x16xf32> -> vector<8x16xf32>
    %c4_221 = arith.constant 4 : index
    %c0_222 = arith.constant 0 : index
    %c0_223 = arith.constant 0 : index
    %430 = vector.load %arg3[%c4_221, %c0_222, %c0_223] : memref<9x8x32xbf16, #tpu.memory_space<vmem>>, vector<1x8x32xbf16>
    %431 = vector.shape_cast %430 : vector<1x8x32xbf16> to vector<8x32xbf16>
    %cst_224 = arith.constant dense<0.000000e+00> : vector<8x16xf32>
    %432 = tpu.matmul %431, %417, %cst_224 {dimension_numbers = #tpu.dot_dimension_numbers<[1], [0], [0], [1], [0, 0, 1, 1], [], []>} : vector<8x32xbf16>, vector<32x16xbf16>, vector<8x16xf32> -> vector<8x16xf32>
    %c5_225 = arith.constant 5 : index
    %c0_226 = arith.constant 0 : index
    %c0_227 = arith.constant 0 : index
    %433 = vector.load %arg3[%c5_225, %c0_226, %c0_227] : memref<9x8x32xbf16, #tpu.memory_space<vmem>>, vector<1x8x32xbf16>
    %434 = vector.shape_cast %433 : vector<1x8x32xbf16> to vector<8x32xbf16>
    %cst_228 = arith.constant dense<0.000000e+00> : vector<8x16xf32>
    %435 = tpu.matmul %434, %417, %cst_228 {dimension_numbers = #tpu.dot_dimension_numbers<[1], [0], [0], [1], [0, 0, 1, 1], [], []>} : vector<8x32xbf16>, vector<32x16xbf16>, vector<8x16xf32> -> vector<8x16xf32>
    %c6_229 = arith.constant 6 : index
    %c0_230 = arith.constant 0 : index
    %c0_231 = arith.constant 0 : index
    %436 = vector.load %arg3[%c6_229, %c0_230, %c0_231] : memref<9x8x32xbf16, #tpu.memory_space<vmem>>, vector<1x8x32xbf16>
    %437 = vector.shape_cast %436 : vector<1x8x32xbf16> to vector<8x32xbf16>
    %cst_232 = arith.constant dense<0.000000e+00> : vector<8x16xf32>
    %438 = tpu.matmul %437, %417, %cst_232 {dimension_numbers = #tpu.dot_dimension_numbers<[1], [0], [0], [1], [0, 0, 1, 1], [], []>} : vector<8x32xbf16>, vector<32x16xbf16>, vector<8x16xf32> -> vector<8x16xf32>
    %c7_233 = arith.constant 7 : index
    %c0_234 = arith.constant 0 : index
    %c0_235 = arith.constant 0 : index
    %439 = vector.load %arg3[%c7_233, %c0_234, %c0_235] : memref<9x8x32xbf16, #tpu.memory_space<vmem>>, vector<1x8x32xbf16>
    %440 = vector.shape_cast %439 : vector<1x8x32xbf16> to vector<8x32xbf16>
    %cst_236 = arith.constant dense<0.000000e+00> : vector<8x16xf32>
    %441 = tpu.matmul %440, %417, %cst_236 {dimension_numbers = #tpu.dot_dimension_numbers<[1], [0], [0], [1], [0, 0, 1, 1], [], []>} : vector<8x32xbf16>, vector<32x16xbf16>, vector<8x16xf32> -> vector<8x16xf32>
    %c8_237 = arith.constant 8 : index
    %c0_238 = arith.constant 0 : index
    %c0_239 = arith.constant 0 : index
    %442 = vector.load %arg3[%c8_237, %c0_238, %c0_239] : memref<9x8x32xbf16, #tpu.memory_space<vmem>>, vector<1x8x32xbf16>
    %443 = vector.shape_cast %442 : vector<1x8x32xbf16> to vector<8x32xbf16>
    %cst_240 = arith.constant dense<0.000000e+00> : vector<8x16xf32>
    %444 = tpu.matmul %443, %417, %cst_240 {dimension_numbers = #tpu.dot_dimension_numbers<[1], [0], [0], [1], [0, 0, 1, 1], [], []>} : vector<8x32xbf16>, vector<32x16xbf16>, vector<8x16xf32> -> vector<8x16xf32>
    %445 = arith.maximumf %420, %423 : vector<8x16xf32>
    %446 = arith.maximumf %426, %429 : vector<8x16xf32>
    %447 = arith.maximumf %432, %435 : vector<8x16xf32>
    %448 = arith.maximumf %438, %441 : vector<8x16xf32>
    %449 = arith.maximumf %445, %446 : vector<8x16xf32>
    %450 = arith.maximumf %447, %448 : vector<8x16xf32>
    %451 = arith.maximumf %449, %450 : vector<8x16xf32>
    %452 = arith.maximumf %451, %444 : vector<8x16xf32>
    %c0_241 = arith.constant 0 : index
    %c0_242 = arith.constant 0 : index
    %453 = vector.load %arg6[%c0_241, %c0_242] : memref<16x256xbf16, #tpu.memory_space<vmem>>, vector<16x32xbf16>
    %454 = arith.truncf %452 : vector<8x16xf32> to vector<8x16xbf16>
    %cst_243 = arith.constant dense<0.000000e+00> : vector<8x32xf32>
    %455 = tpu.matmul %454, %453, %cst_243 {dimension_numbers = #tpu.dot_dimension_numbers<[1], [0], [0], [1], [0, 0, 1, 1], [], []>} : vector<8x16xbf16>, vector<16x32xbf16>, vector<8x32xf32> -> vector<8x32xf32>
    %c0_244 = arith.constant 0 : index
    %c2688 = arith.constant 2688 : index
    %456 = vector.load %arg11[%c0_244, %c2688] : memref<1x3968xf32, #tpu.memory_space<vmem>>, vector<1x32xf32>
    %457 = vector.broadcast %456 : vector<1x32xf32> to vector<8x32xf32>
    %458 = arith.addf %455, %457 : vector<8x32xf32>
    %c0_245 = arith.constant 0 : index
    %c2816 = arith.constant 2816 : index
    %459 = vector.load %arg11[%c0_245, %c2816] : memref<1x3968xf32, #tpu.memory_space<vmem>>, vector<1x16xf32>
    %c0_246 = arith.constant 0 : index
    %c2944 = arith.constant 2944 : index
    %460 = vector.load %arg11[%c0_246, %c2944] : memref<1x3968xf32, #tpu.memory_space<vmem>>, vector<1x16xf32>
    %cst_247 = arith.constant dense<0.000000e+00> : vector<32xf32>
    %461 = vector.multi_reduction <add>, %416, %cst_247 [1] : vector<32x16xf32> to vector<32xf32>
    %462 = vector.shape_cast %461 : vector<32xf32> to vector<32x1xf32>
    %cst_248 = arith.constant 1.600000e+01 : f32
    %463 = vector.broadcast %cst_248 : f32 to vector<32x1xf32>
    %464 = arith.divf %462, %463 : vector<32x1xf32>
    %465 = arith.mulf %416, %416 : vector<32x16xf32>
    %cst_249 = arith.constant dense<0.000000e+00> : vector<32xf32>
    %466 = vector.multi_reduction <add>, %465, %cst_249 [1] : vector<32x16xf32> to vector<32xf32>
    %467 = vector.shape_cast %466 : vector<32xf32> to vector<32x1xf32>
    %cst_250 = arith.constant 1.600000e+01 : f32
    %468 = vector.broadcast %cst_250 : f32 to vector<32x1xf32>
    %469 = arith.divf %467, %468 : vector<32x1xf32>
    %470 = arith.mulf %464, %464 : vector<32x1xf32>
    %471 = arith.subf %469, %470 : vector<32x1xf32>
    %cst_251 = arith.constant 0.000000e+00 : f32
    %472 = vector.broadcast %cst_251 : f32 to vector<32x1xf32>
    %473 = arith.maximumf %471, %472 : vector<32x1xf32>
    %474 = vector.broadcast %464 : vector<32x1xf32> to vector<32x16xf32>
    %475 = arith.subf %416, %474 : vector<32x16xf32>
    %cst_252 = arith.constant 9.99999974E-6 : f32
    %476 = vector.broadcast %cst_252 : f32 to vector<32x1xf32>
    %477 = arith.addf %473, %476 : vector<32x1xf32>
    %478 = math.rsqrt %477 : vector<32x1xf32>
    %479 = vector.broadcast %478 : vector<32x1xf32> to vector<32x16xf32>
    %480 = arith.mulf %475, %479 : vector<32x16xf32>
    %481 = vector.broadcast %459 : vector<1x16xf32> to vector<32x16xf32>
    %482 = arith.mulf %480, %481 : vector<32x16xf32>
    %483 = vector.broadcast %460 : vector<1x16xf32> to vector<32x16xf32>
    %484 = arith.addf %482, %483 : vector<32x16xf32>
    %485 = arith.truncf %484 : vector<32x16xf32> to vector<32x16xbf16>
    %c0_253 = arith.constant 0 : index
    %c0_254 = arith.constant 0 : index
    %c0_255 = arith.constant 0 : index
    %486 = vector.load %arg3[%c0_253, %c0_254, %c0_255] : memref<9x8x32xbf16, #tpu.memory_space<vmem>>, vector<1x8x32xbf16>
    %487 = vector.shape_cast %486 : vector<1x8x32xbf16> to vector<8x32xbf16>
    %cst_256 = arith.constant dense<0.000000e+00> : vector<8x16xf32>
    %488 = tpu.matmul %487, %485, %cst_256 {dimension_numbers = #tpu.dot_dimension_numbers<[1], [0], [0], [1], [0, 0, 1, 1], [], []>} : vector<8x32xbf16>, vector<32x16xbf16>, vector<8x16xf32> -> vector<8x16xf32>
    %c1_257 = arith.constant 1 : index
    %c0_258 = arith.constant 0 : index
    %c0_259 = arith.constant 0 : index
    %489 = vector.load %arg3[%c1_257, %c0_258, %c0_259] : memref<9x8x32xbf16, #tpu.memory_space<vmem>>, vector<1x8x32xbf16>
    %490 = vector.shape_cast %489 : vector<1x8x32xbf16> to vector<8x32xbf16>
    %cst_260 = arith.constant dense<0.000000e+00> : vector<8x16xf32>
    %491 = tpu.matmul %490, %485, %cst_260 {dimension_numbers = #tpu.dot_dimension_numbers<[1], [0], [0], [1], [0, 0, 1, 1], [], []>} : vector<8x32xbf16>, vector<32x16xbf16>, vector<8x16xf32> -> vector<8x16xf32>
    %c2_261 = arith.constant 2 : index
    %c0_262 = arith.constant 0 : index
    %c0_263 = arith.constant 0 : index
    %492 = vector.load %arg3[%c2_261, %c0_262, %c0_263] : memref<9x8x32xbf16, #tpu.memory_space<vmem>>, vector<1x8x32xbf16>
    %493 = vector.shape_cast %492 : vector<1x8x32xbf16> to vector<8x32xbf16>
    %cst_264 = arith.constant dense<0.000000e+00> : vector<8x16xf32>
    %494 = tpu.matmul %493, %485, %cst_264 {dimension_numbers = #tpu.dot_dimension_numbers<[1], [0], [0], [1], [0, 0, 1, 1], [], []>} : vector<8x32xbf16>, vector<32x16xbf16>, vector<8x16xf32> -> vector<8x16xf32>
    %c3_265 = arith.constant 3 : index
    %c0_266 = arith.constant 0 : index
    %c0_267 = arith.constant 0 : index
    %495 = vector.load %arg3[%c3_265, %c0_266, %c0_267] : memref<9x8x32xbf16, #tpu.memory_space<vmem>>, vector<1x8x32xbf16>
    %496 = vector.shape_cast %495 : vector<1x8x32xbf16> to vector<8x32xbf16>
    %cst_268 = arith.constant dense<0.000000e+00> : vector<8x16xf32>
    %497 = tpu.matmul %496, %485, %cst_268 {dimension_numbers = #tpu.dot_dimension_numbers<[1], [0], [0], [1], [0, 0, 1, 1], [], []>} : vector<8x32xbf16>, vector<32x16xbf16>, vector<8x16xf32> -> vector<8x16xf32>
    %c4_269 = arith.constant 4 : index
    %c0_270 = arith.constant 0 : index
    %c0_271 = arith.constant 0 : index
    %498 = vector.load %arg3[%c4_269, %c0_270, %c0_271] : memref<9x8x32xbf16, #tpu.memory_space<vmem>>, vector<1x8x32xbf16>
    %499 = vector.shape_cast %498 : vector<1x8x32xbf16> to vector<8x32xbf16>
    %cst_272 = arith.constant dense<0.000000e+00> : vector<8x16xf32>
    %500 = tpu.matmul %499, %485, %cst_272 {dimension_numbers = #tpu.dot_dimension_numbers<[1], [0], [0], [1], [0, 0, 1, 1], [], []>} : vector<8x32xbf16>, vector<32x16xbf16>, vector<8x16xf32> -> vector<8x16xf32>
    %c5_273 = arith.constant 5 : index
    %c0_274 = arith.constant 0 : index
    %c0_275 = arith.constant 0 : index
    %501 = vector.load %arg3[%c5_273, %c0_274, %c0_275] : memref<9x8x32xbf16, #tpu.memory_space<vmem>>, vector<1x8x32xbf16>
    %502 = vector.shape_cast %501 : vector<1x8x32xbf16> to vector<8x32xbf16>
    %cst_276 = arith.constant dense<0.000000e+00> : vector<8x16xf32>
    %503 = tpu.matmul %502, %485, %cst_276 {dimension_numbers = #tpu.dot_dimension_numbers<[1], [0], [0], [1], [0, 0, 1, 1], [], []>} : vector<8x32xbf16>, vector<32x16xbf16>, vector<8x16xf32> -> vector<8x16xf32>
    %c6_277 = arith.constant 6 : index
    %c0_278 = arith.constant 0 : index
    %c0_279 = arith.constant 0 : index
    %504 = vector.load %arg3[%c6_277, %c0_278, %c0_279] : memref<9x8x32xbf16, #tpu.memory_space<vmem>>, vector<1x8x32xbf16>
    %505 = vector.shape_cast %504 : vector<1x8x32xbf16> to vector<8x32xbf16>
    %cst_280 = arith.constant dense<0.000000e+00> : vector<8x16xf32>
    %506 = tpu.matmul %505, %485, %cst_280 {dimension_numbers = #tpu.dot_dimension_numbers<[1], [0], [0], [1], [0, 0, 1, 1], [], []>} : vector<8x32xbf16>, vector<32x16xbf16>, vector<8x16xf32> -> vector<8x16xf32>
    %c7_281 = arith.constant 7 : index
    %c0_282 = arith.constant 0 : index
    %c0_283 = arith.constant 0 : index
    %507 = vector.load %arg3[%c7_281, %c0_282, %c0_283] : memref<9x8x32xbf16, #tpu.memory_space<vmem>>, vector<1x8x32xbf16>
    %508 = vector.shape_cast %507 : vector<1x8x32xbf16> to vector<8x32xbf16>
    %cst_284 = arith.constant dense<0.000000e+00> : vector<8x16xf32>
    %509 = tpu.matmul %508, %485, %cst_284 {dimension_numbers = #tpu.dot_dimension_numbers<[1], [0], [0], [1], [0, 0, 1, 1], [], []>} : vector<8x32xbf16>, vector<32x16xbf16>, vector<8x16xf32> -> vector<8x16xf32>
    %c8_285 = arith.constant 8 : index
    %c0_286 = arith.constant 0 : index
    %c0_287 = arith.constant 0 : index
    %510 = vector.load %arg3[%c8_285, %c0_286, %c0_287] : memref<9x8x32xbf16, #tpu.memory_space<vmem>>, vector<1x8x32xbf16>
    %511 = vector.shape_cast %510 : vector<1x8x32xbf16> to vector<8x32xbf16>
    %cst_288 = arith.constant dense<0.000000e+00> : vector<8x16xf32>
    %512 = tpu.matmul %511, %485, %cst_288 {dimension_numbers = #tpu.dot_dimension_numbers<[1], [0], [0], [1], [0, 0, 1, 1], [], []>} : vector<8x32xbf16>, vector<32x16xbf16>, vector<8x16xf32> -> vector<8x16xf32>
    %513 = arith.maximumf %488, %491 : vector<8x16xf32>
    %514 = arith.maximumf %494, %497 : vector<8x16xf32>
    %515 = arith.maximumf %500, %503 : vector<8x16xf32>
    %516 = arith.maximumf %506, %509 : vector<8x16xf32>
    %517 = arith.maximumf %513, %514 : vector<8x16xf32>
    %518 = arith.maximumf %515, %516 : vector<8x16xf32>
    %519 = arith.maximumf %517, %518 : vector<8x16xf32>
    %520 = arith.maximumf %519, %512 : vector<8x16xf32>
    %c0_289 = arith.constant 0 : index
    %c128_290 = arith.constant 128 : index
    %521 = vector.load %arg6[%c0_289, %c128_290] : memref<16x256xbf16, #tpu.memory_space<vmem>>, vector<16x48xbf16>
    %522 = arith.truncf %520 : vector<8x16xf32> to vector<8x16xbf16>
    %cst_291 = arith.constant dense<0.000000e+00> : vector<8x48xf32>
    %523 = tpu.matmul %522, %521, %cst_291 {dimension_numbers = #tpu.dot_dimension_numbers<[1], [0], [0], [1], [0, 0, 1, 1], [], []>} : vector<8x16xbf16>, vector<16x48xbf16>, vector<8x48xf32> -> vector<8x48xf32>
    %c0_292 = arith.constant 0 : index
    %c3072 = arith.constant 3072 : index
    %524 = vector.load %arg11[%c0_292, %c3072] : memref<1x3968xf32, #tpu.memory_space<vmem>>, vector<1x48xf32>
    %525 = vector.broadcast %524 : vector<1x48xf32> to vector<8x48xf32>
    %526 = arith.addf %523, %525 : vector<8x48xf32>
    %c0_293 = arith.constant 0 : index
    %c0_294 = arith.constant 0 : index
    %527 = vector.load %arg12[%c0_293, %c0_294] : memref<8x8xf32, #tpu.memory_space<vmem>>, vector<8x8xf32>
    %528 = vector.extract_strided_slice %526 {offsets = [0, 0], sizes = [8, 8], strides = [1, 1]} : vector<8x48xf32> to vector<8x8xf32>
    %529 = vector.extract_strided_slice %526 {offsets = [0, 16], sizes = [8, 8], strides = [1, 1]} : vector<8x48xf32> to vector<8x8xf32>
    %530 = vector.extract_strided_slice %526 {offsets = [0, 32], sizes = [8, 8], strides = [1, 1]} : vector<8x48xf32> to vector<8x8xf32>
    %531 = arith.truncf %528 : vector<8x8xf32> to vector<8x8xbf16>
    %532 = arith.truncf %529 : vector<8x8xf32> to vector<8x8xbf16>
    %cst_295 = arith.constant dense<0.000000e+00> : vector<8x8xf32>
    %533 = tpu.matmul %531, %532, %cst_295 {dimension_numbers = #tpu.dot_dimension_numbers<[1], [1], [0], [0], [0, 0, 1, 0], [], []>} : vector<8x8xbf16>, vector<8x8xbf16>, vector<8x8xf32> -> vector<8x8xf32>
    %cst_296 = arith.constant 2.500000e-01 : f32
    %534 = vector.broadcast %cst_296 : f32 to vector<8x8xf32>
    %535 = arith.mulf %533, %534 : vector<8x8xf32>
    %536 = arith.addf %535, %527 : vector<8x8xf32>
    %cst_297 = arith.constant dense<0xFF800000> : vector<8xf32>
    %537 = vector.multi_reduction <maximumf>, %536, %cst_297 [1] : vector<8x8xf32> to vector<8xf32>
    %538 = vector.shape_cast %537 : vector<8xf32> to vector<8x1xf32>
    %539 = vector.broadcast %538 : vector<8x1xf32> to vector<8x8xf32>
    %540 = arith.subf %536, %539 : vector<8x8xf32>
    %541 = math.exp %540 : vector<8x8xf32>
    %cst_298 = arith.constant dense<0.000000e+00> : vector<8xf32>
    %542 = vector.multi_reduction <add>, %541, %cst_298 [1] : vector<8x8xf32> to vector<8xf32>
    %543 = vector.shape_cast %542 : vector<8xf32> to vector<8x1xf32>
    %544 = tpu.reciprocal %543 {approx = true} : vector<8x1xf32> -> vector<8x1xf32>
    %545 = vector.broadcast %544 : vector<8x1xf32> to vector<8x8xf32>
    %546 = arith.mulf %541, %545 : vector<8x8xf32>
    %547 = arith.truncf %546 : vector<8x8xf32> to vector<8x8xbf16>
    %548 = arith.truncf %530 : vector<8x8xf32> to vector<8x8xbf16>
    %cst_299 = arith.constant dense<0.000000e+00> : vector<8x8xf32>
    %549 = tpu.matmul %547, %548, %cst_299 {dimension_numbers = #tpu.dot_dimension_numbers<[1], [0], [0], [1], [0, 0, 1, 1], [], []>} : vector<8x8xbf16>, vector<8x8xbf16>, vector<8x8xf32> -> vector<8x8xf32>
    %c0_300 = arith.constant 0 : index
    %c384_301 = arith.constant 384 : index
    %550 = vector.load %arg5[%c0_300, %c384_301] : memref<8x640xbf16, #tpu.memory_space<vmem>>, vector<8x32xbf16>
    %551 = arith.truncf %549 : vector<8x8xf32> to vector<8x8xbf16>
    %cst_302 = arith.constant dense<0.000000e+00> : vector<8x32xf32>
    %552 = tpu.matmul %551, %550, %cst_302 {dimension_numbers = #tpu.dot_dimension_numbers<[1], [0], [0], [1], [0, 0, 1, 1], [], []>} : vector<8x8xbf16>, vector<8x32xbf16>, vector<8x32xf32> -> vector<8x32xf32>
    %553 = vector.extract_strided_slice %526 {offsets = [0, 8], sizes = [8, 8], strides = [1, 1]} : vector<8x48xf32> to vector<8x8xf32>
    %554 = vector.extract_strided_slice %526 {offsets = [0, 24], sizes = [8, 8], strides = [1, 1]} : vector<8x48xf32> to vector<8x8xf32>
    %555 = vector.extract_strided_slice %526 {offsets = [0, 40], sizes = [8, 8], strides = [1, 1]} : vector<8x48xf32> to vector<8x8xf32>
    %556 = arith.truncf %553 : vector<8x8xf32> to vector<8x8xbf16>
    %557 = arith.truncf %554 : vector<8x8xf32> to vector<8x8xbf16>
    %cst_303 = arith.constant dense<0.000000e+00> : vector<8x8xf32>
    %558 = tpu.matmul %556, %557, %cst_303 {dimension_numbers = #tpu.dot_dimension_numbers<[1], [1], [0], [0], [0, 0, 1, 0], [], []>} : vector<8x8xbf16>, vector<8x8xbf16>, vector<8x8xf32> -> vector<8x8xf32>
    %cst_304 = arith.constant 2.500000e-01 : f32
    %559 = vector.broadcast %cst_304 : f32 to vector<8x8xf32>
    %560 = arith.mulf %558, %559 : vector<8x8xf32>
    %561 = arith.addf %560, %527 : vector<8x8xf32>
    %cst_305 = arith.constant dense<0xFF800000> : vector<8xf32>
    %562 = vector.multi_reduction <maximumf>, %561, %cst_305 [1] : vector<8x8xf32> to vector<8xf32>
    %563 = vector.shape_cast %562 : vector<8xf32> to vector<8x1xf32>
    %564 = vector.broadcast %563 : vector<8x1xf32> to vector<8x8xf32>
    %565 = arith.subf %561, %564 : vector<8x8xf32>
    %566 = math.exp %565 : vector<8x8xf32>
    %cst_306 = arith.constant dense<0.000000e+00> : vector<8xf32>
    %567 = vector.multi_reduction <add>, %566, %cst_306 [1] : vector<8x8xf32> to vector<8xf32>
    %568 = vector.shape_cast %567 : vector<8xf32> to vector<8x1xf32>
    %569 = tpu.reciprocal %568 {approx = true} : vector<8x1xf32> -> vector<8x1xf32>
    %570 = vector.broadcast %569 : vector<8x1xf32> to vector<8x8xf32>
    %571 = arith.mulf %566, %570 : vector<8x8xf32>
    %572 = arith.truncf %571 : vector<8x8xf32> to vector<8x8xbf16>
    %573 = arith.truncf %555 : vector<8x8xf32> to vector<8x8xbf16>
    %cst_307 = arith.constant dense<0.000000e+00> : vector<8x8xf32>
    %574 = tpu.matmul %572, %573, %cst_307 {dimension_numbers = #tpu.dot_dimension_numbers<[1], [0], [0], [1], [0, 0, 1, 1], [], []>} : vector<8x8xbf16>, vector<8x8xbf16>, vector<8x8xf32> -> vector<8x8xf32>
    %c0_308 = arith.constant 0 : index
    %c512_309 = arith.constant 512 : index
    %575 = vector.load %arg5[%c0_308, %c512_309] : memref<8x640xbf16, #tpu.memory_space<vmem>>, vector<8x32xbf16>
    %576 = arith.truncf %574 : vector<8x8xf32> to vector<8x8xbf16>
    %cst_310 = arith.constant dense<0.000000e+00> : vector<8x32xf32>
    %577 = tpu.matmul %576, %575, %cst_310 {dimension_numbers = #tpu.dot_dimension_numbers<[1], [0], [0], [1], [0, 0, 1, 1], [], []>} : vector<8x8xbf16>, vector<8x32xbf16>, vector<8x32xf32> -> vector<8x32xf32>
    %578 = arith.addf %552, %577 : vector<8x32xf32>
    %c0_311 = arith.constant 0 : index
    %c3200 = arith.constant 3200 : index
    %579 = vector.load %arg11[%c0_311, %c3200] : memref<1x3968xf32, #tpu.memory_space<vmem>>, vector<1x32xf32>
    %580 = vector.broadcast %579 : vector<1x32xf32> to vector<8x32xf32>
    %581 = arith.addf %578, %580 : vector<8x32xf32>
    %582 = arith.addf %458, %581 : vector<8x32xf32>
    %c0_312 = arith.constant 0 : index
    %c3328 = arith.constant 3328 : index
    %583 = vector.load %arg11[%c0_312, %c3328] : memref<1x3968xf32, #tpu.memory_space<vmem>>, vector<1x32xf32>
    %c0_313 = arith.constant 0 : index
    %c3456 = arith.constant 3456 : index
    %584 = vector.load %arg11[%c0_313, %c3456] : memref<1x3968xf32, #tpu.memory_space<vmem>>, vector<1x32xf32>
    %cst_314 = arith.constant dense<0.000000e+00> : vector<8xf32>
    %585 = vector.multi_reduction <add>, %582, %cst_314 [1] : vector<8x32xf32> to vector<8xf32>
    %586 = vector.shape_cast %585 : vector<8xf32> to vector<8x1xf32>
    %cst_315 = arith.constant 3.200000e+01 : f32
    %587 = vector.broadcast %cst_315 : f32 to vector<8x1xf32>
    %588 = arith.divf %586, %587 : vector<8x1xf32>
    %589 = arith.mulf %582, %582 : vector<8x32xf32>
    %cst_316 = arith.constant dense<0.000000e+00> : vector<8xf32>
    %590 = vector.multi_reduction <add>, %589, %cst_316 [1] : vector<8x32xf32> to vector<8xf32>
    %591 = vector.shape_cast %590 : vector<8xf32> to vector<8x1xf32>
    %cst_317 = arith.constant 3.200000e+01 : f32
    %592 = vector.broadcast %cst_317 : f32 to vector<8x1xf32>
    %593 = arith.divf %591, %592 : vector<8x1xf32>
    %594 = arith.mulf %588, %588 : vector<8x1xf32>
    %595 = arith.subf %593, %594 : vector<8x1xf32>
    %cst_318 = arith.constant 0.000000e+00 : f32
    %596 = vector.broadcast %cst_318 : f32 to vector<8x1xf32>
    %597 = arith.maximumf %595, %596 : vector<8x1xf32>
    %598 = vector.broadcast %588 : vector<8x1xf32> to vector<8x32xf32>
    %599 = arith.subf %582, %598 : vector<8x32xf32>
    %cst_319 = arith.constant 9.99999974E-6 : f32
    %600 = vector.broadcast %cst_319 : f32 to vector<8x1xf32>
    %601 = arith.addf %597, %600 : vector<8x1xf32>
    %602 = math.rsqrt %601 : vector<8x1xf32>
    %603 = vector.broadcast %602 : vector<8x1xf32> to vector<8x32xf32>
    %604 = arith.mulf %599, %603 : vector<8x32xf32>
    %605 = vector.broadcast %583 : vector<1x32xf32> to vector<8x32xf32>
    %606 = arith.mulf %604, %605 : vector<8x32xf32>
    %607 = vector.broadcast %584 : vector<1x32xf32> to vector<8x32xf32>
    %608 = arith.addf %606, %607 : vector<8x32xf32>
    %c0_320 = arith.constant 0 : index
    %c256_321 = arith.constant 256 : index
    %609 = vector.load %arg7[%c0_320, %c256_321] : memref<32x512xbf16, #tpu.memory_space<vmem>>, vector<32x128xbf16>
    %610 = arith.truncf %608 : vector<8x32xf32> to vector<8x32xbf16>
    %cst_322 = arith.constant dense<0.000000e+00> : vector<8x128xf32>
    %611 = tpu.matmul %610, %609, %cst_322 {dimension_numbers = #tpu.dot_dimension_numbers<[1], [0], [0], [1], [0, 0, 1, 1], [], []>} : vector<8x32xbf16>, vector<32x128xbf16>, vector<8x128xf32> -> vector<8x128xf32>
    %c0_323 = arith.constant 0 : index
    %c3584 = arith.constant 3584 : index
    %612 = vector.load %arg11[%c0_323, %c3584] : memref<1x3968xf32, #tpu.memory_space<vmem>>, vector<1x128xf32>
    %613 = vector.broadcast %612 : vector<1x128xf32> to vector<8x128xf32>
    %614 = arith.addf %611, %613 : vector<8x128xf32>
    %cst_324 = arith.constant 0.707106769 : f32
    %615 = vector.broadcast %cst_324 : f32 to vector<8x128xf32>
    %616 = arith.mulf %614, %615 : vector<8x128xf32>
    %cst_325 = arith.constant 0.000000e+00 : f32
    %617 = vector.broadcast %cst_325 : f32 to vector<8x128xf32>
    %618 = arith.cmpf oge, %616, %617 : vector<8x128xf32>
    %cst_326 = arith.constant 1.000000e+00 : f32
    %cst_327 = arith.constant -1.000000e+00 : f32
    %619 = vector.broadcast %cst_326 : f32 to vector<8x128xf32>
    %620 = vector.broadcast %cst_327 : f32 to vector<8x128xf32>
    %621 = arith.select %618, %619, %620 : vector<8x128xi1>, vector<8x128xf32>
    %622 = math.absf %616 : vector<8x128xf32>
    %cst_328 = arith.constant 0.327591091 : f32
    %623 = vector.broadcast %cst_328 : f32 to vector<8x128xf32>
    %624 = arith.mulf %623, %622 : vector<8x128xf32>
    %cst_329 = arith.constant 1.000000e+00 : f32
    %625 = vector.broadcast %cst_329 : f32 to vector<8x128xf32>
    %626 = arith.addf %625, %624 : vector<8x128xf32>
    %cst_330 = arith.constant 1.000000e+00 : f32
    %627 = vector.broadcast %cst_330 : f32 to vector<8x128xf32>
    %628 = arith.divf %627, %626 : vector<8x128xf32>
    %cst_331 = arith.constant 1.06140542 : f32
    %629 = vector.broadcast %cst_331 : f32 to vector<8x128xf32>
    %630 = arith.mulf %629, %628 : vector<8x128xf32>
    %cst_332 = arith.constant 1.45315206 : f32
    %631 = vector.broadcast %cst_332 : f32 to vector<8x128xf32>
    %632 = arith.subf %630, %631 : vector<8x128xf32>
    %633 = arith.mulf %632, %628 : vector<8x128xf32>
    %cst_333 = arith.constant 1.42141378 : f32
    %634 = vector.broadcast %cst_333 : f32 to vector<8x128xf32>
    %635 = arith.addf %633, %634 : vector<8x128xf32>
    %636 = arith.mulf %635, %628 : vector<8x128xf32>
    %cst_334 = arith.constant 0.284496725 : f32
    %637 = vector.broadcast %cst_334 : f32 to vector<8x128xf32>
    %638 = arith.subf %636, %637 : vector<8x128xf32>
    %639 = arith.mulf %638, %628 : vector<8x128xf32>
    %cst_335 = arith.constant 0.254829586 : f32
    %640 = vector.broadcast %cst_335 : f32 to vector<8x128xf32>
    %641 = arith.addf %639, %640 : vector<8x128xf32>
    %642 = arith.mulf %641, %628 : vector<8x128xf32>
    %cst_336 = arith.constant 0.000000e+00 : f32
    %643 = vector.broadcast %cst_336 : f32 to vector<8x128xf32>
    %644 = arith.subf %643, %622 : vector<8x128xf32>
    %645 = arith.mulf %644, %622 : vector<8x128xf32>
    %646 = math.exp %645 : vector<8x128xf32>
    %647 = arith.mulf %642, %646 : vector<8x128xf32>
    %cst_337 = arith.constant 1.000000e+00 : f32
    %648 = vector.broadcast %cst_337 : f32 to vector<8x128xf32>
    %649 = arith.subf %648, %647 : vector<8x128xf32>
    %650 = arith.mulf %621, %649 : vector<8x128xf32>
    %cst_338 = arith.constant 5.000000e-01 : f32
    %651 = vector.broadcast %cst_338 : f32 to vector<8x128xf32>
    %652 = arith.mulf %651, %614 : vector<8x128xf32>
    %cst_339 = arith.constant 1.000000e+00 : f32
    %653 = vector.broadcast %cst_339 : f32 to vector<8x128xf32>
    %654 = arith.addf %653, %650 : vector<8x128xf32>
    %655 = arith.mulf %652, %654 : vector<8x128xf32>
    %c0_340 = arith.constant 0 : index
    %c0_341 = arith.constant 0 : index
    %656 = vector.load %arg8[%c0_340, %c0_341] : memref<128x32xbf16, #tpu.memory_space<vmem>>, vector<128x32xbf16>
    %657 = arith.truncf %655 : vector<8x128xf32> to vector<8x128xbf16>
    %cst_342 = arith.constant dense<0.000000e+00> : vector<8x32xf32>
    %658 = tpu.matmul %657, %656, %cst_342 {dimension_numbers = #tpu.dot_dimension_numbers<[1], [0], [0], [1], [0, 0, 1, 1], [], []>} : vector<8x128xbf16>, vector<128x32xbf16>, vector<8x32xf32> -> vector<8x32xf32>
    %c0_343 = arith.constant 0 : index
    %c3712 = arith.constant 3712 : index
    %659 = vector.load %arg11[%c0_343, %c3712] : memref<1x3968xf32, #tpu.memory_space<vmem>>, vector<1x32xf32>
    %660 = vector.broadcast %659 : vector<1x32xf32> to vector<8x32xf32>
    %661 = arith.addf %658, %660 : vector<8x32xf32>
    %662 = arith.addf %582, %661 : vector<8x32xf32>
    %c0_344 = arith.constant 0 : index
    %c128_345 = arith.constant 128 : index
    %663 = vector.load %arg9[%c0_344, %c128_345] : memref<2x256xbf16, #tpu.memory_space<vmem>>, vector<2x8xbf16>
    %664 = arith.truncf %662 : vector<8x32xf32> to vector<8x32xbf16>
    %cst_346 = arith.constant dense<0.000000e+00> : vector<2x32xf32>
    %665 = tpu.matmul %663, %664, %cst_346 {dimension_numbers = #tpu.dot_dimension_numbers<[1], [0], [0], [1], [0, 0, 1, 1], [], []>} : vector<2x8xbf16>, vector<8x32xbf16>, vector<2x32xf32> -> vector<2x32xf32>
    %cst_347 = arith.constant 2.500000e-01 : f32
    %666 = vector.broadcast %cst_347 : f32 to vector<2x32xf32>
    %667 = arith.mulf %665, %666 : vector<2x32xf32>
    %c0_348 = arith.constant 0 : index
    %c384_349 = arith.constant 384 : index
    %668 = vector.load %arg7[%c0_348, %c384_349] : memref<32x512xbf16, #tpu.memory_space<vmem>>, vector<32x10xbf16>
    %669 = arith.truncf %667 : vector<2x32xf32> to vector<2x32xbf16>
    %cst_350 = arith.constant dense<0.000000e+00> : vector<2x10xf32>
    %670 = tpu.matmul %669, %668, %cst_350 {dimension_numbers = #tpu.dot_dimension_numbers<[1], [0], [0], [1], [0, 0, 1, 1], [], []>} : vector<2x32xbf16>, vector<32x10xbf16>, vector<2x10xf32> -> vector<2x10xf32>
    %c0_351 = arith.constant 0 : index
    %c3840 = arith.constant 3840 : index
    %671 = vector.load %arg11[%c0_351, %c3840] : memref<1x3968xf32, #tpu.memory_space<vmem>>, vector<1x10xf32>
    %672 = vector.broadcast %671 : vector<1x10xf32> to vector<2x10xf32>
    %673 = arith.addf %670, %672 : vector<2x10xf32>
    %c0_352 = arith.constant 0 : index
    %c0_353 = arith.constant 0 : index
    %674 = vector.load %arg13[%c0_352, %c0_353] : memref<2x10xf32, #tpu.memory_space<vmem>>, vector<2x10xf32>
    tpu.vector_store %arg13[%c0_352, %c0_353], %673 {strides = array<i32>} : memref<2x10xf32, #tpu.memory_space<vmem>>, vector<2x10xf32>,
    return
  }
}

</mosaic_0001>

<bundles_post_ra>
// kernel: coatnet_forward.1
= control target key start
LH: loop header
LB: loop body
LE: loop exit
PB: predicated region body
PF: predicated region fallthrough
CT: control target
= control target key end

     0   :  { %vm147_vm0 = vcmask 1041408   ;;  %s6554_s0 = inlined_call_operand.vmem [shape: bf16[128,36], index: 0, kind: input, shape index: {}]   ;;  %s6555_s1 = inlined_call_operand.vmem [shape: bf16[9,32,128], index: 1, kind: input, shape index: {}]   ;;  %s6556_s2 = inlined_call_operand.vmem [shape: bf16[9,32,32], index: 2, kind: input, shape index: {}]   ;;  %s6557_s3 = inlined_call_operand.vmem [shape: bf16[9,8,32], index: 3, kind: input, shape index: {}]   ;;  %s6558_s4 = inlined_call_operand.vmem [shape: bf16[36,8], index: 4, kind: input, shape index: {}]   ;;  %s6559_s5 = inlined_call_operand.vmem [shape: bf16[8,640], index: 5, kind: input, shape index: {}]   ;;  %s6560_s6 = inlined_call_operand.vmem [shape: bf16[16,256], index: 6, kind: input, shape index: {}]   ;;  %s6561_s7 = inlined_call_operand.vmem [shape: bf16[32,512], index: 7, kind: input, shape index: {}]   ;;  %s6562_s8 = inlined_call_operand.vmem [shape: bf16[128,32], index: 8, kind: input, shape index: {}]   ;;  %s6563_s9 = inlined_call_operand.vmem [shape: bf16[2,256], index: 9, kind: input, shape index: {}]   ;;  %s6564_s10 = inlined_call_operand.vmem [shape: bf16[32,2], index: 10, kind: input, shape index: {}]   ;;  %s6565_s11 = inlined_call_operand.vmem [shape: f32[1,3968], index: 11, kind: input, shape index: {}]   ;;  %s6566_s12 = inlined_call_operand.vmem [shape: f32[8,8], index: 12, kind: input, shape index: {}]   ;;  %s6567_s13 = inlined_call_operand.hbm [shape: f32[2,10], index: 13, kind: output, shape index: {}]  }
   0x1   :  { %v66_v0 = vld [vmem:[%s6558_s4 + $0x10] sm:$0x3]  ;;  %v4126_v4 = vld [vmem:[%s6558_s4 + $0x8] sm:$0xff]  ;;  %v4125_v5 = vld [vmem:[%s6558_s4] sm:$0xff] }
   0x2   :  { %v116_v1 = vunpack.c.l.b16 %v66_v0 }
   0x4   :  { %v119_v2 = vpack.c.b16 %v116_v1, %v116_v1 }
   0x6   :  { %v149_v3 = vsel %vm147_vm0, %v119_v2, 0 }
   0x7   :  { %156 = vmatpush.bf16.msra.mxu0 %v149_v3 }
   0xb   :  { %157 = vmatpush.bf16.msra.mxu0 %v4126_v4 }
   0xc   :  { %18 = vsyncpa [#allocation3], 0  ;;  %v4117_v6 = vld [vmem:[%s6554_s0] sm:$0xff]  ;;  %vm122_vm1 = vcmask 293888   ;;  %v4118_v7 = vld [vmem:[%s6554_s0 + $0x8] sm:$0xff]  ;;  %vm6568_vm2 = vcmask 64512  }
   0xd   :  { %v4119_v8 = vld [vmem:[%s6554_s0 + $0x10] sm:$0xff]  ;;  %v4120_v9 = vld [vmem:[%s6554_s0 + $0x18] sm:$0xff]  ;;  %v4121_v10 = vld [vmem:[%s6554_s0 + $0x20] sm:$0xff]  ;;  %s4402_s18 = smov 120   ;;  %s4403_s19 = smov 104  }
   0xe   :  { %v4122_v11 = vld [vmem:[%s6554_s0 + $0x28] sm:$0xff]  ;;  %v4123_v12 = vld [vmem:[%s6554_s0 + $0x30] sm:$0xff]  ;;  %v4124_v13 = vld [vmem:[%s6554_s0 + $0x38] sm:$0xff]  ;;  %s4405_s21 = smov 96   ;;  %s3654_s24 = sshll.u32 %s6567_s13, 4  ;;  %s3655_s24 = int_to_ptr.hbm [resolvable:$true] %s3654_s24 }
   0xf   :  { %158 = vmatpush.bf16.msra.mxu0 %v4125_v5 }
  0x12   :  { %3703 = vmatmul.msk.bf16.vlgmr.msra.gmra.mxu0 %vm122_vm1, %v4117_v6 }
  0x22   :  { %3704 = vmatmul.msk.bf16.gmra.mxu0 %vm122_vm1, %v4118_v7 }
  0x32   :  { %3705 = vmatmul.msk.bf16.gmra.mxu0 %vm122_vm1, %v4119_v8 }
  0x42   :  { %3706 = vmatmul.msk.bf16.gmra.mxu0 %vm122_vm1, %v4120_v9  ;;  %v4398_v9 = vmov 128.0  }
  0x43   :  { %4232 = vrcp.f32 %v4398_v9 }
  0x52   :  { %3707 = vmatmul.msk.bf16.gmra.mxu0 %vm122_vm1, %v4121_v10 }
  0x62   :  { %3708 = vmatmul.msk.bf16.gmra.mxu0 %vm122_vm1, %v4122_v11 }
  0x72   :  { %3709 = vmatmul.msk.bf16.gmra.mxu0 %vm122_vm1, %v4123_v12 }
  0x82   :  { %3710 = vmatmul.msk.bf16.gmra.mxu0 %vm122_vm1, %v4124_v13 }
  0x8f   :  { %v4511_v14 = vpop.f32.mrf.mxu0 }
  0x90   :  { %v248_v27 = vmul.f32 %v4511_v14, %v4511_v14  ;;  %v203_v30 = vsel %vm6568_vm2, %v4511_v14, 0.0 }
  0x92   :  { %v264_v35 = vsel %vm6568_vm2, %v248_v27, 0.0 }
  0x97   :  { %v4513_v15 = vpop.f32.mrf.mxu0 }
  0x98   :  { %v249_v26 = vmul.f32 %v4513_v15, %v4513_v15  ;;  %v204_v28 = vsel %vm6568_vm2, %v4513_v15, 0.0 }
  0x99   :  { %v205_v34 = vadd.f32 %v204_v28, %v203_v30 }
  0x9a   :  { %v265_v31 = vsel %vm6568_vm2, %v249_v26, 0.0 }
  0x9b   :  { %v266_v40 = vadd.f32 %v265_v31, %v264_v35 }
  0x9f   :  { %v4515_v16 = vpop.f32.mrf.mxu0 }
  0xa0   :  { %v250_v29 = vmul.f32 %v4515_v16, %v4515_v16  ;;  %v206_v32 = vsel %vm6568_vm2, %v4515_v16, 0.0 }
  0xa1   :  { %v207_v39 = vadd.f32 %v206_v32, %v205_v34 }
  0xa2   :  { %v267_v36 = vsel %vm6568_vm2, %v250_v29, 0.0 }
  0xa3   :  { %v268_v45 = vadd.f32 %v267_v36, %v266_v40  ;;  %v4233_v36 = vpop.eup %4232 }
  0xa4   :  { %vm245_vm3 = vweird.f32 %v4233_v36 }
  0xa7   :  { %v4517_v17 = vpop.f32.mrf.mxu0 }
  0xa8   :  { %v251_v33 = vmul.f32 %v4517_v17, %v4517_v17  ;;  %v208_v37 = vsel %vm6568_vm2, %v4517_v17, 0.0 }
  0xa9   :  { %v209_v46 = vadd.f32 %v208_v37, %v207_v39 }
  0xaa   :  { %v269_v42 = vsel %vm6568_vm2, %v251_v33, 0.0 }
  0xab   :  { %v270_v51 = vadd.f32 %v269_v42, %v268_v45 }
  0xaf   :  { %v4519_v18 = vpop.f32.mrf.mxu0 }
  0xb0   :  { %v252_v38 = vmul.f32 %v4519_v18, %v4519_v18  ;;  %v210_v43 = vsel %vm6568_vm2, %v4519_v18, 0.0 }
  0xb1   :  { %v211_v50 = vadd.f32 %v210_v43, %v209_v46 }
  0xb2   :  { %v271_v47 = vsel %vm6568_vm2, %v252_v38, 0.0 }
  0xb3   :  { %v272_v55 = vadd.f32 %v271_v47, %v270_v51  ;;  %v241_v47 = vmul.f32 128.0, %v4233_v36 }
  0xb7   :  { %v4521_v19 = vpop.f32.mrf.mxu0 }
  0xb8   :  { %v253_v44 = vmul.f32 %v4521_v19, %v4521_v19  ;;  %v212_v48 = vsel %vm6568_vm2, %v4521_v19, 0.0 }
  0xb9   :  { %v213_v56 = vadd.f32 %v212_v48, %v211_v50 }
  0xba   :  { %v273_v52 = vsel %vm6568_vm2, %v253_v44, 0.0 }
  0xbb   :  { %v274_v61 = vadd.f32 %v273_v52, %v272_v55  ;;  %v242_v55 = vsub.f32 1.0, %v241_v47 }
  0xbf   :  { %v4523_v20 = vpop.f32.mrf.mxu0 }
  0xc0   :  { %v254_v49 = vmul.f32 %v4523_v20, %v4523_v20  ;;  %v214_v53 = vsel %vm6568_vm2, %v4523_v20, 0.0 }
  0xc1   :  { %v215_v60 = vadd.f32 %v214_v53, %v213_v56 }
  0xc2   :  { %v275_v57 = vsel %vm6568_vm2, %v254_v49, 0.0 }
  0xc3   :  { %v276_v2 = vadd.f32 %v275_v57, %v274_v61 }
  0xc7   :  { %v4525_v21 = vpop.f32.mrf.mxu0 }
  0xc8   :  { %v255_v54 = vmul.f32 %v4525_v21, %v4525_v21  ;;  %v216_v58 = vsel %vm6568_vm2, %v4525_v21, 0.0 }
  0xc9   :  { %v217_v3 = vadd.f32 %v216_v58, %v215_v60 }
  0xca   :  { %v277_v63 = vsel %vm6568_vm2, %v255_v54, 0.0 }
  0xcb   :  { %v278_v8 = vadd.f32 %v277_v63, %v276_v2  ;;  %v243_v63 = vmul.f32 %v4233_v36, %v242_v55 }
  0xcf   :  { %v4527_v22 = vpop.f32.mrf.mxu0 }
  0xd0   :  { %v256_v59 = vmul.f32 %v4527_v22, %v4527_v22  ;;  %v218_v0 = vsel %vm6568_vm2, %v4527_v22, 0.0 }
  0xd1   :  { %v219_v7 = vadd.f32 %v218_v0, %v217_v3 }
  0xd2   :  { %v279_v4 = vsel %vm6568_vm2, %v256_v59, 0.0 }
  0xd3   :  { %v280_v13 = vadd.f32 %v279_v4, %v278_v8  ;;  %v244_v4 = vadd.f32 %v4233_v36, %v243_v63 }
  0xd5   :  { %v4623_v9 = vsel %vm245_vm3, %v4233_v36, %v244_v4 }
  0xd6   :  { %6591 = vst [vmem:[#allocation5_spill] sm:$0xff] %v4623_v9 }
  0xd7   :  { %v4529_v23 = vpop.f32.mrf.mxu0 }
  0xd8   :  { %v257_v1 = vmul.f32 %v4529_v23, %v4529_v23  ;;  %v220_v5 = vsel %vm6568_vm2, %v4529_v23, 0.0 }
  0xd9   :  { %v221_v26 = vadd.f32 %v220_v5, %v219_v7 }
  0xda   :  { %v281_v10 = vsel %vm6568_vm2, %v257_v1, 0.0 }
  0xdb   :  { %v282_v31 = vadd.f32 %v281_v10, %v280_v13 }
  0xdf   :  { %v4531_v24 = vpop.f32.mrf.mxu0 }
  0xe0   :  { %v258_v6 = vmul.f32 %v4531_v24, %v4531_v24  ;;  %v222_v11 = vsel %vm6568_vm2, %v4531_v24, 0.0 }
  0xe1   :  { %v223_v30 = vadd.f32 %v222_v11, %v221_v26 }
  0xe2   :  { %v283_v27 = vsel %vm6568_vm2, %v258_v6, 0.0 }
  0xe3   :  { %v284_v37 = vadd.f32 %v283_v27, %v282_v31 }
  0xe7   :  { %v4533_v25 = vpop.f32.mrf.mxu0 }
  0xe8   :  { %v259_v12 = vmul.f32 %v4533_v25, %v4533_v25  ;;  %v224_v28 = vsel %vm6568_vm2, %v4533_v25, 0.0 }
  0xe9   :  { %v225_v38 = vadd.f32 %v224_v28, %v223_v30 }
  0xea   :  { %v285_v33 = vsel %vm6568_vm2, %v259_v12, 0.0 }
  0xeb   :  { %v286_v44 = vadd.f32 %v285_v33, %v284_v37 }
  0xef   :  { %v4556_v41 = vpop.f32.mrf.mxu0 }
  0xf0   :  { %v260_v29 = vmul.f32 %v4556_v41, %v4556_v41  ;;  %v226_v34 = vsel %vm6568_vm2, %v4556_v41, 0.0 }
  0xf1   :  { %v227_v43 = vadd.f32 %v226_v34, %v225_v38 }
  0xf2   :  { %v287_v39 = vsel %vm6568_vm2, %v260_v29, 0.0 }
  0xf3   :  { %v288_v48 = vadd.f32 %v287_v39, %v286_v44 }
  0xf7   :  { %v4578_v62 = vpop.f32.mrf.mxu0 }
  0xf8   :  { %v261_v35 = vmul.f32 %v4578_v62, %v4578_v62  ;;  %v228_v40 = vsel %vm6568_vm2, %v4578_v62, 0.0 }
  0xf9   :  { %v229_v49 = vadd.f32 %v228_v40, %v227_v43 }
  0xfa   :  { %v289_v45 = vsel %vm6568_vm2, %v261_v35, 0.0 }
  0xfb   :  { %v290_v52 = vadd.f32 %v289_v45, %v288_v48 }
  0xff   :  { %v4600_v32 = vpop.f32.mrf.mxu0 }
 0x100   :  { %v262_v42 = vmul.f32 %v4600_v32, %v4600_v32  ;;  %v230_v46 = vsel %vm6568_vm2, %v4600_v32, 0.0 }
 0x101   :  { %v231_v51 = vadd.f32 %v230_v46, %v229_v49 }
 0x102   :  { %v291_v50 = vsel %vm6568_vm2, %v262_v42, 0.0 }
 0x103   :  { %v292_v57 = vadd.f32 %v291_v50, %v290_v52 }
 0x107   :  { %v4616_v53 = vpop.f32.mrf.mxu0 }
 0x108   :  { %v232_v54 = vsel %vm6568_vm2, %v4616_v53, 0.0  ;;  %v263_v56 = vmul.f32 %v4616_v53, %v4616_v53 }
 0x109   :  { %v233_v58 = vadd.f32 %v232_v54, %v231_v51 }
 0x10a   :  { %v293_v59 = vsel %vm6568_vm2, %v263_v56, 0.0 }
 0x10b   :  { %v234_v60 = vrot.slane %v233_v58, 4  ;;  %v294_v61 = vadd.f32 %v293_v59, %v292_v57 }
 0x10d   :  { %v235_v0 = vadd.f32 %v234_v60, %v233_v58  ;;  %v295_v1 = vrot.slane %v294_v61, 4 }
 0x10f   :  { %v236_v2 = vrot.slane %v235_v0, 2  ;;  %v296_v3 = vadd.f32 %v295_v1, %v294_v61 }
 0x111   :  { %v237_v5 = vadd.f32 %v236_v2, %v235_v0  ;;  %v297_v6 = vrot.slane %v296_v3, 2 }
 0x113   :  { %v238_v7 = vrot.slane %v237_v5, 1  ;;  %v298_v8 = vadd.f32 %v297_v6, %v296_v3 }
 0x115   :  { %v239_v10 = vadd.f32 %v238_v7, %v237_v5  ;;  %v299_v11 = vrot.slane %v298_v8, 1 }
 0x117   :  { %v247_v12 = vmul.f32 %v4623_v9, %v239_v10  ;;  %v300_v13 = vadd.f32 %v299_v11, %v298_v8 }
 0x119   :  { %v301_v26 = vmul.f32 %v300_v13, %v4623_v9  ;;  %v302_v27 = vmul.f32 %v247_v12, %v247_v12  ;;  %v305_v36 = vsub.f32 %v4511_v14, %v247_v12  ;;  %v306_v39 = vsub.f32 %v4513_v15, %v247_v12 }
 0x11a   :  { %v307_v40 = vsub.f32 %v4515_v16, %v247_v12  ;;  %v308_v42 = vsub.f32 %v4517_v17, %v247_v12  ;;  %v309_v44 = vsub.f32 %v4519_v18, %v247_v12  ;;  %v310_v45 = vsub.f32 %v4521_v19, %v247_v12  ;;  %v4201_v19 = vld [vmem:[%s6565_s11] ss:$0 sm:$0xff] }
 0x11b   :  { %v303_v28 = vsub.f32 %v301_v26, %v302_v27  ;;  %v311_v46 = vsub.f32 %v4523_v20, %v247_v12  ;;  %v312_v47 = vsub.f32 %v4525_v21, %v247_v12  ;;  %v313_v48 = vsub.f32 %v4527_v22, %v247_v12 }
 0x11c   :  { %v314_v14 = vsub.f32 %v4529_v23, %v247_v12  ;;  %v315_v49 = vsub.f32 %v4531_v24, %v247_v12  ;;  %v316_v15 = vsub.f32 %v4533_v25, %v247_v12  ;;  %v317_v16 = vsub.f32 %v4556_v41, %v247_v12 }
 0x11d   :  { %v304_v29 = vmax.f32 %v303_v28, 0.0  ;;  %v318_v17 = vsub.f32 %v4578_v62, %v247_v12  ;;  %v319_v20 = vsub.f32 %v4600_v32, %v247_v12  ;;  %v320_v23 = vsub.f32 %v4616_v53, %v247_v12  ;;  %v4202_v32 = vld [vmem:[%s6565_s11 + $0x1] ss:$0 sm:$0xff] }
 0x11f   :  { %v321_v30 = vadd.f32 1e-05, %v304_v29 }
 0x121   :  { %4234 = vrsqrt.f32 %v321_v30  ;;  %vm328_vm5 = vweird.f32 %v321_v30 }
 0x127   :  { %v4235_v31 = vpop.eup %4234 }
 0x128   :  { %v323_v33 = vmul.f32 %v4235_v31, %v321_v30  ;;  %vm329_vm4 = vweird.f32 %v4235_v31 }
 0x129   :  { %vm330_vm6 = vmor %vm328_vm5, %vm329_vm4 }
 0x12a   :  { %v324_v34 = vmul.f32 %v4235_v31, %v323_v33 }
 0x12c   :  { %v325_v35 = vmul.f32 0.5, %v324_v34 }
 0x12e   :  { %v326_v37 = vsub.f32 1.5, %v325_v35 }
 0x130   :  { %v327_v38 = vmul.f32 %v4235_v31, %v326_v37 }
 0x132   :  { %v331_v43 = vsel %vm330_vm6, %v4235_v31, %v327_v38 }
 0x133   :  { %v332_v50 = vmul.f32 %v331_v43, %v305_v36  ;;  %v333_v18 = vmul.f32 %v331_v43, %v306_v39  ;;  %v334_v21 = vmul.f32 %v331_v43, %v307_v40  ;;  %v335_v22 = vmul.f32 %v331_v43, %v308_v42 }
 0x134   :  { %v336_v51 = vmul.f32 %v331_v43, %v309_v44  ;;  %v337_v24 = vmul.f32 %v331_v43, %v310_v45  ;;  %v338_v52 = vmul.f32 %v331_v43, %v311_v46  ;;  %v339_v25 = vmul.f32 %v331_v43, %v312_v47 }
 0x135   :  { %v340_v54 = vmul.f32 %v331_v43, %v313_v48  ;;  %v341_v41 = vmul.f32 %v331_v43, %v314_v14  ;;  %v342_v55 = vmul.f32 %v331_v43, %v315_v49  ;;  %v343_v62 = vmul.f32 %v331_v43, %v316_v15 }
 0x136   :  { %v344_v56 = vmul.f32 %v331_v43, %v317_v16  ;;  %v345_v57 = vmul.f32 %v331_v43, %v318_v17  ;;  %v351_v58 = vmul.f32 %v4201_v19, %v332_v50  ;;  %v352_v59 = vmul.f32 %v4201_v19, %v333_v18 }
 0x137   :  { %v346_v60 = vmul.f32 %v331_v43, %v319_v20  ;;  %v353_v61 = vmul.f32 %v4201_v19, %v334_v21  ;;  %v354_v63 = vmul.f32 %v4201_v19, %v335_v22  ;;  %v355_v0 = vmul.f32 %v4201_v19, %v336_v51 }
 0x138   :  { %v347_v53 = vmul.f32 %v331_v43, %v320_v23  ;;  %v356_v1 = vmul.f32 %v4201_v19, %v337_v24  ;;  %v357_v2 = vmul.f32 %v4201_v19, %v338_v52  ;;  %v358_v3 = vmul.f32 %v4201_v19, %v339_v25 }
 0x139   :  { %v359_v4 = vmul.f32 %v4201_v19, %v340_v54  ;;  %v360_v5 = vmul.f32 %v4201_v19, %v341_v41  ;;  %v361_v6 = vmul.f32 %v4201_v19, %v342_v55  ;;  %v362_v7 = vmul.f32 %v4201_v19, %v343_v62 }
 0x13a   :  { %v363_v8 = vmul.f32 %v4201_v19, %v344_v56  ;;  %v364_v10 = vmul.f32 %v4201_v19, %v345_v57  ;;  %v4649_v11 = vadd.f32 %v4202_v32, %v351_v58  ;;  %v4651_v12 = vadd.f32 %v4202_v32, %v352_v59 }
 0x13b   :  { %v365_v13 = vmul.f32 %v4201_v19, %v346_v60  ;;  %v4653_v26 = vadd.f32 %v4202_v32, %v353_v61  ;;  %v4655_v27 = vadd.f32 %v4202_v32, %v354_v63  ;;  %v4657_v28 = vadd.f32 %v4202_v32, %v355_v0 }
 0x13c   :  { %6592 = vst [vmem:[#allocation6_spill] sm:$0xff] %v4649_v11  ;;  %v366_v29 = vmul.f32 %v4201_v19, %v347_v53  ;;  %v4659_v30 = vadd.f32 %v4202_v32, %v356_v1  ;;  %v4661_v31 = vadd.f32 %v4202_v32, %v357_v2  ;;  %v4663_v33 = vadd.f32 %v4202_v32, %v358_v3 }
 0x13d   :  { %6593 = vst [vmem:[#allocation7_spill] sm:$0xff] %v4651_v12  ;;  %v4665_v34 = vadd.f32 %v4202_v32, %v359_v4  ;;  %v4667_v35 = vadd.f32 %v4202_v32, %v360_v5  ;;  %v4669_v37 = vadd.f32 %v4202_v32, %v361_v6  ;;  %v4671_v38 = vadd.f32 %v4202_v32, %v362_v7 }
 0x13e   :  { %6594 = vst [vmem:[#allocation8_spill] sm:$0xff] %v4653_v26  ;;  %v4673_v36 = vadd.f32 %v4202_v32, %v363_v8  ;;  %v4675_v39 = vadd.f32 %v4202_v32, %v364_v10  ;;  %v386_v40 = vmul.f32 0.70710677, %v4649_v11  ;;  %v387_v42 = vmul.f32 0.70710677, %v4651_v12 }
 0x13f   :  { %6595 = vst [vmem:[#allocation9_spill] sm:$0xff] %v4655_v27  ;;  %v4679_v43 = vadd.f32 %v4202_v32, %v365_v13  ;;  %v388_v44 = vmul.f32 0.70710677, %v4653_v26  ;;  %v389_v45 = vmul.f32 0.70710677, %v4655_v27  ;;  %v4684_v47 = vadd.f32 %v4202_v32, %v366_v29 }
 0x140   :  { %6596 = vst [vmem:[#allocation10_spill] sm:$0xff] %v4657_v28  ;;  %v390_v46 = vmul.f32 0.70710677, %v4657_v28  ;;  %v391_v48 = vmul.f32 0.70710677, %v4659_v30  ;;  %vm402_vm7 = vcmp.ge.f32.partialorder %v386_v40, 0.0 }
 0x141   :  { %6597 = vst [vmem:[#allocation11_spill] sm:$0xff] %v4659_v30  ;;  %v392_v14 = vmul.f32 0.70710677, %v4661_v31  ;;  %v393_v49 = vmul.f32 0.70710677, %v4663_v33  ;;  %vm403_vm8 = vcmp.ge.f32.partialorder %v387_v42, 0.0 }
 0x142   :  { %6598 = vst [vmem:[#allocation12_spill] sm:$0xff] %v4661_v31  ;;  %v394_v15 = vmul.f32 0.70710677, %v4665_v34  ;;  %v395_v16 = vmul.f32 0.70710677, %v4667_v35  ;;  %vm404_vm9 = vcmp.ge.f32.partialorder %v388_v44, 0.0 }
 0x143   :  { %6599 = vst [vmem:[#allocation13_spill] sm:$0xff] %v4663_v33  ;;  %v396_v17 = vmul.f32 0.70710677, %v4669_v37  ;;  %v397_v50 = vmul.f32 0.70710677, %v4671_v38  ;;  %vm405_vm10 = vcmp.ge.f32.partialorder %v389_v45, 0.0 }
 0x144   :  { %6600 = vst [vmem:[#allocation14_spill] sm:$0xff] %v4665_v34  ;;  %v398_v18 = vmul.f32 0.70710677, %v4673_v36  ;;  %v4694_v19 = vand.u32 2147483647, %v386_v40  ;;  %vm406_vm11 = vcmp.ge.f32.partialorder %v390_v46, 0.0 }
 0x145   :  { %6601 = vst [vmem:[#allocation15_spill] sm:$0xff] %v4667_v35  ;;  %v4697_v20 = vmul.f32 0.70710677, %v4675_v39  ;;  %v4700_v21 = vmul.f32 0.70710677, %v4679_v43  ;;  %vm407_vm12 = vcmp.ge.f32.partialorder %v391_v48, 0.0 }
 0x146   :  { %6602 = vst [vmem:[#allocation16_spill] sm:$0xff] %v4669_v37  ;;  %v4702_v22 = vand.u32 2147483647, %v387_v42  ;;  %v4705_v51 = vmul.f32 0.70710677, %v4684_v47  ;;  %vm408_vm13 = vcmp.ge.f32.partialorder %v392_v14, 0.0 }
 0x147   :  { %6603 = vst [vmem:[#allocation17_spill] sm:$0xff] %v4671_v38  ;;  %v4707_v23 = vand.u32 2147483647, %v388_v44  ;;  %v4709_v24 = vand.u32 2147483647, %v389_v45  ;;  %vm409_vm14 = vcmp.ge.f32.partialorder %v393_v49, 0.0 }
 0x148   :  { %6604 = vst [vmem:[#allocation18_spill] sm:$0xff] %v4673_v36  ;;  %v450_v52 = vmul.f32 0.3275911, %v4694_v19  ;;  %vm410_vm15 = vcmp.ge.f32.partialorder %v394_v15, 0.0  ;;  %v4712_v25 = vand.u32 2147483647, %v390_v46 }
 0x149   :  { %6605 = vst [vmem:[#allocation19_spill] sm:$0xff] %v4675_v39  ;;  %v451_v54 = vmul.f32 0.3275911, %v4702_v22  ;;  %vm411_vm0 = vcmp.ge.f32.partialorder %v395_v16, 0.0  ;;  %vm412_vm1 = vcmp.ge.f32.partialorder %v396_v17, 0.0  ;;  %vm413_vm3 = vcmp.ge.f32.partialorder %v397_v50, 0.0 }
 0x14a   :  { %6606 = vst [vmem:[#allocation20_spill] sm:$0xff] %v4679_v43  ;;  %v452_v41 = vmul.f32 0.3275911, %v4707_v23  ;;  %vm414_vm4 = vcmp.ge.f32.partialorder %v398_v18, 0.0  ;;  %vm415_vm5 = vcmp.ge.f32.partialorder %v4697_v20, 0.0  ;;  %vm416_vm6 = vcmp.ge.f32.partialorder %v4700_v21, 0.0 }
 0x14b   :  { %6607 = vst [vmem:[#allocation21_spill] sm:$0xff] %v4684_v47  ;;  %v4718_v55 = vand.u32 2147483647, %v391_v48  ;;  %vm417_vm2 = vcmp.ge.f32.partialorder %v4705_v51, 0.0  ;;  %v6576_v62 = vmov -1.0   ;;  %v4730_v59 = vadd.f32 1.0, %v450_v52 }
 0x14c   :  { %v4723_v56 = vsel %vm402_vm7, 1.0, %v6576_v62  ;;  %v4727_v57 = vsel %vm403_vm8, 1.0, %v6576_v62  ;;  %v453_v58 = vmul.f32 0.3275911, %v4709_v24  ;;  %v4734_v32 = vsel %vm404_vm9, 1.0, %v6576_v62 }
 0x14d   :  { %6608 = vst [vmem:[#allocation22_spill] sm:$0xff] %v4723_v56  ;;  %v4738_v60 = vsel %vm405_vm10, 1.0, %v6576_v62  ;;  %v454_v61 = vmul.f32 0.3275911, %v4712_v25  ;;  %v4741_v63 = vadd.f32 1.0, %v451_v54  ;;  %v4745_v0 = vsel %vm406_vm11, 1.0, %v6576_v62 }
 0x14e   :  { %6609 = vst [vmem:[#allocation23_spill] sm:$0xff] %v4727_v57  ;;  %v4749_v53 = vsel %vm407_vm12, 1.0, %v6576_v62  ;;  %v4751_v1 = vand.u32 2147483647, %v392_v14  ;;  %v4753_v2 = vadd.f32 1.0, %v452_v41  ;;  %v4757_v3 = vsel %vm408_vm13, 1.0, %v6576_v62 }
 0x14f   :  { %6610 = vst [vmem:[#allocation24_spill] sm:$0xff] %v4734_v32  ;;  %v4761_v4 = vsel %vm409_vm14, 1.0, %v6576_v62  ;;  %v4765_v5 = vsel %vm410_vm15, 1.0, %v6576_v62  ;;  %v455_v6 = vmul.f32 0.3275911, %v4718_v55  ;;  %v4770_v7 = vsel %vm411_vm0, 1.0, %v6576_v62 }
 0x150   :  { %6611 = vst [vmem:[#allocation25_spill] sm:$0xff] %v4738_v60  ;;  %v4774_v8 = vsel %vm412_vm1, 1.0, %v6576_v62  ;;  %v4776_v10 = vadd.f32 1.0, %v453_v58  ;;  %4236 = vrcp.f32 %v4730_v59  ;;  %v4781_v13 = vsel %vm413_vm3, 1.0, %v6576_v62 }
 0x151   :  { %6612 = vst [vmem:[#allocation26_spill] sm:$0xff] %v4745_v0  ;;  %v4783_v29 = vand.u32 2147483647, %v393_v49  ;;  %v4785_v40 = vadd.f32 1.0, %v454_v61  ;;  %4238 = vrcp.f32 %v4741_v63  ;;  %v4788_v42 = vand.u32 2147483647, %v394_v15 }
 0x152   :  { %6613 = vst [vmem:[#allocation27_spill] sm:$0xff] %v4749_v53  ;;  %v4790_v44 = vand.u32 2147483647, %v395_v16  ;;  %v456_v45 = vmul.f32 0.3275911, %v4751_v1  ;;  %4240 = vrcp.f32 %v4753_v2  ;;  %v4796_v46 = vsel %vm414_vm4, 1.0, %v6576_v62 }
 0x153   :  { %6614 = vst [vmem:[#allocation28_spill] sm:$0xff] %v4757_v3  ;;  %v4798_v48 = vand.u32 2147483647, %v396_v17  ;;  %v4800_v14 = vand.u32 2147483647, %v397_v50  ;;  %v4802_v49 = vadd.f32 1.0, %v455_v6  ;;  %4242 = vrcp.f32 %v4776_v10 }
 0x154   :  { %6615 = vst [vmem:[#allocation29_spill] sm:$0xff] %v4761_v4  ;;  %v4804_v52 = vand.u32 2147483647, %v398_v18  ;;  %v4807_v15 = vand.u32 2147483647, %v4697_v20  ;;  %v4816_v54 = vsel %vm415_vm5, 1.0, %v6576_v62  ;;  %4244 = vrcp.f32 %v4785_v40 }
 0x155   :  { %6616 = vst [vmem:[#allocation30_spill] sm:$0xff] %v4765_v5  ;;  %v4810_v16 = vand.u32 2147483647, %v4700_v21  ;;  %v4819_v17 = vand.u32 2147483647, %v4705_v51  ;;  %v4828_v41 = vsel %vm416_vm6, 1.0, %v6576_v62  ;;  %4246 = vrcp.f32 %v4802_v49 }
 0x156   :  { %6617 = vst [vmem:[#allocation31_spill] sm:$0xff] %v4770_v7  ;;  %v457_v50 = vmul.f32 0.3275911, %v4783_v29  ;;  %v4823_v18 = vpop.eup %4236  ;;  %v458_v58 = vmul.f32 0.3275911, %v4788_v42  ;;  %v4832_v61 = vadd.f32 1.0, %v456_v45  ;;  %vm502_vm7 = vweird.f32 %v4741_v63 }
 0x157   :  { %6618 = vst [vmem:[#allocation32_spill] sm:$0xff] %v4774_v8  ;;  %v459_v20 = vmul.f32 0.3275911, %v4790_v44  ;;  %v4834_v6 = vpop.eup %4238  ;;  %v4839_v9 = vsel %vm417_vm2, 1.0, %v6576_v62  ;;  %v460_v35 = vmul.f32 0.3275911, %v4798_v48  ;;  %v483_v51 = vmul.f32 %v4823_v18, %v4730_v59 }
 0x158   :  { %6619 = vst [vmem:[#allocation33_spill] sm:$0xff] %v4781_v13  ;;  %v461_v34 = vmul.f32 0.3275911, %v4800_v14  ;;  %v4844_v21 = vpop.eup %4240  ;;  %v462_v38 = vmul.f32 0.3275911, %v4804_v52  ;;  %v4850_v7 = vadd.f32 1.0, %v457_v50  ;;  %v498_v62 = vmul.f32 %v4834_v6, %v4741_v63 }
 0x159   :  { %6620 = vst [vmem:[#allocation34_spill] sm:$0xff] %v4796_v46  ;;  %v463_v45 = vmul.f32 0.3275911, %v4807_v15  ;;  %v464_v37 = vmul.f32 0.3275911, %v4810_v16  ;;  %v4856_v5 = vpop.eup %4242  ;;  %v4858_v4 = vadd.f32 1.0, %v458_v58  ;;  %4248 = vrcp.f32 %v4832_v61 }
 0x15a   :  { %6621 = vst [vmem:[#allocation35_spill] sm:$0xff] %v4816_v54  ;;  %v465_v33 = vmul.f32 0.3275911, %v4819_v17  ;;  %v4860_v13 = vadd.f32 1.0, %v459_v20  ;;  %v4865_v8 = vpop.eup %4244  ;;  %v4867_v50 = vadd.f32 1.0, %v460_v35  ;;  %v4869_v3 = vadd.f32 1.0, %v461_v34 }
 0x15b   :  { %6622 = vst [vmem:[#allocation36_spill] sm:$0xff] %v4819_v17  ;;  %v528_v54 = vmul.f32 %v4856_v5, %v4776_v10  ;;  %v4874_v58 = vadd.f32 1.0, %v462_v38  ;;  %v4876_v20 = vadd.f32 1.0, %v463_v45  ;;  %v508_v46 = vand.u32 2147483648, %v4741_v63  ;;  %v4881_v0 = vpop.eup %4246 }
 0x15c   :  { %6623 = vst [vmem:[#allocation37_spill] sm:$0xff] %v4828_v41  ;;  %v493_v41 = vand.u32 2147483648, %v4730_v59  ;;  %v543_v53 = vmul.f32 %v4865_v8, %v4785_v40  ;;  %v4883_v35 = vadd.f32 1.0, %v464_v37  ;;  %v4885_v34 = vadd.f32 1.0, %v465_v33 }
 0x15d   :  { %6624 = vst [vmem:[#allocation38_spill] sm:$0xff] %v4839_v9  ;;  %v513_v9 = vmul.f32 %v4844_v21, %v4753_v2  ;;  %v484_v60 = vsub.f32 1.0, %v483_v51  ;;  %v499_v32 = vsub.f32 1.0, %v498_v62  ;;  %vm487_vm2 = vweird.f32 %v4730_v59 }
 0x15e   :  { %v491_v38 = vand.u32 2147483647, %v4730_v59  ;;  %v523_v45 = vand.u32 2147483648, %v4753_v2  ;;  %v558_v56 = vmul.f32 %v4881_v0, %v4802_v49  ;;  %v4892_v47 = vor.u32 1.1754944e-38, %v493_v41 }
 0x15f   :  { %v514_v57 = vsub.f32 1.0, %v513_v9  ;;  %v506_v37 = vand.u32 2147483647, %v4741_v63  ;;  %v529_v33 = vsub.f32 1.0, %v528_v54  ;;  %v538_v51 = vand.u32 2147483648, %v4776_v10  ;;  %v4897_v62 = vpop.eup %4248 }
 0x160   :  { %v4899_v43 = vor.u32 1.1754944e-38, %v508_v46  ;;  %vm517_vm8 = vweird.f32 %v4753_v2  ;;  %v521_v9 = vand.u32 2147483647, %v4753_v2  ;;  %v536_v39 = vand.u32 2147483647, %v4776_v10 }
 0x161   :  { %v544_v36 = vsub.f32 1.0, %v543_v53  ;;  %v485_v41 = vmul.f32 %v4823_v18, %v484_v60  ;;  %v500_v31 = vmul.f32 %v4834_v6, %v499_v32  ;;  %vm532_vm9 = vweird.f32 %v4776_v10 }
 0x162   :  { %v553_v54 = vand.u32 2147483648, %v4785_v40  ;;  %v573_v30 = vmul.f32 %v4897_v62, %v4832_v61  ;;  %v515_v46 = vmul.f32 %v4844_v21, %v514_v57  ;;  %v524_v28 = vor.u32 1.1754944e-38, %v523_v45 }
 0x163   :  { %v551_v27 = vand.u32 2147483647, %v4785_v40  ;;  %v559_v26 = vsub.f32 1.0, %v558_v56  ;;  %vm488_vm10 = vweird.f32 %v4823_v18  ;;  %vm4913_vm11 = vcmp.eq.f32.partialorder %v491_v38, 8.507059e+37 }
 0x164   :  { %vm4917_vm12 = vcmp.eq.f32.partialorder %v506_v37, 8.507059e+37  ;;  %v530_v60 = vmul.f32 %v4856_v5, %v529_v33  ;;  %v539_v12 = vor.u32 1.1754944e-38, %v538_v51  ;;  %vm503_vm14 = vweird.f32 %v4834_v6  ;;  %vm4950_vm5 = vmor %vm487_vm2, %vm488_vm10 }
 0x165   :  { %vm4924_vm15 = vcmp.eq.f32.partialorder %v521_v9, 8.507059e+37  ;;  %v545_v56 = vmul.f32 %v4865_v8, %v544_v36  ;;  %v566_v38 = vand.u32 2147483647, %v4802_v49  ;;  %4250 = vrcp.f32 %v4850_v7  ;;  %vm4962_vm13 = vmor %vm502_vm7, %vm503_vm14 }
 0x166   :  { %v486_v45 = vadd.f32 %v4823_v18, %v485_v41  ;;  %v501_v37 = vadd.f32 %v4834_v6, %v500_v31  ;;  %vm4934_vm1 = vcmp.eq.f32.partialorder %v536_v39, 8.507059e+37  ;;  %v554_v51 = vor.u32 1.1754944e-38, %v553_v54 }
 0x167   :  { %v574_v9 = vsub.f32 1.0, %v573_v30  ;;  %v516_v11 = vadd.f32 %v4844_v21, %v515_v46  ;;  %vm518_vm3 = vweird.f32 %v4844_v21  ;;  %vm4940_vm4 = vcmp.eq.f32.partialorder %v551_v27, 8.507059e+37 }
 0x168   :  { %v560_v17 = vmul.f32 %v4881_v0, %v559_v26  ;;  %4252 = vrcp.f32 %v4858_v4  ;;  %v531_v30 = vadd.f32 %v4856_v5, %v530_v60  ;;  %vm533_vm6 = vweird.f32 %v4856_v5  ;;  %vm4983_vm7 = vmor %vm517_vm8, %vm518_vm3 }
 0x169   :  { %v568_v27 = vand.u32 2147483648, %v4802_v49  ;;  %vm577_vm0 = vweird.f32 %v4832_v61  ;;  %v546_v39 = vadd.f32 %v4865_v8, %v545_v56  ;;  %vm548_vm2 = vweird.f32 %v4865_v8 }
 0x16a   :  { %vm4968_vm10 = vcmp.eq.f32.partialorder %v566_v38, 8.507059e+37  ;;  %4254 = vrcp.f32 %v4860_v13  ;;  %v490_v41 = vsel %vm4950_vm5, %v4823_v18, %v486_v45  ;;  %v505_v63 = vsel %vm4962_vm13, %v4834_v6, %v501_v37  ;;  %vm4998_vm13 = vmor %vm532_vm9, %vm533_vm6 }
 0x16b   :  { %vm563_vm14 = vweird.f32 %v4881_v0  ;;  %v575_v46 = vmul.f32 %v4897_v62, %v574_v9  ;;  %v4989_v60 = vpop.eup %4250  ;;  %v520_v18 = vsel %vm4983_vm7, %v4844_v21, %v516_v11  ;;  %v561_v6 = vadd.f32 %v4881_v0, %v560_v17 }
 0x16c   :  { %v581_v56 = vand.u32 2147483647, %v4832_v61  ;;  %4256 = vrcp.f32 %v4867_v50  ;;  %v535_v38 = vsel %vm4998_vm13, %v4856_v5, %v531_v30  ;;  %vm6645_vm8 = vweird.f32 %v4785_v40 }
 0x16d   :  { %vm5012_vm3 = vmor %vm6645_vm8, %vm548_vm2  ;;  %v569_v10 = vor.u32 1.1754944e-38, %v568_v27  ;;  %v583_v21 = vand.u32 2147483648, %v4832_v61  ;;  %v588_v17 = vmul.f32 %v4989_v60, %v4850_v7  ;;  %v5024_v5 = vsel %vm4913_vm11, %v4892_v47, %v490_v41 }
 0x16e   :  { %v5019_v45 = vpop.eup %4252  ;;  %v5029_v40 = vsel %vm4917_vm12, %v4899_v43, %v505_v63  ;;  %v550_v37 = vsel %vm5012_vm3, %v4865_v8, %v546_v39  ;;  %4258 = vrcp.f32 %v4869_v3  ;;  %v5037_v9 = vsel %vm4924_vm15, %v524_v28, %v520_v18 }
 0x16f   :  { %vm6648_vm9 = vweird.f32 %v4802_v49  ;;  %v576_v43 = vadd.f32 %v4897_v62, %v575_v46  ;;  %vm578_vm12 = vweird.f32 %v4897_v62  ;;  %v603_v8 = vmul.f32 %v5019_v45, %v4858_v4 }
 0x170   :  { %vm5043_vm11 = vmor %vm6648_vm9, %vm563_vm14  ;;  %v5051_v53 = vpop.eup %4254  ;;  %v5055_v28 = vsel %vm4934_vm1, %v539_v12, %v535_v38  ;;  %vm5060_vm15 = vcmp.eq.f32.partialorder %v581_v56, 8.507059e+37  ;;  %v598_v57 = vand.u32 2147483648, %v4850_v7  ;;  %v5067_v31 = vsel %vm4940_vm4, %v554_v51, %v550_v37 }
 0x171   :  { %v565_v49 = vsel %vm5043_vm11, %v4881_v0, %v561_v6  ;;  %v584_v30 = vor.u32 1.1754944e-38, %v583_v21  ;;  %v589_v27 = vsub.f32 1.0, %v588_v17  ;;  %v618_v12 = vmul.f32 %v5051_v53, %v4860_v13  ;;  %vm5075_vm1 = vmor %vm577_vm0, %vm578_vm12 }
 0x172   :  { %v5071_v33 = vpop.eup %4256  ;;  %v596_v26 = vand.u32 2147483647, %v4850_v7  ;;  %v604_v39 = vsub.f32 1.0, %v603_v8  ;;  %v613_v36 = vand.u32 2147483648, %v4858_v4  ;;  %4260 = vrcp.f32 %v4874_v58 }
 0x173   :  { %v5084_v51 = vsel %vm4968_vm10, %v569_v10, %v565_v49  ;;  %v580_v41 = vsel %vm5075_vm1, %v4897_v62, %v576_v43  ;;  %vm592_vm0 = vweird.f32 %v4850_v7  ;;  %v619_v61 = vsub.f32 1.0, %v618_v12 }
 0x174   :  { %v633_v63 = vmul.f32 %v5071_v33, %v4867_v50  ;;  %v5092_v54 = vpop.eup %4258  ;;  %v599_v46 = vor.u32 1.1754944e-38, %v598_v57  ;;  %vm607_vm4 = vweird.f32 %v4858_v4  ;;  %v611_v18 = vand.u32 2147483647, %v4858_v4 }
 0x175   :  { %v628_v59 = vand.u32 2147483648, %v4860_v13  ;;  %4262 = vrcp.f32 %v4876_v20  ;;  %v590_v2 = vmul.f32 %v4989_v60, %v589_v27  ;;  %vm622_vm5 = vweird.f32 %v4860_v13 }
 0x176   :  { %v626_v62 = vand.u32 2147483647, %v4860_v13  ;;  %v634_v6 = vsub.f32 1.0, %v633_v63  ;;  %v5103_v56 = vsel %vm5060_vm15, %v584_v30, %v580_v41  ;;  %v605_v38 = vmul.f32 %v5019_v45, %v604_v39 }
 0x177   :  { %v614_v11 = vor.u32 1.1754944e-38, %v613_v36  ;;  %v648_v10 = vmul.f32 %v5092_v54, %v4869_v3  ;;  %vm593_vm6 = vweird.f32 %v4989_v60  ;;  %vm5109_vm2 = vcmp.eq.f32.partialorder %v596_v26, 8.507059e+37 }
 0x178   :  { %v620_v17 = vmul.f32 %v5051_v53, %v619_v61  ;;  %vm637_vm10 = vweird.f32 %v4867_v50  ;;  %v641_v37 = vand.u32 2147483647, %v4867_v50  ;;  %v5116_v47 = vpop.eup %4260  ;;  %vm608_vm7 = vweird.f32 %v5019_v45  ;;  %vm5151_vm11 = vmor %vm592_vm0, %vm593_vm6 }
 0x179   :  { %vm5119_vm14 = vcmp.eq.f32.partialorder %v611_v18, 8.507059e+37  ;;  %v629_v8 = vor.u32 1.1754944e-38, %v628_v59  ;;  %v643_v49 = vand.u32 2147483648, %v4867_v50  ;;  %v649_v32 = vsub.f32 1.0, %v648_v10  ;;  %vm5165_vm15 = vmor %vm607_vm4, %vm608_vm7 }
 0x17a   :  { %v591_v57 = vadd.f32 %v4989_v60, %v590_v2  ;;  %vm5125_vm13 = vcmp.eq.f32.partialorder %v626_v62, 8.507059e+37  ;;  %v635_v27 = vmul.f32 %v5071_v33, %v634_v6  ;;  %v656_v12 = vand.u32 2147483647, %v4869_v3 }
 0x17b   :  { %v663_v0 = vmul.f32 %v5116_v47, %v4874_v58  ;;  %v5133_v26 = vpop.eup %4262  ;;  %v606_v39 = vadd.f32 %v5019_v45, %v605_v38  ;;  %vm623_vm8 = vweird.f32 %v5051_v53  ;;  %vm652_vm3 = vweird.f32 %v4869_v3 }
 0x17c   :  { %v658_v36 = vand.u32 2147483648, %v4869_v3  ;;  %v621_v41 = vadd.f32 %v5051_v53, %v620_v17  ;;  %vm5140_vm9 = vcmp.eq.f32.partialorder %v641_v37, 8.507059e+37  ;;  %v650_v63 = vmul.f32 %v5092_v54, %v649_v32  ;;  %vm5182_vm0 = vmor %vm622_vm5, %vm623_vm8 }
 0x17d   :  { %v664_v18 = vsub.f32 1.0, %v663_v0  ;;  %v678_v59 = vmul.f32 %v5133_v26, %v4876_v20  ;;  %vm638_vm12 = vweird.f32 %v5071_v33  ;;  %v644_v62 = vor.u32 1.1754944e-38, %v643_v49 }
 0x17e   :  { %v671_v6 = vand.u32 2147483647, %v4874_v58  ;;  %4264 = vrcp.f32 %v4883_v35  ;;  %v595_v38 = vsel %vm5151_vm11, %v4989_v60, %v591_v57  ;;  %v636_v10 = vadd.f32 %v5071_v33, %v635_v27  ;;  %vm5202_vm5 = vmor %vm637_vm10, %vm638_vm12 }
 0x17f   :  { %vm5170_vm1 = vcmp.eq.f32.partialorder %v656_v12, 8.507059e+37  ;;  %v673_v37 = vand.u32 2147483648, %v4874_v58  ;;  %v679_v49 = vsub.f32 1.0, %v678_v59  ;;  %v610_v60 = vsel %vm5165_vm15, %v5019_v45, %v606_v39 }
 0x180   :  { %v659_v32 = vor.u32 1.1754944e-38, %v658_v36  ;;  %v686_v57 = vand.u32 2147483647, %v4876_v20  ;;  %4266 = vrcp.f32 %v4885_v34  ;;  %v625_v27 = vsel %vm5182_vm0, %v5051_v53, %v621_v41 }
 0x181   :  { %v651_v12 = vadd.f32 %v5092_v54, %v650_v63  ;;  %vm653_vm4 = vweird.f32 %v5092_v54  ;;  %v665_v45 = vmul.f32 %v5116_v47, %v664_v18  ;;  %v5196_v13 = vsel %vm5109_vm2, %v599_v46, %v595_v38 }
 0x182   :  { %vm667_vm6 = vweird.f32 %v4874_v58  ;;  %v680_v53 = vmul.f32 %v5133_v26, %v679_v49  ;;  %v688_v39 = vand.u32 2147483648, %v4876_v20  ;;  %v5211_v36 = vsel %vm5119_vm14, %v614_v11, %v610_v60  ;;  %vm5227_vm7 = vmor %vm652_vm3, %vm653_vm4 }
 0x183   :  { %v640_v46 = vsel %vm5202_vm5, %v5071_v33, %v636_v10  ;;  %vm5216_vm2 = vcmp.eq.f32.partialorder %v671_v6, 8.507059e+37  ;;  %v674_v21 = vor.u32 1.1754944e-38, %v673_v37  ;;  %vm682_vm10 = vweird.f32 %v4876_v20 }
 0x184   :  { %v4265_v41 = vpop.eup %4264  ;;  %v5223_v63 = vsel %vm5125_vm13, %v629_v8, %v625_v27  ;;  %vm668_vm14 = vweird.f32 %v5116_v47  ;;  %vm5232_vm8 = vcmp.eq.f32.partialorder %v686_v57, 8.507059e+37  ;;  %v701_v43 = vand.u32 2147483647, %v4883_v35 }
 0x185   :  { %v655_v30 = vsel %vm5227_vm7, %v5092_v54, %v651_v12  ;;  %v666_v8 = vadd.f32 %v5116_v47, %v665_v45  ;;  %vm683_vm13 = vweird.f32 %v5133_v26  ;;  %v693_v3 = vmul.f32 %v4265_v41, %v4883_v35 }
 0x186   :  { %v4267_v18 = vpop.eup %4266  ;;  %v5245_v59 = vsel %vm5140_vm9, %v644_v62, %v640_v46  ;;  %v681_v2 = vadd.f32 %v5133_v26, %v680_v53  ;;  %v689_v6 = vor.u32 1.1754944e-38, %v688_v39  ;;  %v703_v38 = vand.u32 2147483648, %v4883_v35  ;;  %vm5260_vm9 = vmor %vm667_vm6, %vm668_vm14 }
 0x187   :  { %v694_v7 = vsub.f32 1.0, %v693_v3  ;;  %vm697_vm3 = vweird.f32 %v4883_v35  ;;  %v708_v54 = vmul.f32 %v4267_v18, %v4885_v34  ;;  %vm712_vm11 = vweird.f32 %v4885_v34  ;;  %vm5277_vm15 = vmor %vm682_vm10, %vm683_vm13 }
 0x188   :  { %v5254_v10 = vsel %vm5170_vm1, %v659_v32, %v655_v30  ;;  %vm5264_vm12 = vcmp.eq.f32.partialorder %v701_v43, 8.507059e+37  ;;  %v716_v37 = vand.u32 2147483647, %v4885_v34  ;;  %v718_v49 = vand.u32 2147483648, %v4885_v34 }
 0x189   :  { %v670_v17 = vsel %vm5260_vm9, %v5116_v47, %v666_v8  ;;  %v695_v60 = vmul.f32 %v4265_v41, %v694_v7  ;;  %vm698_vm1 = vweird.f32 %v4265_v41  ;;  %v709_v4 = vsub.f32 1.0, %v708_v54 }
 0x18a   :  { %v685_v32 = vsel %vm5277_vm15, %v5133_v26, %v681_v2  ;;  %v704_v57 = vor.u32 1.1754944e-38, %v703_v38  ;;  %v722_v27 = vmul.f32 1.0614054, %v5024_v5  ;;  %v723_v47 = vmul.f32 1.0614054, %v5029_v40  ;;  %vm5293_vm4 = vmor %vm697_vm3, %vm698_vm1 }
 0x18b   :  { %v696_v12 = vadd.f32 %v4265_v41, %v695_v60  ;;  %v710_v45 = vmul.f32 %v4267_v18, %v709_v4  ;;  %vm713_vm0 = vweird.f32 %v4267_v18  ;;  %v724_v20 = vmul.f32 1.0614054, %v5037_v9 }
 0x18c   :  { %v5289_v0 = vsel %vm5216_vm2, %v674_v21, %v670_v17  ;;  %vm5297_vm5 = vcmp.eq.f32.partialorder %v716_v37, 8.507059e+37  ;;  %v719_v39 = vor.u32 1.1754944e-38, %v718_v49  ;;  %v725_v46 = vmul.f32 1.0614054, %v5055_v28  ;;  %vm714_vm6 = vmor %vm712_vm11, %vm713_vm0 }
 0x18d   :  { %v5304_v11 = vsel %vm5232_vm8, %v689_v6, %v685_v32  ;;  %v700_v50 = vsel %vm5293_vm4, %v4265_v41, %v696_v12  ;;  %v711_v21 = vadd.f32 %v4267_v18, %v710_v45  ;;  %v726_v35 = vmul.f32 1.0614054, %v5067_v31 }
 0x18e   :  { %v727_v43 = vmul.f32 1.0614054, %v5084_v51  ;;  %v728_v30 = vmul.f32 1.0614054, %v5103_v56  ;;  %v729_v8 = vmul.f32 1.0614054, %v5196_v13  ;;  %v5319_v41 = vsel %vm5264_vm12, %v704_v57, %v700_v50 }
 0x18f   :  { %v715_v3 = vsel %vm714_vm6, %v4267_v18, %v711_v21  ;;  %v730_v33 = vmul.f32 1.0614054, %v5211_v36  ;;  %v731_v2 = vmul.f32 1.0614054, %v5223_v63  ;;  %v732_v6 = vmul.f32 1.0614054, %v5245_v59 }
 0x190   :  { %v733_v34 = vmul.f32 1.0614054, %v5254_v10  ;;  %v734_v38 = vmul.f32 1.0614054, %v5289_v0  ;;  %v735_v7 = vmul.f32 1.0614054, %v5304_v11  ;;  %v5326_v54 = vsel %vm5297_vm5, %v719_v39, %v715_v3 }
 0x191   :  { %v3711_v18 = vadd.f32 -1.4531521, %v722_v27  ;;  %v3712_v61 = vadd.f32 -1.4531521, %v723_v47  ;;  %v3713_v37 = vadd.f32 -1.4531521, %v724_v20 }
 0x192   :  { %v3714_v49 = vadd.f32 -1.4531521, %v725_v46  ;;  %v3715_v17 = vadd.f32 -1.4531521, %v726_v35  ;;  %v3716_v58 = vadd.f32 -1.4531521, %v727_v43 }
 0x193   :  { %v736_v62 = vmul.f32 1.0614054, %v5319_v41  ;;  %v3717_v60 = vadd.f32 -1.4531521, %v728_v30  ;;  %v3718_v4 = vadd.f32 -1.4531521, %v729_v8  ;;  %v754_v39 = vmul.f32 %v3711_v18, %v5024_v5 }
 0x194   :  { %v737_v32 = vmul.f32 1.0614054, %v5326_v54  ;;  %v3719_v57 = vadd.f32 -1.4531521, %v730_v33  ;;  %v3720_v12 = vadd.f32 -1.4531521, %v731_v2  ;;  %v755_v27 = vmul.f32 %v3712_v61, %v5029_v40 }
 0x195   :  { %v3721_v45 = vadd.f32 -1.4531521, %v732_v6  ;;  %v3722_v53 = vadd.f32 -1.4531521, %v733_v34  ;;  %v3723_v50 = vadd.f32 -1.4531521, %v734_v38  ;;  %v756_v47 = vmul.f32 %v3713_v37, %v5037_v9 }
 0x196   :  { %v3724_v26 = vadd.f32 -1.4531521, %v735_v7  ;;  %v3725_v20 = vadd.f32 -1.4531521, %v736_v62  ;;  %v757_v46 = vmul.f32 %v3714_v49, %v5055_v28  ;;  %v758_v21 = vmul.f32 %v3715_v17, %v5067_v31 }
 0x197   :  { %v759_v35 = vmul.f32 %v3716_v58, %v5084_v51  ;;  %v3726_v43 = vadd.f32 -1.4531521, %v737_v32  ;;  %v760_v30 = vmul.f32 %v3717_v60, %v5103_v56  ;;  %v761_v8 = vmul.f32 %v3718_v4, %v5196_v13 }
 0x198   :  { %v762_v3 = vmul.f32 %v3719_v57, %v5211_v36  ;;  %v763_v33 = vmul.f32 %v3720_v12, %v5223_v63  ;;  %v764_v2 = vmul.f32 %v3721_v45, %v5245_v59  ;;  %v765_v6 = vmul.f32 %v3722_v53, %v5254_v10 }
 0x199   :  { %v766_v34 = vmul.f32 %v3723_v50, %v5289_v0  ;;  %v767_v38 = vmul.f32 %v3724_v26, %v5304_v11  ;;  %v770_v7 = vadd.f32 1.4214138, %v754_v39  ;;  %v771_v18 = vadd.f32 1.4214138, %v755_v27 }
 0x19a   :  { %v772_v61 = vadd.f32 1.4214138, %v756_v47  ;;  %v768_v37 = vmul.f32 %v3725_v20, %v5319_v41  ;;  %v773_v49 = vadd.f32 1.4214138, %v757_v46  ;;  %v774_v17 = vadd.f32 1.4214138, %v758_v21 }
 0x19b   :  { %v775_v58 = vadd.f32 1.4214138, %v759_v35  ;;  %v769_v62 = vmul.f32 %v3726_v43, %v5326_v54  ;;  %v776_v60 = vadd.f32 1.4214138, %v760_v30  ;;  %v777_v4 = vadd.f32 1.4214138, %v761_v8 }
 0x19c   :  { %v778_v32 = vadd.f32 1.4214138, %v762_v3  ;;  %v779_v57 = vadd.f32 1.4214138, %v763_v33  ;;  %v780_v12 = vadd.f32 1.4214138, %v764_v2  ;;  %v786_v26 = vmul.f32 %v770_v7, %v5024_v5 }
 0x19d   :  { %v781_v45 = vadd.f32 1.4214138, %v765_v6  ;;  %v782_v53 = vadd.f32 1.4214138, %v766_v34  ;;  %v783_v50 = vadd.f32 1.4214138, %v767_v38  ;;  %v787_v39 = vmul.f32 %v771_v18, %v5029_v40 }
 0x19e   :  { %v784_v27 = vadd.f32 1.4214138, %v768_v37  ;;  %v788_v47 = vmul.f32 %v772_v61, %v5037_v9  ;;  %v789_v20 = vmul.f32 %v773_v49, %v5055_v28  ;;  %v790_v46 = vmul.f32 %v774_v17, %v5067_v31 }
 0x19f   :  { %v785_v21 = vadd.f32 1.4214138, %v769_v62  ;;  %v791_v35 = vmul.f32 %v775_v58, %v5084_v51  ;;  %v792_v43 = vmul.f32 %v776_v60, %v5103_v56  ;;  %v793_v30 = vmul.f32 %v777_v4, %v5196_v13 }
 0x1a0   :  { %v794_v8 = vmul.f32 %v778_v32, %v5211_v36  ;;  %v795_v3 = vmul.f32 %v779_v57, %v5223_v63  ;;  %v796_v33 = vmul.f32 %v780_v12, %v5245_v59  ;;  %v797_v2 = vmul.f32 %v781_v45, %v5254_v10 }
 0x1a1   :  { %v798_v6 = vmul.f32 %v782_v53, %v5289_v0  ;;  %v799_v34 = vmul.f32 %v783_v50, %v5304_v11  ;;  %v3727_v38 = vadd.f32 -0.28449672, %v786_v26  ;;  %v3728_v7 = vadd.f32 -0.28449672, %v787_v39 }
 0x1a2   :  { %v800_v18 = vmul.f32 %v784_v27, %v5319_v41  ;;  %v3729_v61 = vadd.f32 -0.28449672, %v788_v47  ;;  %v3730_v37 = vadd.f32 -0.28449672, %v789_v20  ;;  %v3731_v49 = vadd.f32 -0.28449672, %v790_v46 }
 0x1a3   :  { %v801_v17 = vmul.f32 %v785_v21, %v5326_v54  ;;  %v3732_v58 = vadd.f32 -0.28449672, %v791_v35  ;;  %v3733_v62 = vadd.f32 -0.28449672, %v792_v43  ;;  %v3734_v60 = vadd.f32 -0.28449672, %v793_v30 }
 0x1a4   :  { %v3735_v4 = vadd.f32 -0.28449672, %v794_v8  ;;  %v3736_v32 = vadd.f32 -0.28449672, %v795_v3  ;;  %v3737_v57 = vadd.f32 -0.28449672, %v796_v33  ;;  %v818_v50 = vmul.f32 %v3727_v38, %v5024_v5 }
 0x1a5   :  { %v3738_v12 = vadd.f32 -0.28449672, %v797_v2  ;;  %v3739_v45 = vadd.f32 -0.28449672, %v798_v6  ;;  %v3740_v53 = vadd.f32 -0.28449672, %v799_v34  ;;  %v819_v39 = vmul.f32 %v3728_v7, %v5029_v40 }
 0x1a6   :  { %v3741_v26 = vadd.f32 -0.28449672, %v800_v18  ;;  %v820_v27 = vmul.f32 %v3729_v61, %v5037_v9  ;;  %v821_v47 = vmul.f32 %v3730_v37, %v5055_v28  ;;  %v3742_v20 = vadd.f32 -0.28449672, %v801_v17 }
 0x1a7   :  { %v822_v46 = vmul.f32 %v3731_v49, %v5067_v31  ;;  %v823_v21 = vmul.f32 %v3732_v58, %v5084_v51  ;;  %v824_v35 = vmul.f32 %v3733_v62, %v5103_v56  ;;  %v825_v43 = vmul.f32 %v3734_v60, %v5196_v13 }
 0x1a8   :  { %v826_v30 = vmul.f32 %v3735_v4, %v5211_v36  ;;  %v827_v8 = vmul.f32 %v3736_v32, %v5223_v63  ;;  %v828_v3 = vmul.f32 %v3737_v57, %v5245_v59  ;;  %v829_v33 = vmul.f32 %v3738_v12, %v5254_v10 }
 0x1a9   :  { %v830_v2 = vmul.f32 %v3739_v45, %v5289_v0  ;;  %v831_v6 = vmul.f32 %v3740_v53, %v5304_v11  ;;  %v834_v34 = vadd.f32 0.2548296, %v818_v50  ;;  %v832_v38 = vmul.f32 %v3741_v26, %v5319_v41 }
 0x1aa   :  { %v835_v7 = vadd.f32 0.2548296, %v819_v39  ;;  %v836_v18 = vadd.f32 0.2548296, %v820_v27  ;;  %v837_v61 = vadd.f32 0.2548296, %v821_v47  ;;  %v833_v37 = vmul.f32 %v3742_v20, %v5326_v54 }
 0x1ab   :  { %v838_v49 = vadd.f32 0.2548296, %v822_v46  ;;  %v839_v17 = vadd.f32 0.2548296, %v823_v21  ;;  %v840_v58 = vadd.f32 0.2548296, %v824_v35  ;;  %v5382_v45 = vmul.f32 %v834_v34, %v5024_v5 }
 0x1ac   :  { %v841_v62 = vadd.f32 0.2548296, %v825_v43  ;;  %v866_v60 = vsub.f32 0.0, %v4694_v19  ;;  %v867_v4 = vsub.f32 0.0, %v4702_v22  ;;  %v868_v32 = vsub.f32 0.0, %v4707_v23 }
 0x1ad   :  { %v842_v57 = vadd.f32 0.2548296, %v826_v30  ;;  %v843_v12 = vadd.f32 0.2548296, %v827_v8  ;;  %v869_v53 = vsub.f32 0.0, %v4709_v24  ;;  %v5388_v39 = vmul.f32 %v835_v7, %v5029_v40 }
 0x1ae   :  { %v844_v50 = vadd.f32 0.2548296, %v828_v3  ;;  %v5385_v26 = vadd.f32 0.2548296, %v829_v33  ;;  %v870_v27 = vsub.f32 0.0, %v4712_v25  ;;  %v5396_v46 = vmul.f32 %v836_v18, %v5037_v9 }
 0x1af   :  { %v5391_v47 = vadd.f32 0.2548296, %v830_v2  ;;  %v5393_v20 = vadd.f32 0.2548296, %v831_v6  ;;  %v871_v5 = vsub.f32 0.0, %v4718_v55  ;;  %v872_v21 = vsub.f32 0.0, %v4751_v1 }
 0x1b0   :  { %v882_v35 = vmul.f32 %v866_v60, %v4694_v19  ;;  %v883_v43 = vmul.f32 %v867_v4, %v4702_v22  ;;  %v884_v40 = vmul.f32 %v868_v32, %v4707_v23  ;;  %v848_v30 = vadd.f32 0.2548296, %v832_v38 }
 0x1b1   :  { %v5403_v8 = vadd.f32 0.2548296, %v833_v37  ;;  %v873_v3 = vsub.f32 0.0, %v4783_v29  ;;  %v885_v33 = vmul.f32 %v869_v53, %v4709_v24  ;;  %v5408_v9 = vmul.f32 %v837_v61, %v5055_v28 }
 0x1b2   :  { %v5411_v2 = vmul.f32 %v838_v49, %v5067_v31  ;;  %v874_v6 = vsub.f32 0.0, %v4788_v42  ;;  %v886_v19 = vmul.f32 %v870_v27, %v4712_v25  ;;  %v5416_v22 = vmul.f32 %v839_v17, %v5084_v51 }
 0x1b3   :  { %v875_v23 = vsub.f32 0.0, %v4790_v44  ;;  %v876_v34 = vsub.f32 0.0, %v4798_v48  ;;  %v887_v38 = vmul.f32 %v871_v5, %v4718_v55  ;;  %v888_v24 = vmul.f32 %v872_v21, %v4751_v1 }
 0x1b4   :  { %v898_v28 = vmul.f32 1.442695, %v882_v35  ;;  %v900_v7 = vmul.f32 1.442695, %v883_v43  ;;  %v902_v18 = vmul.f32 1.442695, %v884_v40  ;;  %v5423_v31 = vmul.f32 %v840_v58, %v5103_v56 }
 0x1b5   :  { %v877_v61 = vsub.f32 0.0, %v4800_v14  ;;  %v889_v25 = vmul.f32 %v873_v3, %v4783_v29  ;;  %v904_v51 = vmul.f32 1.442695, %v885_v33  ;;  %v878_v37 = vsub.f32 0.0, %v4804_v52  ;;  %v6689_v29 = vld [vmem:[#allocation36_spill] sm:$0xff] }
 0x1b6   :  { %v890_v49 = vmul.f32 %v874_v6, %v4788_v42  ;;  %4268 = vpow2.f32 %v898_v28  ;;  %v906_v17 = vmul.f32 1.442695, %v886_v19  ;;  %v879_v55 = vsub.f32 0.0, %v4807_v15  ;;  %v6692_v28 = vld [vmem:[#allocation8_spill] sm:$0xff] }
 0x1b7   :  { %v891_v1 = vmul.f32 %v875_v23, %v4790_v44  ;;  %4270 = vpow2.f32 %v900_v7  ;;  %v908_v60 = vmul.f32 1.442695, %v887_v38  ;;  %v880_v56 = vsub.f32 0.0, %v4810_v16  ;;  %v6691_v38 = vld [vmem:[#allocation7_spill] sm:$0xff] }
 0x1b8   :  { %v892_v58 = vmul.f32 %v876_v34, %v4798_v48  ;;  %4272 = vpow2.f32 %v902_v18  ;;  %v910_v4 = vmul.f32 1.442695, %v888_v24  ;;  %v881_v32 = vsub.f32 0.0, %v6689_v29 }
 0x1b9   :  { %v893_v53 = vmul.f32 %v877_v61, %v4800_v14  ;;  %4274 = vpow2.f32 %v904_v51  ;;  %v912_v42 = vmul.f32 1.442695, %v889_v25  ;;  %v5436_v27 = vmul.f32 %v841_v62, %v5196_v13  ;;  %v6694_v61 = vld [vmem:[#allocation10_spill] sm:$0xff] }
 0x1ba   :  { %v894_v5 = vmul.f32 %v878_v37, %v4804_v52  ;;  %4276 = vpow2.f32 %v906_v17  ;;  %v914_v44 = vmul.f32 1.442695, %v890_v49  ;;  %v5440_v21 = vmul.f32 %v842_v57, %v5211_v36  ;;  %v6695_v17 = vld [vmem:[#allocation11_spill] sm:$0xff] }
 0x1bb   :  { %v895_v48 = vmul.f32 %v879_v55, %v4807_v15  ;;  %4278 = vpow2.f32 %v908_v60  ;;  %v916_v35 = vmul.f32 1.442695, %v891_v1  ;;  %v5444_v40 = vmul.f32 %v843_v12, %v5223_v63 }
 0x1bc   :  { %v4269_v43 = vpop.eup %4268  ;;  %v896_v14 = vmul.f32 %v880_v56, %v4810_v16  ;;  %4280 = vpow2.f32 %v910_v4  ;;  %v918_v13 = vmul.f32 1.442695, %v892_v58  ;;  %v860_v52 = vmul.f32 %v844_v50, %v5245_v59  ;;  %v6696_v56 = vld [vmem:[#allocation12_spill] sm:$0xff]  ;;  %v6697_v4 = vld [vmem:[#allocation18_spill] sm:$0xff] }
 0x1bd   :  { %v4271_v62 = vpop.eup %4270  ;;  %v897_v3 = vmul.f32 %v881_v32, %v6689_v29  ;;  %4282 = vpow2.f32 %v912_v42  ;;  %v920_v36 = vmul.f32 1.442695, %v893_v53  ;;  %v861_v15 = vmul.f32 %v5385_v26, %v5254_v10  ;;  %v6698_v42 = vld [vmem:[#allocation19_spill] sm:$0xff] }
 0x1be   :  { %v4273_v57 = vpop.eup %4272  ;;  %v862_v33 = vmul.f32 %v5391_v47, %v5289_v0  ;;  %4284 = vpow2.f32 %v914_v44  ;;  %v922_v63 = vmul.f32 1.442695, %v894_v5  ;;  %v863_v16 = vmul.f32 %v5393_v20, %v5304_v11  ;;  %v6690_v20 = vld [vmem:[#allocation6_spill] sm:$0xff] }
 0x1bf   :  { %v4275_v12 = vpop.eup %4274  ;;  %v864_v6 = vmul.f32 %v848_v30, %v5319_v41  ;;  %4286 = vpow2.f32 %v916_v35  ;;  %v924_v59 = vmul.f32 1.442695, %v895_v48  ;;  %v926_v19 = vmul.f32 1.442695, %v896_v14  ;;  %v6700_v48 = vld [vmem:[#allocation21_spill] sm:$0xff] }
 0x1c0   :  { %v4277_v50 = vpop.eup %4276  ;;  %4288 = vpow2.f32 %v918_v13  ;;  %v930_v23 = vmul.f32 %v4269_v43, %v5382_v45  ;;  %v931_v10 = vmul.f32 %v4271_v62, %v5388_v39  ;;  %v865_v0 = vmul.f32 %v5403_v8, %v5326_v54  ;;  %v6693_v8 = vld [vmem:[#allocation9_spill] sm:$0xff]  ;;  %v6701_v13 = vld [vmem:[#allocation22_spill] sm:$0xff] }
 0x1c1   :  { %v4279_v26 = vpop.eup %4278  ;;  %4290 = vpow2.f32 %v920_v36  ;;  %v928_v47 = vmul.f32 1.442695, %v897_v3  ;;  %v932_v34 = vmul.f32 %v4273_v57, %v5396_v46  ;;  %v933_v41 = vmul.f32 %v4275_v12, %v5408_v9  ;;  %v6702_v3 = vld [vmem:[#allocation23_spill] sm:$0xff] }
 0x1c2   :  { %v4281_v11 = vpop.eup %4280  ;;  %4292 = vpow2.f32 %v922_v63  ;;  %v5463_v30 = vmul.f32 0.5, %v6690_v20  ;;  %v5466_v24 = vmul.f32 0.5, %v6691_v38  ;;  %v934_v39 = vmul.f32 %v4277_v50, %v5411_v2  ;;  %v6703_v50 = vld [vmem:[#allocation24_spill] sm:$0xff]  ;;  %v6705_v38 = vld [vmem:[#allocation26_spill] sm:$0xff] }
 0x1c3   :  { %v4283_v45 = vpop.eup %4282  ;;  %4294 = vpow2.f32 %v924_v59  ;;  %v5470_v54 = vmul.f32 0.5, %v6692_v28  ;;  %v5473_v7 = vmul.f32 0.5, %v6693_v8  ;;  %v946_v18 = vsub.f32 1.0, %v930_v23 }
 0x1c4   :  { %v4285_v46 = vpop.eup %4284  ;;  %4296 = vpow2.f32 %v926_v19  ;;  %v947_v9 = vsub.f32 1.0, %v931_v10  ;;  %v5476_v25 = vmul.f32 0.5, %v6694_v61  ;;  %v935_v37 = vmul.f32 %v4279_v26, %v5416_v22  ;;  %v6699_v22 = vld [vmem:[#allocation20_spill] sm:$0xff] }
 0x1c5   :  { %v4287_v51 = vpop.eup %4286  ;;  %4298 = vpow2.f32 %v928_v47  ;;  %v948_v49 = vsub.f32 1.0, %v932_v34  ;;  %v5480_v2 = vmul.f32 0.5, %v6695_v17  ;;  %v936_v1 = vmul.f32 %v4281_v11, %v5423_v31  ;;  %v6704_v34 = vld [vmem:[#allocation25_spill] sm:$0xff]  ;;  %v6708_v17 = vld [vmem:[#allocation35_spill] sm:$0xff] }
 0x1c6   :  { %v4289_v55 = vpop.eup %4288  ;;  %v949_v60 = vsub.f32 1.0, %v933_v41  ;;  %v5484_v58 = vmul.f32 0.5, %v6696_v56  ;;  %v5487_v29 = vmul.f32 0.5, %v6697_v4  ;;  %v950_v53 = vsub.f32 1.0, %v934_v39  ;;  %v6711_v4 = vld [vmem:[#allocation32_spill] sm:$0xff] }
 0x1c7   :  { %v4291_v32 = vpop.eup %4290  ;;  %v5490_v5 = vmul.f32 0.5, %v6698_v42  ;;  %v992_v44 = vmul.f32 0.5, %v6699_v22  ;;  %v993_v35 = vmul.f32 0.5, %v6700_v48  ;;  %v937_v14 = vmul.f32 %v4283_v45, %v5436_v27  ;;  %v6713_v48 = vld [vmem:[#allocation33_spill] sm:$0xff] }
 0x1c8   :  { %v4293_v43 = vpop.eup %4292  ;;  %v940_v31 = vmul.f32 %v4289_v55, %v860_v52  ;;  %v962_v62 = vmul.f32 %v946_v18, %v6701_v13  ;;  %v963_v36 = vmul.f32 %v947_v9, %v6702_v3  ;;  %v941_v63 = vmul.f32 %v4291_v32, %v861_v15 }
 0x1c9   :  { %v4295_v57 = vpop.eup %4294  ;;  %v942_v12 = vmul.f32 %v4293_v43, %v862_v33  ;;  %v951_v59 = vsub.f32 1.0, %v935_v37  ;;  %v964_v19 = vmul.f32 %v948_v49, %v6703_v50  ;;  %v938_v10 = vmul.f32 %v4285_v46, %v5440_v21  ;;  %v6707_v37 = vld [vmem:[#allocation34_spill] sm:$0xff]  ;;  %v6716_v50 = vld [vmem:[#allocation31_spill] sm:$0xff] }
 0x1ca   :  { %v4297_v23 = vpop.eup %4296  ;;  %v943_v26 = vmul.f32 %v4295_v57, %v863_v16  ;;  %v952_v47 = vsub.f32 1.0, %v936_v1  ;;  %v965_v11 = vmul.f32 %v949_v60, %v6704_v34  ;;  %v939_v27 = vmul.f32 %v4287_v51, %v5444_v40  ;;  %v6706_v16 = vld [vmem:[#allocation27_spill] sm:$0xff]  ;;  %v6709_v51 = vld [vmem:[#allocation37_spill] sm:$0xff] }
 0x1cb   :  { %v4299_v41 = vpop.eup %4298  ;;  %v944_v52 = vmul.f32 %v4297_v23, %v864_v6  ;;  %v958_v20 = vsub.f32 1.0, %v942_v12  ;;  %v966_v45 = vmul.f32 %v950_v53, %v6705_v38  ;;  %v953_v15 = vsub.f32 1.0, %v937_v14  ;;  %v6712_v53 = vld [vmem:[#allocation38_spill] sm:$0xff] }
 0x1cc   :  { %v945_v39 = vmul.f32 %v4299_v41, %v865_v0  ;;  %v956_v33 = vsub.f32 1.0, %v940_v31  ;;  %v959_v28 = vsub.f32 1.0, %v943_v26  ;;  %v957_v8 = vsub.f32 1.0, %v941_v63  ;;  %v6710_v0 = vld [vmem:[#allocation28_spill] sm:$0xff]  ;;  %v6715_v12 = vld [vmem:[#allocation30_spill] sm:$0xff] }
 0x1cd   :  { %v960_v18 = vsub.f32 1.0, %v944_v52  ;;  %v994_v9 = vadd.f32 1.0, %v962_v62  ;;  %v995_v61 = vadd.f32 1.0, %v963_v36  ;;  %v967_v46 = vmul.f32 %v951_v59, %v6706_v16  ;;  %v6714_v62 = vld [vmem:[#allocation29_spill] sm:$0xff] }
 0x1ce   :  { %v961_v21 = vsub.f32 1.0, %v945_v39  ;;  %v974_v49 = vmul.f32 %v958_v20, %v6707_v37  ;;  %v975_v55 = vmul.f32 %v959_v28, %v6708_v17  ;;  %v954_v40 = vsub.f32 1.0, %v938_v10  ;;  %v6719_v20 = vld [vmem:[#allocation13_spill] sm:$0xff] }
 0x1cf   :  { %v955_v6 = vsub.f32 1.0, %v939_v27  ;;  %v976_v1 = vmul.f32 %v960_v18, %v6709_v51  ;;  %v996_v60 = vadd.f32 1.0, %v964_v19  ;;  %v968_v56 = vmul.f32 %v952_v47, %v6710_v0  ;;  %v6726_v51 = vld [vmem:[#allocation15_spill] sm:$0xff] }
 0x1d0   :  { %v972_v32 = vmul.f32 %v956_v33, %v6711_v4  ;;  %v977_v42 = vmul.f32 %v961_v21, %v6712_v53  ;;  %v997_v22 = vadd.f32 1.0, %v965_v11  ;;  %v973_v43 = vmul.f32 %v957_v8, %v6713_v48  ;;  %v6722_v33 = vld [vmem:[#allocation17_spill] sm:$0xff] }
 0x1d1   :  { %v1008_v14 = vadd.f32 1.0, %v976_v1  ;;  %v5511_v31 = vmul.f32 %v994_v9, %v5463_v30  ;;  %v5514_v13 = vmul.f32 %v995_v61, %v5466_v24  ;;  %v969_v3 = vmul.f32 %v953_v15, %v6714_v62  ;;  %v6721_v15 = vld [vmem:[#allocation16_spill] sm:$0xff] }
 0x1d2   :  { %v1006_v36 = vadd.f32 1.0, %v974_v49  ;;  %v1007_v57 = vadd.f32 1.0, %v975_v55  ;;  %v1009_v63 = vadd.f32 1.0, %v977_v42  ;;  %v970_v59 = vmul.f32 %v954_v40, %v6715_v12  ;;  %v6725_v40 = vld [vmem:[#allocation14_spill] sm:$0xff] }
 0x1d3   :  { %v971_v19 = vmul.f32 %v955_v6, %v6716_v50  ;;  %v998_v23 = vadd.f32 1.0, %v966_v45  ;;  %v5520_v10 = vmul.f32 %v996_v60, %v5470_v54  ;;  %v999_v26 = vadd.f32 1.0, %v967_v46 }
 0x1d4   :  { %v1004_v47 = vadd.f32 1.0, %v972_v32  ;;  %v5522_v30 = vmul.f32 %v1008_v14, %v992_v44  ;;  %v5524_v34 = vmul.f32 %v1009_v63, %v993_v35  ;;  %v1005_v24 = vadd.f32 1.0, %v973_v43 }
 0x1d5   :  { %v5527_v11 = vmul.f32 %v997_v22, %v5473_v7  ;;  %vm6717_vm2 = vcmask 64512   ;;  %v5534_v52 = vmul.f32 %v1006_v36, %v5487_v29  ;;  %v5537_v54 = vmul.f32 %v1007_v57, %v5490_v5 }
 0x1d6   :  { %v1425_v41 = vsel %vm6717_vm2, %v5511_v31, 0.0  ;;  %vm6718_vm10 = vmmov %vm6717_vm2  ;;  %v5541_v44 = vpack.c.bf16 %v5524_v34, %v5522_v30  ;;  %v985_v7 = vmul.f32 0.5, %v6719_v20  ;;  %v1000_v38 = vadd.f32 1.0, %v968_v56 }
 0x1d7   :  { %v1426_v27 = vsel %vm6718_vm10, %v5514_v13, 0.0  ;;  %v5545_v45 = vmul.f32 %v998_v23, %v5476_v25  ;;  %vm6720_vm7 = vmmov %vm6717_vm2  ;;  %v988_v29 = vmul.f32 0.5, %v6721_v15  ;;  %v989_v28 = vmul.f32 0.5, %v6722_v33 }
 0x1d8   :  { %v1427_v35 = vadd.f32 %v1426_v27, %v1425_v41  ;;  %v1428_v39 = vsel %vm6720_vm7, %v5520_v10, 0.0  ;;  %v1001_v5 = vadd.f32 1.0, %v969_v3  ;;  %1050 = vmatpush.bf16.msra.mxu1 %v5541_v44  ;;  %1086 = vmatpush.bf16.msra.mxu2 %v5541_v44  ;;  %v1002_v18 = vadd.f32 1.0, %v970_v59  ;;  %vm6723_vm14 = vmmov %vm6717_vm2 }
 0x1d9   :  { %v1003_v9 = vadd.f32 1.0, %v971_v19  ;;  %v5554_v61 = vmul.f32 %v999_v26, %v5480_v2  ;;  %v1430_v25 = vsel %vm6723_vm14, %v5527_v11, 0.0  ;;  %1122 = vmatpush.bf16.msra.mxu3 %v5541_v44  ;;  %1266 = vmatpush.bf16.msrb.mxu0 %v5541_v44  ;;  %v5560_v21 = vmul.f32 %v1004_v47, %v988_v29  ;;  %vm6724_vm8 = vmmov %vm6717_vm2 }
 0x1da   :  { %v1429_v8 = vadd.f32 %v1428_v39, %v1427_v35  ;;  %v5562_v16 = vmul.f32 %v1005_v24, %v989_v28  ;;  %v5566_v46 = vpack.c.bf16 %v5537_v54, %v5534_v52  ;;  %v1016_v49 = vmul.f32 %v1000_v38, %v5484_v58  ;;  %vm6727_vm13 = vmmov %vm6717_vm2 }
 0x1db   :  { %v1432_v2 = vsel %vm6724_vm8, %v5545_v45, 0.0  ;;  %v1463_v17 = vmul.f32 %v5511_v31, %v5511_v31  ;;  %v1464_v55 = vmul.f32 %v5514_v13, %v5514_v13  ;;  %v986_v6 = vmul.f32 0.5, %v6725_v40  ;;  %vm6728_vm3 = vmmov %vm6717_vm2 }
 0x1dc   :  { %v1431_v37 = vadd.f32 %v1430_v25, %v1429_v8  ;;  %v987_v1 = vmul.f32 0.5, %v6726_v51  ;;  %1051 = vmatpush.bf16.msra.mxu1 %v5566_v46  ;;  %v1017_v0 = vmul.f32 %v1001_v5, %v985_v7  ;;  %v1434_v58 = vsel %vm6727_vm13, %v5554_v61, 0.0  ;;  %1087 = vmatpush.bf16.msra.mxu2 %v5566_v46  ;;  %vm6729_vm11 = vmmov %vm6717_vm2 }
 0x1dd   :  { %v1465_v56 = vmul.f32 %v5520_v10, %v5520_v10  ;;  %v1018_v4 = vmul.f32 %v1002_v18, %v986_v6  ;;  %v5585_v53 = vpack.c.bf16 %v5562_v16, %v5560_v21  ;;  %1123 = vmatpush.bf16.msra.mxu3 %v5566_v46  ;;  %v1436_v22 = vsel %vm6728_vm3, %v1016_v49, 0.0  ;;  %vm6730_vm9 = vmmov %vm6717_vm2  ;;  %1267 = vmatpush.bf16.msrb.mxu0 %v5566_v46 }
 0x1de   :  { %v1433_v60 = vadd.f32 %v1432_v2, %v1431_v37  ;;  %v1019_v32 = vmul.f32 %v1003_v9, %v987_v1  ;;  %v1466_v48 = vmul.f32 %v5527_v11, %v5527_v11  ;;  %v1479_v43 = vsel %vm6729_vm11, %v1463_v17, 0.0  ;;  %vm6731_vm12 = vmmov %vm6717_vm2 }
 0x1df   :  { %v1480_v14 = vsel %vm6730_vm9, %v1464_v55, 0.0  ;;  %v1438_v36 = vsel %vm6731_vm12, %v1017_v0, 0.0  ;;  %v1467_v57 = vmul.f32 %v5545_v45, %v5545_v45  ;;  %vm6732_vm15 = vmmov %vm6717_vm2  ;;  %v1468_v23 = vmul.f32 %v5554_v61, %v5554_v61 }
 0x1e0   :  { %v1435_v42 = vadd.f32 %v1434_v58, %v1433_v60  ;;  %v1481_v3 = vadd.f32 %v1480_v14, %v1479_v43  ;;  %1052 = vmatpush.bf16.msra.mxu1 %v5585_v53  ;;  %v1482_v63 = vsel %vm6732_vm15, %v1465_v56, 0.0  ;;  %1088 = vmatpush.bf16.msra.mxu2 %v5585_v53  ;;  %v5600_v12 = vpack.c.bf16 %v1019_v32, %v1018_v4  ;;  %vm6733_vm1 = vmmov %vm6717_vm2  ;;  %v4127_v14 = vld [vmem:[%s6555_s1] sm:$0xff] }
 0x1e1   :  { %1124 = vmatpush.bf16.msra.mxu3 %v5585_v53  ;;  %v1440_v19 = vsel %vm6733_vm1, %v1018_v4, 0.0  ;;  %vm6734_vm0 = vmmov %vm6733_vm1  ;;  %1268 = vmatpush.bf16.msrb.mxu0 %v5585_v53  ;;  %v1469_v27 = vmul.f32 %v1016_v49, %v1016_v49  ;;  %v5612_v20 = vpack.c.bf16 %v1017_v0, %v1016_v49  ;;  %v1470_v15 = vmul.f32 %v1017_v0, %v1017_v0 }
 0x1e2   :  { %v1437_v62 = vadd.f32 %v1436_v22, %v1435_v42  ;;  %v1483_v50 = vadd.f32 %v1482_v63, %v1481_v3  ;;  %v1484_v26 = vsel %vm6734_vm0, %v1466_v48, 0.0  ;;  %vm6735_vm4 = vmmov %vm6734_vm0  ;;  %v1471_v8 = vmul.f32 %v1018_v4, %v1018_v4  ;;  %v4131_v3 = vld [vmem:[%s6555_s1 + $0x20] sm:$0xff] }
 0x1e3   :  { %v1442_v41 = vsel %vm6735_vm4, %v1019_v32, 0.0  ;;  %vm6736_vm5 = vmmov %vm6734_vm0  ;;  %v5627_v37 = vpack.c.bf16 %v5554_v61, %v5545_v45  ;;  %v1472_v2 = vmul.f32 %v1019_v32, %v1019_v32  ;;  %v1473_v51 = vmul.f32 %v5560_v21, %v5560_v21 }
 0x1e4   :  { %v1439_v59 = vadd.f32 %v1438_v36, %v1437_v62  ;;  %v1485_v24 = vadd.f32 %v1484_v26, %v1483_v50  ;;  %1053 = vmatpush.bf16.msra.mxu1 %v5600_v12  ;;  %v1486_v35 = vsel %vm6736_vm5, %v1467_v57, 0.0  ;;  %1089 = vmatpush.bf16.msra.mxu2 %v5600_v12  ;;  %vm6737_vm6 = vmmov %vm6734_vm0  ;;  %v5643_v60 = vpack.c.bf16 %v5527_v11, %v5520_v10  ;;  %v4129_v62 = vld [vmem:[%s6555_s1 + $0x10] sm:$0xff] }
 0x1e5   :  { %1125 = vmatpush.bf16.msra.mxu3 %v5600_v12  ;;  %v1444_v39 = vsel %vm6737_vm6, %v5560_v21, 0.0  ;;  %vm6738_vm2 = vmmov %vm6734_vm0  ;;  %1269 = vmatpush.bf16.msrb.mxu0 %v5600_v12  ;;  %v1474_v58 = vmul.f32 %v5562_v16, %v5562_v16  ;;  %v1475_v10 = vmul.f32 %v5534_v52, %v5534_v52  ;;  %v5661_v22 = vpack.c.bf16 %v5514_v13, %v5511_v31 }
 0x1e6   :  { %v1441_v47 = vadd.f32 %v1440_v19, %v1439_v59  ;;  %v1487_v38 = vadd.f32 %v1486_v35, %v1485_v24  ;;  %v1488_v29 = vsel %vm6738_vm2, %v1468_v23, 0.0  ;;  %vm6739_vm10 = vmmov %vm6734_vm0  ;;  %v1476_v48 = vmul.f32 %v5537_v54, %v5537_v54 }
 0x1e7   :  { %v1446_v5 = vsel %vm6739_vm10, %v5562_v16, 0.0  ;;  %vm6740_vm7 = vmmov %vm6734_vm0  ;;  %v1477_v13 = vmul.f32 %v5522_v30, %v5522_v30  ;;  %v1478_v63 = vmul.f32 %v5524_v34, %v5524_v34  ;;  %vm1402_vm2 = vcmask 1043456  }
 0x1e8   :  { %v1443_v7 = vadd.f32 %v1442_v41, %v1441_v47  ;;  %v1489_v28 = vadd.f32 %v1488_v29, %v1487_v38  ;;  %1054 = vmatpush.bf16.msra.mxu1 %v5612_v20  ;;  %v1490_v18 = vsel %vm6740_vm7, %v1469_v27, 0.0  ;;  %1090 = vmatpush.bf16.msra.mxu2 %v5612_v20  ;;  %vm6741_vm14 = vmmov %vm6734_vm0  ;;  %v4128_v38 = vld [vmem:[%s6555_s1 + $0x8] sm:$0xff] }
 0x1e9   :  { %1126 = vmatpush.bf16.msra.mxu3 %v5612_v20  ;;  %v1448_v49 = vsel %vm6741_vm14, %v5534_v52, 0.0  ;;  %vm6742_vm8 = vmmov %vm6734_vm0  ;;  %1270 = vmatpush.bf16.msrb.mxu0 %v5612_v20 }
 0x1ea   :  { %v1445_v33 = vadd.f32 %v1444_v39, %v1443_v7  ;;  %v1491_v25 = vadd.f32 %v1490_v18, %v1489_v28  ;;  %v1492_v17 = vsel %vm6742_vm8, %v1470_v15, 0.0  ;;  %vm6743_vm13 = vmmov %vm6734_vm0  ;;  %v4130_v39 = vld [vmem:[%s6555_s1 + $0x18] sm:$0xff]  ;;  %v6753_v15 = vld [vmem:[#allocation5_spill] sm:$0xff] }
 0x1eb   :  { %v1450_v6 = vsel %vm6743_vm13, %v5537_v54, 0.0  ;;  %vm6744_vm3 = vmmov %vm6734_vm0  ;;  %v1502_v54 = vsel %vm6734_vm0, %v1475_v10, 0.0  ;;  %v4132_v28 = vld [vmem:[%s6555_s1 + $0x28] sm:$0xff] }
 0x1ec   :  { %v1447_v9 = vadd.f32 %v1446_v5, %v1445_v33  ;;  %v1493_v40 = vadd.f32 %v1492_v17, %v1491_v25  ;;  %1055 = vmatpush.bf16.msra.mxu1 %v5627_v37  ;;  %v1494_v45 = vsel %vm6744_vm3, %v1471_v8, 0.0  ;;  %1091 = vmatpush.bf16.msra.mxu2 %v5627_v37  ;;  %vm6745_vm11 = vmmov %vm6734_vm0  ;;  %v4137_v17 = vld [vmem:[%s6555_s1 + $0x50] sm:$0xff] }
 0x1ed   :  { %1127 = vmatpush.bf16.msra.mxu3 %v5627_v37  ;;  %v1452_v0 = vsel %vm6745_vm11, %v5522_v30, 0.0  ;;  %vm6746_vm9 = vmmov %vm6734_vm0  ;;  %1271 = vmatpush.bf16.msrb.mxu0 %v5627_v37 }
 0x1ee   :  { %v1449_v55 = vadd.f32 %v1448_v49, %v1447_v9  ;;  %v1495_v1 = vadd.f32 %v1494_v45, %v1493_v40  ;;  %v1496_v21 = vsel %vm6746_vm9, %v1472_v2, 0.0  ;;  %vm6747_vm12 = vmmov %vm6734_vm0  ;;  %v4133_v49 = vld [vmem:[%s6555_s1 + $0x30] sm:$0xff]  ;;  %v4135_v2 = vld [vmem:[%s6555_s1 + $0x40] sm:$0xff]  ;;  %vm1588_vm9 = vcmask 261120  }
 0x1ef   :  { %v1454_v32 = vsel %vm6747_vm12, %v5524_v34, 0.0  ;;  %vm6748_vm15 = vmmov %vm6734_vm0  ;;  %v4142_v40 = vld [vmem:[%s6555_s1 + $0x78] sm:$0xff] }
 0x1f0   :  { %v1451_v61 = vadd.f32 %v1450_v6, %v1449_v55  ;;  %v1497_v4 = vadd.f32 %v1496_v21, %v1495_v1  ;;  %1056 = vmatpush.bf16.msra.mxu1 %v5643_v60  ;;  %v1498_v11 = vsel %vm6748_vm15, %v1473_v51, 0.0  ;;  %1092 = vmatpush.bf16.msra.mxu2 %v5643_v60  ;;  %vm6749_vm1 = vmmov %vm6734_vm0  ;;  %v4138_v55 = vld [vmem:[%s6555_s1 + $0x58] sm:$0xff]  ;;  %v4144_v6 = vld [vmem:[%s6555_s1 + $0x88] sm:$0xff] }
 0x1f1   :  { %1128 = vmatpush.bf16.msra.mxu3 %v5643_v60  ;;  %v1500_v43 = vsel %vm6749_vm1, %v1474_v58, 0.0  ;;  %1272 = vmatpush.bf16.msrb.mxu0 %v5643_v60  ;;  %vm6750_vm4 = vmmov %vm6734_vm0 }
 0x1f2   :  { %v1453_v56 = vadd.f32 %v1452_v0, %v1451_v61  ;;  %v1499_v16 = vadd.f32 %v1498_v11, %v1497_v4  ;;  %v1504_v30 = vsel %vm6750_vm4, %v1476_v48, 0.0  ;;  %vm6751_vm5 = vmmov %vm6734_vm0 }
 0x1f3   :  { %v1506_v19 = vsel %vm6751_vm5, %v1477_v13, 0.0  ;;  %vm6752_vm6 = vmmov %vm6734_vm0 }
 0x1f4   :  { %v1455_v42 = vadd.f32 %v1454_v32, %v1453_v56  ;;  %v1501_v52 = vadd.f32 %v1500_v43, %v1499_v16  ;;  %1057 = vmatpush.bf16.msra.mxu1 %v5661_v22  ;;  %1093 = vmatpush.bf16.msra.mxu2 %v5661_v22  ;;  %v1508_v34 = vsel %vm6752_vm6, %v1478_v63, 0.0  ;;  %vm6754_vm8 = vmmov %vm6734_vm0 }
 0x1f5   :  { %1129 = vmatpush.bf16.msra.mxu3 %v5661_v22  ;;  %1273 = vmatpush.bf16.msrb.mxu0 %v5661_v22  ;;  %vm6755_vm13 = vmmov %vm6734_vm0 }
 0x1f6   :  { %v1456_v31 = vrot.slane %v1455_v42, 4  ;;  %v1503_v36 = vadd.f32 %v1502_v54, %v1501_v52  ;;  %vm6756_vm3 = vmmov %vm6734_vm0 }
 0x1f7   :  { %1058 = vmatmul.bf16.vlgmr.msra.gmra.mxu1 %v4127_v14  ;;  %1094 = vmatmul.bf16.vlgmr.msra.gmra.mxu2 %v4129_v62  ;;  %vm6757_vm11 = vmmov %vm6734_vm0 }
 0x1f8   :  { %1158 = vmatpush.bf16.msrb.mxu1 %v5541_v44  ;;  %1194 = vmatpush.bf16.msrb.mxu2 %v5541_v44  ;;  %v1457_v57 = vadd.f32 %v1456_v31, %v1455_v42  ;;  %v1505_v59 = vadd.f32 %v1504_v30, %v1503_v36 }
 0x1f9   :  { %1230 = vmatpush.bf16.msrb.mxu3 %v5541_v44 }
 0x1fa   :  { %v1458_v50 = vrot.slane %v1457_v57, 2  ;;  %1130 = vmatmul.bf16.vlgmr.msra.gmra.mxu3 %v4131_v3  ;;  %v1507_v23 = vadd.f32 %v1506_v19, %v1505_v59 }
 0x1fc   :  { %1159 = vmatpush.bf16.msrb.mxu1 %v5566_v46  ;;  %1195 = vmatpush.bf16.msrb.mxu2 %v5566_v46  ;;  %v1459_v26 = vadd.f32 %v1458_v50, %v1457_v57  ;;  %v1509_v47 = vadd.f32 %v1508_v34, %v1507_v23  ;;  %v4203_v23 = vld [vmem:[%s6565_s11 + $0x3] ss:$0 sm:$0xff] }
 0x1fd   :  { %1231 = vmatpush.bf16.msrb.mxu3 %v5566_v46 }
 0x1fe   :  { %v1460_v24 = vrot.slane %v1459_v26, 1  ;;  %v1510_v41 = vrot.slane %v1509_v47, 4 }
 0x200   :  { %1160 = vmatpush.bf16.msrb.mxu1 %v5585_v53  ;;  %1196 = vmatpush.bf16.msrb.mxu2 %v5585_v53  ;;  %v1461_v27 = vadd.f32 %v1460_v24, %v1459_v26  ;;  %v1511_v35 = vadd.f32 %v1510_v41, %v1509_v47 }
 0x201   :  { %1232 = vmatpush.bf16.msrb.mxu3 %v5585_v53 }
 0x202   :  { %v1512_v7 = vrot.slane %v1511_v35, 2  ;;  %v5707_v29 = vmul.f32 %v1461_v27, %v6753_v15 }
 0x204   :  { %1161 = vmatpush.bf16.msrb.mxu1 %v5600_v12  ;;  %1197 = vmatpush.bf16.msrb.mxu2 %v5600_v12  ;;  %v1513_v33 = vadd.f32 %v1512_v7, %v1511_v35  ;;  %v1517_v18 = vmul.f32 %v5707_v29, %v5707_v29  ;;  %v4204_v7 = vld [vmem:[%s6565_s11 + $0x4] ss:$0 sm:$0xff] }
 0x205   :  { %1233 = vmatpush.bf16.msrb.mxu3 %v5600_v12 }
 0x206   :  { %v1514_v5 = vrot.slane %v1513_v33, 1 }
 0x207   :  { %1063 = vmatmul.bf16.gmra.mxu1 %v4128_v38  ;;  %1099 = vmatmul.bf16.gmra.mxu2 %v4130_v39 }
 0x208   :  { %1162 = vmatpush.bf16.msrb.mxu1 %v5612_v20  ;;  %1198 = vmatpush.bf16.msrb.mxu2 %v5612_v20  ;;  %v1515_v8 = vadd.f32 %v1514_v5, %v1513_v33 }
 0x209   :  { %1234 = vmatpush.bf16.msrb.mxu3 %v5612_v20 }
 0x20a   :  { %1135 = vmatmul.bf16.gmra.mxu3 %v4132_v28  ;;  %v1516_v9 = vmul.f32 %v1515_v8, %v6753_v15 }
 0x20c   :  { %1163 = vmatpush.bf16.msrb.mxu1 %v5627_v37  ;;  %1199 = vmatpush.bf16.msrb.mxu2 %v5627_v37  ;;  %v1518_v25 = vsub.f32 %v1516_v9, %v1517_v18 }
 0x20d   :  { %1235 = vmatpush.bf16.msrb.mxu3 %v5627_v37 }
 0x20e   :  { %v1519_v45 = vmax.f32 %v1518_v25, 0.0 }
 0x210   :  { %1164 = vmatpush.bf16.msrb.mxu1 %v5643_v60  ;;  %1200 = vmatpush.bf16.msrb.mxu2 %v5643_v60  ;;  %v1524_v0 = vadd.f32 1e-05, %v1519_v45 }
 0x211   :  { %1236 = vmatpush.bf16.msrb.mxu3 %v5643_v60 }
 0x212   :  { %4300 = vrsqrt.f32 %v1524_v0  ;;  %vm1531_vm7 = vweird.f32 %v1524_v0 }
 0x214   :  { %1165 = vmatpush.bf16.msrb.mxu1 %v5661_v22  ;;  %1201 = vmatpush.bf16.msrb.mxu2 %v5661_v22 }
 0x215   :  { %1237 = vmatpush.bf16.msrb.mxu3 %v5661_v22 }
 0x217   :  { %1166 = vmatmul.bf16.vlgmr.msrb.gmra.mxu1 %v4133_v49  ;;  %1202 = vmatmul.bf16.vlgmr.msrb.gmra.mxu2 %v4135_v2  ;;  %v1389_v49 = vld [vmem:[%s6559_s5] sm:$0xf] }
 0x218   :  { %4183 = vmatpush.bf16.msra.mxu1 %v5541_v44  ;;  %1302 = vmatpush.bf16.msra.mxu2 %v5541_v44  ;;  %v4301_v4 = vpop.eup %4300  ;;  %v1404_v2 = vsel %vm1402_vm2, %v1389_v49, 0 }
 0x219   :  { %1338 = vmatpush.bf16.msra.mxu3 %v5541_v44  ;;  %v4139_v44 = vld [vmem:[%s6555_s1 + $0x60] sm:$0xff]  ;;  %v1526_v32 = vmul.f32 %v4301_v4, %v1524_v0  ;;  %vm1532_vm10 = vweird.f32 %v4301_v4 }
 0x21a   :  { %1238 = vmatmul.bf16.vlgmr.msrb.gmra.mxu3 %v4137_v17  ;;  %1274 = vmatmul.bf16.vlgmr.msrb.gmra.mxu0 %v4139_v44  ;;  %vm1533_vm14 = vmor %vm1531_vm7, %vm1532_vm10 }
 0x21b   :  { %v1527_v16 = vmul.f32 %v4301_v4, %v1526_v32 }
 0x21c   :  { %4184 = vmatpush.bf16.msra.mxu1 %v5566_v46  ;;  %1303 = vmatpush.bf16.msra.mxu2 %v5566_v46 }
 0x21d   :  { %1339 = vmatpush.bf16.msra.mxu3 %v5566_v46  ;;  %v4134_v46 = vld [vmem:[%s6555_s1 + $0x38] sm:$0xff]  ;;  %v1528_v48 = vmul.f32 0.5, %v1527_v16 }
 0x21f   :  { %v1529_v54 = vsub.f32 1.5, %v1528_v48 }
 0x220   :  { %4185 = vmatpush.bf16.msra.mxu1 %v5585_v53  ;;  %1304 = vmatpush.bf16.msra.mxu2 %v5585_v53 }
 0x221   :  { %1340 = vmatpush.bf16.msra.mxu3 %v5585_v53  ;;  %v4136_v53 = vld [vmem:[%s6555_s1 + $0x48] sm:$0xff]  ;;  %v1530_v36 = vmul.f32 %v4301_v4, %v1529_v54 }
 0x223   :  { %v1534_v50 = vsel %vm1533_vm14, %v4301_v4, %v1530_v36 }
 0x224   :  { %4186 = vmatpush.bf16.msra.mxu1 %v5600_v12  ;;  %1305 = vmatpush.bf16.msra.mxu2 %v5600_v12 }
 0x225   :  { %1341 = vmatpush.bf16.msra.mxu3 %v5600_v12  ;;  %v4140_v12 = vld [vmem:[%s6555_s1 + $0x68] sm:$0xff] }
 0x227   :  { %1171 = vmatmul.bf16.gmra.mxu1 %v4134_v46  ;;  %1207 = vmatmul.bf16.gmra.mxu2 %v4136_v53 }
 0x228   :  { %4187 = vmatpush.bf16.msra.mxu1 %v5612_v20  ;;  %1306 = vmatpush.bf16.msra.mxu2 %v5612_v20 }
 0x229   :  { %1342 = vmatpush.bf16.msra.mxu3 %v5612_v20  ;;  %v4141_v20 = vld [vmem:[%s6555_s1 + $0x70] sm:$0xff] }
 0x22a   :  { %1243 = vmatmul.bf16.gmra.mxu3 %v4138_v55 }
 0x22c   :  { %4188 = vmatpush.bf16.msra.mxu1 %v5627_v37  ;;  %1307 = vmatpush.bf16.msra.mxu2 %v5627_v37 }
 0x22d   :  { %1343 = vmatpush.bf16.msra.mxu3 %v5627_v37  ;;  %v4143_v37 = vld [vmem:[%s6555_s1 + $0x80] sm:$0xff] }
 0x230   :  { %4189 = vmatpush.bf16.msra.mxu1 %v5643_v60  ;;  %1308 = vmatpush.bf16.msra.mxu2 %v5643_v60 }
 0x231   :  { %1344 = vmatpush.bf16.msra.mxu3 %v5643_v60 }
 0x234   :  { %4190 = vmatpush.bf16.msra.mxu1 %v5661_v22  ;;  %1309 = vmatpush.bf16.msra.mxu2 %v5661_v22 }
 0x235   :  { %1345 = vmatpush.bf16.msra.mxu3 %v5661_v22  ;;  %v1555_v22 = vld [vmem:[%s6559_s5 + $0x4] sm:$0xf] }
 0x236   :  { %v1565_v43 = vsel %vm1402_vm2, %v1555_v22, 0 }
 0x237   :  { %1279 = vmatmul.bf16.vlgmr.msra.gmra.mxu1 %v4140_v12  ;;  %1310 = vmatmul.bf16.vlgmr.msra.gmra.mxu2 %v4141_v20 }
 0x238   :  { %1574 = vmatpush.bf16.msrb.mxu2 %v1565_v43  ;;  %1413 = vmatpush.bf16.msrb.mxu1 %v1404_v2 }
 0x23a   :  { %1346 = vmatmul.bf16.vlgmr.msra.gmra.mxu3 %v4143_v37 }
 0x247   :  { %1315 = vmatmul.bf16.gmra.mxu2 %v4142_v40 }
 0x24a   :  { %1351 = vmatmul.bf16.gmra.mxu3 %v4144_v6 }
 0x274   :  { %v1059_v51 = vpop.f32.mrf.mxu1 }
 0x27a   :  { %v1095_v61 = vpop.f32.mrf.mxu2 }
 0x27b   :  { %v1357_v31 = vmax.f32 %v1059_v51, %v1095_v61 }
 0x27c   :  { %v5787_v60 = vpop.f32.mrf.mxu1 }
 0x27d   :  { %v1131_v1 = vpop.f32.mrf.mxu3 }
 0x282   :  { %v5789_v58 = vpop.f32.mrf.mxu2 }
 0x284   :  { %v1064_v56 = vpop.f32.mrf.mxu1 }
 0x285   :  { %v5791_v21 = vpop.f32.mrf.mxu3 }
 0x28a   :  { %v1100_v10 = vpop.f32.mrf.mxu2 }
 0x28b   :  { %v1359_v41 = vmax.f32 %v1064_v56, %v1100_v10 }
 0x28c   :  { %v5793_v42 = vpop.f32.mrf.mxu1 }
 0x28d   :  { %v1136_v11 = vpop.f32.mrf.mxu3 }
 0x292   :  { %v5799_v52 = vpop.f32.mrf.mxu2 }
 0x294   :  { %v1167_v62 = vpop.f32.mrf.mxu1 }
 0x295   :  { %v5801_v14 = vpop.f32.mrf.mxu3  ;;  %v1361_v13 = vmax.f32 %v1131_v1, %v1167_v62 }
 0x297   :  { %v5803_v3 = vmax.f32 %v1357_v31, %v1361_v13  ;;  %v1275_v12 = vpop.f32.mrf.mxu0 }
 0x29a   :  { %v1203_v57 = vpop.f32.mrf.mxu2 }
 0x29b   :  { %v1520_v30 = vsub.f32 %v1203_v57, %v5707_v29 }
 0x29c   :  { %v1169_v59 = vpop.f32.mrf.mxu1 }
 0x29d   :  { %v1239_v63 = vpop.f32.mrf.mxu3  ;;  %v1535_v19 = vmul.f32 %v1534_v50, %v1520_v30  ;;  %v1362_v4 = vmax.f32 %v5791_v21, %v1169_v59 }
 0x29e   :  { %v1365_v0 = vmax.f32 %v1203_v57, %v1239_v63 }
 0x29f   :  { %v1543_v35 = vmul.f32 %v4203_v23, %v1535_v19  ;;  %v1277_v56 = vpop.f32.mrf.mxu0 }
 0x2a1   :  { %v1551_v33 = vadd.f32 %v4204_v7, %v1543_v35 }
 0x2a2   :  { %v1205_v26 = vpop.f32.mrf.mxu2 }
 0x2a3   :  { %v1521_v47 = vsub.f32 %v1205_v26, %v5707_v29 }
 0x2a4   :  { %v1172_v24 = vpop.f32.mrf.mxu1 }
 0x2a5   :  { %v1241_v34 = vpop.f32.mrf.mxu3  ;;  %v1363_v27 = vmax.f32 %v1136_v11, %v1172_v24  ;;  %v1536_v38 = vmul.f32 %v1534_v50, %v1521_v47  ;;  %v1358_v11 = vmax.f32 %v5787_v60, %v5789_v58 }
 0x2a6   :  { %v1366_v16 = vmax.f32 %v1205_v26, %v1241_v34 }
 0x2a7   :  { %v5813_v39 = vmax.f32 %v1359_v41, %v1363_v27  ;;  %v1544_v15 = vmul.f32 %v4203_v23, %v1536_v38  ;;  %v1374_v48 = vmax.f32 %v1358_v11, %v1362_v4 }
 0x2a9   :  { %v1552_v28 = vadd.f32 %v4204_v7, %v1544_v15 }
 0x2aa   :  { %v1208_v5 = vpop.f32.mrf.mxu2 }
 0x2ab   :  { %v1556_v18 = vpack.c.bf16 %v1552_v28, %v1551_v33  ;;  %v1522_v9 = vsub.f32 %v1208_v5, %v5707_v29  ;;  %v4400_v33 = vmov 32.0  }
 0x2ac   :  { %v1174_v1 = vpop.f32.mrf.mxu1  ;;  %4302 = vrcp.f32 %v4400_v33 }
 0x2ad   :  { %v1244_v8 = vpop.f32.mrf.mxu3  ;;  %v1537_v25 = vmul.f32 %v1534_v50, %v1522_v9  ;;  %3849 = vmatmul.msk.bf16.vlgmr.msrb.gmra.mxu2 %vm6754_vm8, %v1556_v18  ;;  %v1364_v60 = vmax.f32 %v5801_v14, %v1174_v1 }
 0x2ae   :  { %v1367_v59 = vmax.f32 %v1208_v5, %v1244_v8 }
 0x2af   :  { %v1545_v53 = vmul.f32 %v4203_v23, %v1537_v25 }
 0x2b1   :  { %v1553_v37 = vadd.f32 %v4204_v7, %v1545_v53 }
 0x2b2   :  { %v1210_v17 = vpop.f32.mrf.mxu2 }
 0x2b3   :  { %v1523_v46 = vsub.f32 %v1210_v17, %v5707_v29 }
 0x2b4   :  { %v1280_v31 = vpop.f32.mrf.mxu1 }
 0x2b5   :  { %v1246_v44 = vpop.f32.mrf.mxu3  ;;  %v1538_v55 = vmul.f32 %v1534_v50, %v1523_v46 }
 0x2b7   :  { %v1546_v20 = vmul.f32 %v4203_v23, %v1538_v55  ;;  %v1368_v23 = vmax.f32 %v1210_v17, %v1246_v44 }
 0x2b9   :  { %v1554_v40 = vadd.f32 %v4204_v7, %v1546_v20 }
 0x2ba   :  { %v1311_v6 = vpop.f32.mrf.mxu2 }
 0x2bb   :  { %v1557_v45 = vpack.c.bf16 %v1554_v40, %v1553_v37  ;;  %v1369_v61 = vmax.f32 %v1275_v12, %v1311_v6 }
 0x2bc   :  { %v1282_v50 = vpop.f32.mrf.mxu1 }
 0x2bd   :  { %v1347_v51 = vpop.f32.mrf.mxu3  ;;  %3850 = vmatmul.msk.bf16.gmra.mxu2 %vm6755_vm13, %v1557_v45  ;;  %v1377_v32 = vmax.f32 %v1365_v0, %v1369_v61 }
 0x2bf   :  { %v1381_v43 = vmax.f32 %v5803_v3, %v1377_v32  ;;  %v1360_v3 = vmax.f32 %v5793_v42, %v5799_v52 }
 0x2c1   :  { %v1385_v54 = vmax.f32 %v1381_v43, %v1347_v51  ;;  %v1376_v34 = vmax.f32 %v1360_v3, %v1364_v60 }
 0x2c2   :  { %v1313_v10 = vpop.f32.mrf.mxu2 }
 0x2c3   :  { %v1370_v22 = vmax.f32 %v1277_v56, %v1313_v10 }
 0x2c5   :  { %v1349_v29 = vpop.f32.mrf.mxu3  ;;  %v1378_v62 = vmax.f32 %v1366_v16, %v1370_v22 }
 0x2c7   :  { %v1382_v13 = vmax.f32 %v1374_v48, %v1378_v62 }
 0x2c9   :  { %v1386_v36 = vmax.f32 %v1382_v13, %v1349_v29 }
 0x2ca   :  { %v1316_v57 = vpop.f32.mrf.mxu2 }
 0x2cb   :  { %v1390_v63 = vpack.c.bf16 %v1386_v36, %v1385_v54  ;;  %v1371_v21 = vmax.f32 %v1280_v31, %v1316_v57 }
 0x2cd   :  { %v1352_v30 = vpop.f32.mrf.mxu3  ;;  %3847 = vmatmul.msk.bf16.vlgmr.msrb.gmra.mxu1 %vm6756_vm3, %v1390_v63  ;;  %v1379_v58 = vmax.f32 %v1367_v59, %v1371_v21 }
 0x2cf   :  { %v1383_v47 = vmax.f32 %v5813_v39, %v1379_v58  ;;  %v4303_v39 = vpop.eup %4302 }
 0x2d0   :  { %v1603_v49 = vmul.f32 32.0, %v4303_v39  ;;  %vm1607_vm12 = vweird.f32 %v4303_v39 }
 0x2d1   :  { %v1387_v35 = vmax.f32 %v1383_v47, %v1352_v30  ;;  %v4205_v47 = vld [vmem:[%s6565_s11 + $0x5] ss:$0 sm:$0xff] }
 0x2d2   :  { %v1318_v19 = vpop.f32.mrf.mxu2  ;;  %v1604_v20 = vsub.f32 1.0, %v1603_v49 }
 0x2d3   :  { %v1372_v26 = vmax.f32 %v1282_v50, %v1318_v19 }
 0x2d4   :  { %v1605_v1 = vmul.f32 %v4303_v39, %v1604_v20 }
 0x2d5   :  { %v1380_v24 = vmax.f32 %v1368_v23, %v1372_v26  ;;  %v1354_v41 = vpop.f32.mrf.mxu3 }
 0x2d6   :  { %v1606_v10 = vadd.f32 %v4303_v39, %v1605_v1 }
 0x2d7   :  { %v1384_v27 = vmax.f32 %v1376_v34, %v1380_v24 }
 0x2d8   :  { %v5856_v48 = vsel %vm1607_vm12, %v4303_v39, %v1606_v10 }
 0x2d9   :  { %v1388_v7 = vmax.f32 %v1384_v27, %v1354_v41 }
 0x2db   :  { %v1391_v38 = vpack.c.bf16 %v1388_v7, %v1387_v35 }
 0x2dd   :  { %3848 = vmatmul.msk.bf16.gmra.mxu1 %vm6757_vm11, %v1391_v38  ;;  %v4206_v38 = vld [vmem:[%s6565_s11 + $0x6] ss:$0 sm:$0xff] }
 0x330   :  { %v5833_v15 = vpop.f32.mrf.mxu2 }
 0x331   :  { %v1610_v28 = vmul.f32 %v5833_v15, %v5833_v15  ;;  %v1589_v18 = vsel %vm1588_vm9, %v5833_v15, 0.0 }
 0x333   :  { %v1614_v17 = vsel %vm1588_vm9, %v1610_v28, 0.0 }
 0x338   :  { %v5835_v14 = vpop.f32.mrf.mxu2 }
 0x339   :  { %v1611_v52 = vmul.f32 %v5835_v14, %v5835_v14  ;;  %v1590_v5 = vsel %vm1588_vm9, %v5835_v14, 0.0 }
 0x33a   :  { %v1591_v2 = vadd.f32 %v1590_v5, %v1589_v18 }
 0x33b   :  { %v1615_v9 = vsel %vm1588_vm9, %v1611_v52, 0.0 }
 0x33c   :  { %v1616_v53 = vadd.f32 %v1615_v9, %v1614_v17 }
 0x340   :  { %v5837_v42 = vpop.f32.mrf.mxu2 }
 0x341   :  { %v1612_v8 = vmul.f32 %v5837_v42, %v5837_v42  ;;  %v1592_v25 = vsel %vm1588_vm9, %v5837_v42, 0.0 }
 0x342   :  { %v1593_v46 = vadd.f32 %v1592_v25, %v1591_v2 }
 0x343   :  { %v1617_v44 = vsel %vm1588_vm9, %v1612_v8, 0.0 }
 0x344   :  { %v1618_v40 = vadd.f32 %v1617_v44, %v1616_v53 }
 0x348   :  { %v1583_v55 = vpop.f32.mrf.mxu2 }
 0x349   :  { %v1594_v12 = vsel %vm1588_vm9, %v1583_v55, 0.0  ;;  %v1613_v37 = vmul.f32 %v1583_v55, %v1583_v55 }
 0x34a   :  { %v1595_v6 = vadd.f32 %v1594_v12, %v1593_v46 }
 0x34b   :  { %v1619_v51 = vsel %vm1588_vm9, %v1613_v37, 0.0 }
 0x34c   :  { %v1596_v45 = vrot.slane %v1595_v6, 4  ;;  %v1620_v61 = vadd.f32 %v1619_v51, %v1618_v40 }
 0x34e   :  { %v1597_v0 = vadd.f32 %v1596_v45, %v1595_v6  ;;  %v1621_v56 = vrot.slane %v1620_v61, 4 }
 0x350   :  { %v1598_v4 = vrot.slane %v1597_v0, 2  ;;  %v1622_v32 = vadd.f32 %v1621_v56, %v1620_v61 }
 0x352   :  { %v1599_v29 = vadd.f32 %v1598_v4, %v1597_v0  ;;  %v1623_v11 = vrot.slane %v1622_v32, 2 }
 0x354   :  { %v1600_v16 = vrot.slane %v1599_v29, 1  ;;  %v1624_v22 = vadd.f32 %v1623_v11, %v1622_v32 }
 0x356   :  { %v1601_v43 = vadd.f32 %v1600_v16, %v1599_v29  ;;  %v1625_v62 = vrot.slane %v1624_v22, 1 }
 0x358   :  { %v1609_v31 = vmul.f32 %v5856_v48, %v1601_v43  ;;  %v1626_v13 = vadd.f32 %v1625_v62, %v1624_v22 }
 0x35a   :  { %v1627_v54 = vmul.f32 %v1626_v13, %v5856_v48  ;;  %v1628_v36 = vmul.f32 %v1609_v31, %v1609_v31  ;;  %v1631_v3 = vsub.f32 %v5833_v15, %v1609_v31  ;;  %v1632_v23 = vsub.f32 %v5835_v14, %v1609_v31 }
 0x35b   :  { %v1633_v26 = vsub.f32 %v5837_v42, %v1609_v31  ;;  %v1634_v34 = vsub.f32 %v1583_v55, %v1609_v31 }
 0x35c   :  { %v1629_v57 = vsub.f32 %v1627_v54, %v1628_v36 }
 0x35e   :  { %v1630_v63 = vmax.f32 %v1629_v57, 0.0 }
 0x360   :  { %v1635_v30 = vadd.f32 1e-05, %v1630_v63 }
 0x362   :  { %4304 = vrsqrt.f32 %v1635_v30  ;;  %vm1642_vm1 = vweird.f32 %v1635_v30 }
 0x368   :  { %v4305_v21 = vpop.eup %4304 }
 0x369   :  { %v1637_v59 = vmul.f32 %v4305_v21, %v1635_v30  ;;  %vm1643_vm15 = vweird.f32 %v4305_v21 }
 0x36a   :  { %vm1644_vm0 = vmor %vm1642_vm1, %vm1643_vm15 }
 0x36b   :  { %v1638_v50 = vmul.f32 %v4305_v21, %v1637_v59 }
 0x36d   :  { %v1639_v60 = vmul.f32 0.5, %v1638_v50 }
 0x36f   :  { %v1640_v58 = vsub.f32 1.5, %v1639_v60 }
 0x371   :  { %v1641_v19 = vmul.f32 %v4305_v21, %v1640_v58 }
 0x373   :  { %v1645_v24 = vsel %vm1644_vm0, %v4305_v21, %v1641_v19 }
 0x374   :  { %v1646_v41 = vmul.f32 %v1645_v24, %v1631_v3  ;;  %v1647_v27 = vmul.f32 %v1645_v24, %v1632_v23  ;;  %v1648_v35 = vmul.f32 %v1645_v24, %v1633_v26  ;;  %v1649_v7 = vmul.f32 %v1645_v24, %v1634_v34 }
 0x376   :  { %v1653_v15 = vmul.f32 %v4205_v47, %v1646_v41  ;;  %v1654_v33 = vmul.f32 %v4205_v47, %v1647_v27  ;;  %v1655_v14 = vmul.f32 %v4205_v47, %v1648_v35  ;;  %v1656_v52 = vmul.f32 %v4205_v47, %v1649_v7 }
 0x378   :  { %v5869_v42 = vadd.f32 %v4206_v38, %v1653_v15  ;;  %v5871_v39 = vadd.f32 %v4206_v38, %v1654_v33  ;;  %v5873_v28 = vadd.f32 %v4206_v38, %v1655_v14  ;;  %v5875_v5 = vadd.f32 %v4206_v38, %v1656_v52 }
 0x37a   :  { %v5878_v8 = vmul.f32 0.70710677, %v5869_v42  ;;  %v5881_v18 = vmul.f32 0.70710677, %v5871_v39  ;;  %v5884_v9 = vmul.f32 0.70710677, %v5873_v28 }
 0x37b   :  { %v5887_v25 = vmul.f32 0.70710677, %v5875_v5 }
 0x37c   :  { %v5890_v49 = vand.u32 2147483647, %v5878_v8  ;;  %v5893_v2 = vand.u32 2147483647, %v5881_v18  ;;  %v5896_v17 = vand.u32 2147483647, %v5884_v9 }
 0x37d   :  { %v5899_v44 = vand.u32 2147483647, %v5887_v25 }
 0x37e   :  { %v1680_v46 = vmul.f32 0.3275911, %v5890_v49  ;;  %v1681_v53 = vmul.f32 0.3275911, %v5893_v2  ;;  %v1682_v55 = vmul.f32 0.3275911, %v5896_v17 }
 0x37f   :  { %v1683_v12 = vmul.f32 0.3275911, %v5899_v44  ;;  %v1784_v4 = vsub.f32 0.0, %v5890_v49  ;;  %v1785_v32 = vsub.f32 0.0, %v5893_v2 }
 0x380   :  { %v1684_v20 = vadd.f32 1.0, %v1680_v46  ;;  %v1685_v37 = vadd.f32 1.0, %v1681_v53  ;;  %v1686_v40 = vadd.f32 1.0, %v1682_v55  ;;  %v1786_v53 = vsub.f32 0.0, %v5896_v17 }
 0x381   :  { %v5905_v6 = vadd.f32 1.0, %v1683_v12 }
 0x382   :  { %4306 = vrcp.f32 %v1684_v20  ;;  %v1697_v51 = vand.u32 2147483647, %v1684_v20  ;;  %v1699_v61 = vand.u32 2147483648, %v1684_v20  ;;  %v1712_v1 = vand.u32 2147483647, %v1685_v37 }
 0x383   :  { %4308 = vrcp.f32 %v1685_v37  ;;  %vm1693_vm4 = vweird.f32 %v1684_v20  ;;  %vm1708_vm5 = vweird.f32 %v1685_v37  ;;  %v1714_v11 = vand.u32 2147483648, %v1685_v37 }
 0x384   :  { %4310 = vrcp.f32 %v1686_v40  ;;  %vm5910_vm6 = vcmp.eq.f32.partialorder %v1697_v51, 8.507059e+37  ;;  %vm1723_vm10 = vweird.f32 %v1686_v40  ;;  %v1700_v31 = vor.u32 1.1754944e-38, %v1699_v61 }
 0x385   :  { %4312 = vrcp.f32 %v5905_v6  ;;  %vm5914_vm7 = vcmp.eq.f32.partialorder %v1712_v1, 8.507059e+37  ;;  %v1727_v36 = vand.u32 2147483647, %v1686_v40  ;;  %v1715_v59 = vor.u32 1.1754944e-38, %v1714_v11 }
 0x386   :  { %v1729_v50 = vand.u32 2147483648, %v1686_v40  ;;  %vm1738_vm11 = vweird.f32 %v5905_v6  ;;  %v1742_v23 = vand.u32 2147483647, %v5905_v6  ;;  %v1744_v26 = vand.u32 2147483648, %v5905_v6 }
 0x387   :  { %vm1728_vm0 = vcmp.eq.f32.partialorder %v1727_v36, 8.507059e+37  ;;  %v1787_v51 = vsub.f32 0.0, %v5899_v44 }
 0x388   :  { %v4307_v45 = vpop.eup %4306  ;;  %v1730_v35 = vor.u32 1.1754944e-38, %v1729_v50  ;;  %v1745_v52 = vor.u32 1.1754944e-38, %v1744_v26 }
 0x389   :  { %v4309_v0 = vpop.eup %4308  ;;  %v1689_v56 = vmul.f32 %v4307_v45, %v1684_v20  ;;  %vm1694_vm14 = vweird.f32 %v4307_v45 }
 0x38a   :  { %v4311_v10 = vpop.eup %4310  ;;  %v1704_v29 = vmul.f32 %v4309_v0, %v1685_v37  ;;  %vm1709_vm8 = vweird.f32 %v4309_v0  ;;  %vm1695_vm3 = vmor %vm1693_vm4, %vm1694_vm14  ;;  %vm1671_vm14 = vcmp.ge.f32.partialorder %v5887_v25, 0.0  ;;  %v1815_v25 = vmul.f32 0.5, %v5875_v5  ;;  %v4145_v5 = vld [vmem:[%s6556_s2] sm:$0xff] }
 0x38b   :  { %v1690_v16 = vsub.f32 1.0, %v1689_v56  ;;  %v1719_v43 = vmul.f32 %v4311_v10, %v1686_v40  ;;  %v4313_v62 = vpop.eup %4312  ;;  %vm1724_vm13 = vweird.f32 %v4311_v10  ;;  %vm1710_vm12 = vmor %vm1708_vm5, %vm1709_vm8  ;;  %vm1743_vm5 = vcmp.eq.f32.partialorder %v1742_v23, 8.507059e+37 }
 0x38c   :  { %v1705_v13 = vsub.f32 1.0, %v1704_v29  ;;  %v1734_v30 = vmul.f32 %v4313_v62, %v5905_v6  ;;  %vm1739_vm15 = vweird.f32 %v4313_v62  ;;  %vm1725_vm1 = vmor %vm1723_vm10, %vm1724_vm13  ;;  %v1789_v6 = vmul.f32 %v1785_v32, %v5893_v2 }
 0x38d   :  { %v1691_v57 = vmul.f32 %v4307_v45, %v1690_v16  ;;  %v1720_v63 = vsub.f32 1.0, %v1719_v43  ;;  %vm1740_vm4 = vmor %vm1738_vm11, %vm1739_vm15  ;;  %v1791_v43 = vmul.f32 %v1787_v51, %v5899_v44  ;;  %vm1669_vm10 = vcmp.ge.f32.partialorder %v5881_v18, 0.0 }
 0x38e   :  { %v1706_v21 = vmul.f32 %v4309_v0, %v1705_v13  ;;  %v1735_v19 = vsub.f32 1.0, %v1734_v30  ;;  %v1794_v36 = vmul.f32 1.442695, %v1789_v6 }
 0x38f   :  { %v1692_v60 = vadd.f32 %v4307_v45, %v1691_v57  ;;  %v1721_v58 = vmul.f32 %v4311_v10, %v1720_v63  ;;  %v1798_v32 = vmul.f32 1.442695, %v1791_v43 }
 0x390   :  { %v1707_v3 = vadd.f32 %v4309_v0, %v1706_v21  ;;  %v1736_v24 = vmul.f32 %v4313_v62, %v1735_v19 }
 0x391   :  { %v1696_v34 = vsel %vm1695_vm3, %v4307_v45, %v1692_v60  ;;  %v1722_v47 = vadd.f32 %v4311_v10, %v1721_v58  ;;  %v1788_v45 = vmul.f32 %v1784_v4, %v5890_v49 }
 0x392   :  { %v1701_v41 = vsel %vm5910_vm6, %v1700_v31, %v1696_v34  ;;  %v1711_v27 = vsel %vm1710_vm12, %v4309_v0, %v1707_v3  ;;  %v1737_v15 = vadd.f32 %v4313_v62, %v1736_v24  ;;  %vm1668_vm6 = vcmp.ge.f32.partialorder %v5878_v8, 0.0 }
 0x393   :  { %v1716_v7 = vsel %vm5914_vm7, %v1715_v59, %v1711_v27  ;;  %v1726_v38 = vsel %vm1725_vm1, %v4311_v10, %v1722_v47  ;;  %v1748_v33 = vmul.f32 1.0614054, %v1701_v41  ;;  %v1790_v10 = vmul.f32 %v1786_v53, %v5896_v17 }
 0x394   :  { %v1731_v14 = vsel %vm1728_vm0, %v1730_v35, %v1726_v38  ;;  %v1749_v46 = vmul.f32 1.0614054, %v1716_v7  ;;  %v1741_v55 = vsel %vm1740_vm4, %v4313_v62, %v1737_v15  ;;  %v1792_v62 = vmul.f32 1.442695, %v1788_v45 }
 0x395   :  { %v1750_v12 = vmul.f32 1.0614054, %v1731_v14  ;;  %v3851_v20 = vadd.f32 -1.4531521, %v1748_v33  ;;  %v1746_v37 = vsel %vm1743_vm5, %v1745_v52, %v1741_v55  ;;  %v1796_v4 = vmul.f32 1.442695, %v1790_v10 }
 0x396   :  { %v3852_v40 = vadd.f32 -1.4531521, %v1749_v46  ;;  %v1751_v61 = vmul.f32 1.0614054, %v1746_v37  ;;  %4314 = vpow2.f32 %v1792_v62  ;;  %vm1670_vm7 = vcmp.ge.f32.partialorder %v5884_v9, 0.0 }
 0x397   :  { %v3853_v1 = vadd.f32 -1.4531521, %v1750_v12  ;;  %v1756_v0 = vmul.f32 %v3851_v20, %v1701_v41  ;;  %4316 = vpow2.f32 %v1794_v36  ;;  %v6762_v20 = vmov -1.0   ;;  %v4152_v36 = vld [vmem:[%s6556_s2 + $0x38] sm:$0xff] }
 0x398   :  { %v1757_v56 = vmul.f32 %v3852_v40, %v1716_v7  ;;  %v3854_v29 = vadd.f32 -1.4531521, %v1751_v61  ;;  %4318 = vpow2.f32 %v1796_v4  ;;  %v1673_v40 = vsel %vm1669_vm10, 1.0, %v6762_v20  ;;  %v4150_v4 = vld [vmem:[%s6556_s2 + $0x28] sm:$0xff] }
 0x399   :  { %v1758_v11 = vmul.f32 %v3853_v1, %v1731_v14  ;;  %v1760_v16 = vadd.f32 1.4214138, %v1756_v0  ;;  %4320 = vpow2.f32 %v1798_v32  ;;  %v1674_v8 = vsel %vm1670_vm7, 1.0, %v6762_v20  ;;  %v4154_v32 = vld [vmem:[%s6556_s2 + $0x48] sm:$0xff] }
 0x39a   :  { %v1761_v22 = vadd.f32 1.4214138, %v1757_v56  ;;  %v1759_v31 = vmul.f32 %v3854_v29, %v1746_v37  ;;  %v1675_v9 = vsel %vm1671_vm14, 1.0, %v6762_v20  ;;  %v1814_v1 = vmul.f32 0.5, %v5873_v28 }
 0x39b   :  { %v1762_v13 = vadd.f32 1.4214138, %v1758_v11  ;;  %v1764_v54 = vmul.f32 %v1760_v16, %v1701_v41  ;;  %v1812_v11 = vmul.f32 0.5, %v5869_v42  ;;  %v1813_v16 = vmul.f32 0.5, %v5871_v39  ;;  %v4151_v42 = vld [vmem:[%s6556_s2 + $0x30] sm:$0xff] }
 0x39c   :  { %v1765_v49 = vmul.f32 %v1761_v22, %v1716_v7  ;;  %v1763_v57 = vadd.f32 1.4214138, %v1759_v31  ;;  %v4315_v34 = vpop.eup %4314  ;;  %v4147_v39 = vld [vmem:[%s6556_s2 + $0x10] sm:$0xff] }
 0x39d   :  { %v1766_v63 = vmul.f32 %v1762_v13, %v1731_v14  ;;  %v3855_v30 = vadd.f32 -0.28449672, %v1764_v54  ;;  %v4317_v24 = vpop.eup %4316  ;;  %v4149_v13 = vld [vmem:[%s6556_s2 + $0x20] sm:$0xff]  ;;  %v4146_v54 = vld [vmem:[%s6556_s2 + $0x8] sm:$0xff] }
 0x39e   :  { %v3856_v2 = vadd.f32 -0.28449672, %v1765_v49  ;;  %v1767_v17 = vmul.f32 %v1763_v57, %v1746_v37  ;;  %v4319_v15 = vpop.eup %4318  ;;  %v4148_v49 = vld [vmem:[%s6556_s2 + $0x18] sm:$0xff]  ;;  %v4153_v57 = vld [vmem:[%s6556_s2 + $0x40] sm:$0xff] }
 0x39f   :  { %v3857_v21 = vadd.f32 -0.28449672, %v1766_v63  ;;  %v1772_v59 = vmul.f32 %v3855_v30, %v1701_v41  ;;  %v4321_v55 = vpop.eup %4320  ;;  %v4159_v63 = vld [vmem:[%s6556_s2 + $0x70] sm:$0xff] }
 0x3a0   :  { %v1773_v50 = vmul.f32 %v3856_v2, %v1716_v7  ;;  %v3858_v44 = vadd.f32 -0.28449672, %v1767_v17  ;;  %v4155_v30 = vld [vmem:[%s6556_s2 + $0x50] sm:$0xff]  ;;  %v4157_v2 = vld [vmem:[%s6556_s2 + $0x60] sm:$0xff]  ;;  %v4160_v17 = vld [vmem:[%s6556_s2 + $0x78] sm:$0xff] }
 0x3a1   :  { %v1774_v60 = vmul.f32 %v3857_v21, %v1731_v14  ;;  %v1776_v58 = vadd.f32 0.2548296, %v1772_v59  ;;  %v4156_v21 = vld [vmem:[%s6556_s2 + $0x58] sm:$0xff]  ;;  %v4158_v59 = vld [vmem:[%s6556_s2 + $0x68] sm:$0xff] }
 0x3a2   :  { %v1777_v19 = vadd.f32 0.2548296, %v1773_v50  ;;  %v1775_v3 = vmul.f32 %v3858_v44, %v1746_v37  ;;  %v4161_v50 = vld [vmem:[%s6556_s2 + $0x80] sm:$0xff]  ;;  %v4162_v44 = vld [vmem:[%s6556_s2 + $0x88] sm:$0xff]  ;;  %s4404_s2 = smov 112  }
 0x3a3   :  { %v1778_v23 = vadd.f32 0.2548296, %v1774_v60  ;;  %v1780_v26 = vmul.f32 %v1776_v58, %v1701_v41  ;;  %v6021_v60 = vpop.f32.mrf.mxu1 }
 0x3a4   :  { %v1781_v47 = vmul.f32 %v1777_v19, %v1716_v7  ;;  %v1779_v27 = vadd.f32 0.2548296, %v1775_v3 }
 0x3a5   :  { %v1782_v35 = vmul.f32 %v1778_v23, %v1731_v14  ;;  %v1800_v38 = vmul.f32 %v4315_v34, %v1780_v26  ;;  %v1672_v14 = vsel %vm1668_vm6, 1.0, %v6762_v20 }
 0x3a6   :  { %v1801_v33 = vmul.f32 %v4317_v24, %v1781_v47  ;;  %v1783_v52 = vmul.f32 %v1779_v27, %v1746_v37 }
 0x3a7   :  { %v1802_v46 = vmul.f32 %v4319_v15, %v1782_v35  ;;  %v1804_v53 = vsub.f32 1.0, %v1800_v38 }
 0x3a8   :  { %v1805_v12 = vsub.f32 1.0, %v1801_v33  ;;  %v1803_v41 = vmul.f32 %v4321_v55, %v1783_v52 }
 0x3a9   :  { %v1806_v7 = vsub.f32 1.0, %v1802_v46  ;;  %v1808_v18 = vmul.f32 %v1804_v53, %v1672_v14 }
 0x3aa   :  { %v1807_v51 = vsub.f32 1.0, %v1803_v41  ;;  %v1809_v45 = vmul.f32 %v1805_v12, %v1673_v40 }
 0x3ab   :  { %v1810_v61 = vmul.f32 %v1806_v7, %v1674_v8  ;;  %v1816_v6 = vadd.f32 1.0, %v1808_v18  ;;  %v6023_v58 = vpop.f32.mrf.mxu1 }
 0x3ac   :  { %v1811_v37 = vmul.f32 %v1807_v51, %v1675_v9  ;;  %v1817_v56 = vadd.f32 1.0, %v1809_v45 }
 0x3ad   :  { %v1818_v0 = vadd.f32 1.0, %v1810_v61  ;;  %v1820_v43 = vmul.f32 %v1816_v6, %v1812_v11  ;;  %v4214_v6 = vld [vmem:[%s6565_s11 + $0xd] ss:$0 sm:$0xff]  ;;  %v6069_v11 = vld [vmem:[%s6565_s11 + $0xa] ss:$0 sm:$0xff] }
 0x3ae   :  { %v1819_v10 = vadd.f32 1.0, %v1811_v37  ;;  %v1821_v62 = vmul.f32 %v1817_v56, %v1813_v16  ;;  %v4215_v56 = vld [vmem:[%s6565_s11 + $0xe] ss:$0 sm:$0xff] }
 0x3af   :  { %v1822_v29 = vmul.f32 %v1818_v0, %v1814_v1  ;;  %v6042_v1 = vld [vmem:[%s6565_s11 + $0x7] ss:$0 sm:$0xff]  ;;  %v4212_v0 = vld [vmem:[%s6565_s11 + $0xb] ss:$0 sm:$0xff] }
 0x3b0   :  { %v1823_v22 = vmul.f32 %v1819_v10, %v1815_v25  ;;  %v1833_v28 = vpack.c.bf16 %v1821_v62, %v1820_v43  ;;  %v4213_v25 = vld [vmem:[%s6565_s11 + $0xc] ss:$0 sm:$0xff]  ;;  %v6059_v10 = vld [vmem:[%s6565_s11 + $0x8] ss:$0 sm:$0xff] }
 0x3b2   :  { %v1834_v31 = vpack.c.bf16 %v1823_v22, %v1822_v29  ;;  %v6064_v29 = vld [vmem:[%s6565_s11 + $0x9] ss:$0 sm:$0xff] }
 0x3b3   :  { %v6025_v19 = vpop.f32.mrf.mxu1 }
 0x3b4   :  { %1861 = vmatpush.bf16.msrb.mxu3 %v1834_v31  ;;  %1908 = vmatpush.bf16.msra.mxu0 %v1834_v31 }
 0x3b5   :  { %1955 = vmatpush.bf16.msra.mxu1 %v1834_v31  ;;  %2002 = vmatpush.bf16.msra.mxu2 %v1834_v31 }
 0x3b8   :  { %1862 = vmatpush.bf16.msrb.mxu3 %v1833_v28  ;;  %1909 = vmatpush.bf16.msra.mxu0 %v1833_v28 }
 0x3b9   :  { %1956 = vmatpush.bf16.msra.mxu1 %v1833_v28  ;;  %2003 = vmatpush.bf16.msra.mxu2 %v1833_v28 }
 0x3bb   :  { %3867 = vmatmul.msk.bf16.vlgmr.msrb.gmra.mxu3 %vm1588_vm9, %v4145_v5  ;;  %3881 = vmatmul.msk.bf16.vlgmr.msra.gmra.mxu0 %vm1588_vm9, %v4147_v39  ;;  %v6027_v3 = vpop.f32.mrf.mxu1 }
 0x3bc   :  { %2049 = vmatpush.bf16.msra.mxu3 %v1834_v31  ;;  %2096 = vmatpush.bf16.msrb.mxu0 %v1834_v31 }
 0x3bd   :  { %2143 = vmatpush.bf16.msrb.mxu1 %v1834_v31  ;;  %2190 = vmatpush.bf16.msrb.mxu2 %v1834_v31 }
 0x3be   :  { %3909 = vmatmul.msk.bf16.vlgmr.msra.gmra.mxu2 %vm1588_vm9, %v4151_v42  ;;  %3895 = vmatmul.msk.bf16.vlgmr.msra.gmra.mxu1 %vm1588_vm9, %v4149_v13 }
 0x3c0   :  { %2050 = vmatpush.bf16.msra.mxu3 %v1833_v28  ;;  %2097 = vmatpush.bf16.msrb.mxu0 %v1833_v28 }
 0x3c1   :  { %2144 = vmatpush.bf16.msrb.mxu1 %v1833_v28  ;;  %2191 = vmatpush.bf16.msrb.mxu2 %v1833_v28 }
 0x3c4   :  { %2237 = vmatpush.bf16.msrb.mxu3 %v1834_v31 }
 0x3c8   :  { %2238 = vmatpush.bf16.msrb.mxu3 %v1833_v28 }
 0x3cb   :  { %3868 = vmatmul.msk.bf16.gmra.mxu3 %vm1588_vm9, %v4146_v54  ;;  %3882 = vmatmul.msk.bf16.gmra.mxu0 %vm1588_vm9, %v4148_v49 }
 0x3ce   :  { %3910 = vmatmul.msk.bf16.gmra.mxu2 %vm1588_vm9, %v4152_v36  ;;  %3896 = vmatmul.msk.bf16.gmra.mxu1 %vm1588_vm9, %v4150_v4 }
 0x3db   :  { %3923 = vmatmul.msk.bf16.vlgmr.msra.gmra.mxu3 %vm1588_vm9, %v4153_v57  ;;  %3937 = vmatmul.msk.bf16.vlgmr.msrb.gmra.mxu0 %vm1588_vm9, %v4155_v30 }
 0x3de   :  { %3965 = vmatmul.msk.bf16.vlgmr.msrb.gmra.mxu2 %vm1588_vm9, %v4159_v63  ;;  %3951 = vmatmul.msk.bf16.vlgmr.msrb.gmra.mxu1 %vm1588_vm9, %v4157_v2 }
 0x3eb   :  { %3924 = vmatmul.msk.bf16.gmra.mxu3 %vm1588_vm9, %v4154_v32  ;;  %3938 = vmatmul.msk.bf16.gmra.mxu0 %vm1588_vm9, %v4156_v21 }
 0x3ee   :  { %3966 = vmatmul.msk.bf16.gmra.mxu2 %vm1588_vm9, %v4160_v17  ;;  %3952 = vmatmul.msk.bf16.gmra.mxu1 %vm1588_vm9, %v4158_v59 }
 0x3fb   :  { %3979 = vmatmul.msk.bf16.vlgmr.msrb.gmra.mxu3 %vm1588_vm9, %v4161_v50 }
 0x40b   :  { %3980 = vmatmul.msk.bf16.gmra.mxu3 %vm1588_vm9, %v4162_v44 }
 0x438   :  { %v1911_v26 = vpop.f32.mrf.mxu0 }
 0x439   :  { %v1924_v57 = vmul.f32 %v6059_v10, %v1911_v26 }
 0x43b   :  { %v1958_v34 = vpop.f32.mrf.mxu1 }
 0x43c   :  { %v1971_v63 = vmul.f32 %v6064_v29, %v1958_v34  ;;  %v4216_v34 = vld [vmem:[%s6565_s11 + $0xf] ss:$0 sm:$0xff] }
 0x43e   :  { %v1864_v23 = vpop.f32.mrf.mxu3 }
 0x43f   :  { %v1877_v32 = vmul.f32 %v6042_v1, %v1864_v23 }
 0x440   :  { %v1913_v27 = vpop.f32.mrf.mxu0 }
 0x441   :  { %v2005_v47 = vpop.f32.mrf.mxu2  ;;  %v1925_v28 = vmul.f32 %v6059_v10, %v1913_v27 }
 0x442   :  { %v2018_v17 = vmul.f32 %v6069_v11, %v2005_v47 }
 0x443   :  { %v1960_v35 = vpop.f32.mrf.mxu1 }
 0x444   :  { %v1972_v5 = vmul.f32 %v6064_v29, %v1960_v35  ;;  %v2261_v26 = vadd.f32 %v2018_v17, %v1971_v63 }
 0x446   :  { %v1866_v24 = vpop.f32.mrf.mxu3 }
 0x447   :  { %v1878_v31 = vmul.f32 %v6042_v1, %v1866_v24 }
 0x448   :  { %v1916_v33 = vpop.f32.mrf.mxu0 }
 0x449   :  { %v2007_v38 = vpop.f32.mrf.mxu2  ;;  %v2258_v50 = vadd.f32 %v1925_v28, %v1878_v31  ;;  %v1926_v47 = vmul.f32 %v6059_v10, %v1916_v33 }
 0x44a   :  { %v2019_v42 = vmul.f32 %v6069_v11, %v2007_v38 }
 0x44b   :  { %v1963_v52 = vpop.f32.mrf.mxu1 }
 0x44c   :  { %v2262_v44 = vadd.f32 %v2019_v42, %v1972_v5 }
 0x44e   :  { %v1869_v15 = vpop.f32.mrf.mxu3 }
 0x44f   :  { %v1879_v23 = vmul.f32 %v6042_v1, %v1869_v15 }
 0x450   :  { %v6031_v12 = vpop.f32.mrf.mxu0 }
 0x451   :  { %v2010_v46 = vpop.f32.mrf.mxu2  ;;  %v2259_v42 = vadd.f32 %v1926_v47, %v1879_v23 }
 0x453   :  { %v6033_v41 = vpop.f32.mrf.mxu1 }
 0x456   :  { %v6029_v53 = vpop.f32.mrf.mxu3 }
 0x458   :  { %v2099_v40 = vpop.f32.mrf.mxu0 }
 0x459   :  { %v6035_v7 = vpop.f32.mrf.mxu2  ;;  %v2112_v13 = vmul.f32 %v4213_v25, %v2099_v40  ;;  %v2257_v40 = vadd.f32 %v1924_v57, %v1877_v32  ;;  %v1974_v32 = vmul.f32 %v6064_v29, %v6033_v41 }
 0x45a   :  { %v2021_v17 = vmul.f32 %v6069_v11, %v6035_v7 }
 0x45b   :  { %v2146_v8 = vpop.f32.mrf.mxu1 }
 0x45c   :  { %v2159_v54 = vmul.f32 %v4214_v6, %v2146_v8 }
 0x45e   :  { %v2052_v55 = vpop.f32.mrf.mxu3 }
 0x45f   :  { %v2065_v39 = vmul.f32 %v4212_v0, %v2052_v55 }
 0x460   :  { %v2101_v45 = vpop.f32.mrf.mxu0 }
 0x461   :  { %v2193_v51 = vpop.f32.mrf.mxu2  ;;  %v2113_v22 = vmul.f32 %v4213_v25, %v2101_v45  ;;  %v2265_v24 = vadd.f32 %v2112_v13, %v2065_v39  ;;  %v2020_v45 = vmul.f32 %v6069_v11, %v2010_v46 }
 0x462   :  { %v2206_v36 = vmul.f32 %v4215_v56, %v2193_v51  ;;  %v1973_v51 = vmul.f32 %v6064_v29, %v1963_v52 }
 0x463   :  { %v2148_v61 = vpop.f32.mrf.mxu1 }
 0x464   :  { %v2160_v43 = vmul.f32 %v4214_v6, %v2148_v61  ;;  %v2269_v27 = vadd.f32 %v2206_v36, %v2159_v54  ;;  %v2274_v61 = vadd.f32 %v2262_v44, %v2258_v50  ;;  %v2263_v39 = vadd.f32 %v2020_v45, %v1973_v51 }
 0x466   :  { %v2054_v14 = vpop.f32.mrf.mxu3  ;;  %v2275_v63 = vadd.f32 %v2263_v39, %v2259_v42 }
 0x467   :  { %v2066_v16 = vmul.f32 %v4212_v0, %v2054_v14 }
 0x468   :  { %v2104_v49 = vpop.f32.mrf.mxu0 }
 0x469   :  { %v2195_v9 = vpop.f32.mrf.mxu2  ;;  %v2266_v21 = vadd.f32 %v2113_v22, %v2066_v16  ;;  %v2114_v38 = vmul.f32 %v4213_v25, %v2104_v49 }
 0x46a   :  { %v2207_v62 = vmul.f32 %v4215_v56, %v2195_v9 }
 0x46b   :  { %v2151_v4 = vpop.f32.mrf.mxu1 }
 0x46c   :  { %v2270_v59 = vadd.f32 %v2207_v62, %v2160_v43  ;;  %v2161_v55 = vmul.f32 %v4214_v6, %v2151_v4  ;;  %v2273_v43 = vadd.f32 %v2261_v26, %v2257_v40 }
 0x46e   :  { %v2057_v18 = vpop.f32.mrf.mxu3  ;;  %v2278_v8 = vadd.f32 %v2270_v59, %v2266_v21 }
 0x46f   :  { %v2067_v35 = vmul.f32 %v4212_v0, %v2057_v18  ;;  %v2277_v18 = vadd.f32 %v2269_v27, %v2265_v24 }
 0x470   :  { %v2106_v62 = vpop.f32.mrf.mxu0  ;;  %v2282_v5 = vadd.f32 %v2278_v8, %v2274_v61 }
 0x471   :  { %v2198_v30 = vpop.f32.mrf.mxu2  ;;  %v2267_v9 = vadd.f32 %v2114_v38, %v2067_v35  ;;  %v2281_v54 = vadd.f32 %v2277_v18, %v2273_v43  ;;  %v2115_v36 = vmul.f32 %v4213_v25, %v2106_v62 }
 0x472   :  { %v2208_v14 = vmul.f32 %v4215_v56, %v2198_v30  ;;  %v1880_v30 = vmul.f32 %v6042_v1, %v6029_v53 }
 0x473   :  { %v2153_v13 = vpop.f32.mrf.mxu1 }
 0x474   :  { %v2271_v16 = vadd.f32 %v2208_v14, %v2161_v55  ;;  %v2162_v49 = vmul.f32 %v4214_v6, %v2153_v13 }
 0x476   :  { %v6037_v37 = vpop.f32.mrf.mxu3  ;;  %v2279_v52 = vadd.f32 %v2271_v16, %v2267_v9 }
 0x477   :  { %v2068_v46 = vmul.f32 %v4212_v0, %v6037_v37 }
 0x478   :  { %v2283_v6 = vadd.f32 %v2279_v52, %v2275_v63 }
 0x479   :  { %v2200_v15 = vpop.f32.mrf.mxu2  ;;  %v2268_v0 = vadd.f32 %v2115_v36, %v2068_v46 }
 0x47a   :  { %v2209_v4 = vmul.f32 %v4215_v56, %v2200_v15 }
 0x47c   :  { %v2272_v56 = vadd.f32 %v2209_v4, %v2162_v49 }
 0x47e   :  { %v2240_v2 = vpop.f32.mrf.mxu3  ;;  %v2280_v59 = vadd.f32 %v2272_v56, %v2268_v0 }
 0x47f   :  { %v2253_v31 = vmul.f32 %v4216_v34, %v2240_v2  ;;  %v1927_v2 = vmul.f32 %v6059_v10, %v6031_v12  ;;  %v2264_v10 = vadd.f32 %v2021_v17, %v1974_v32 }
 0x481   :  { %v6089_v57 = vadd.f32 %v2281_v54, %v2253_v31  ;;  %v2260_v1 = vadd.f32 %v1927_v2, %v1880_v30 }
 0x483   :  { %v2305_v21 = vmul.f32 %v6089_v57, %v6089_v57  ;;  %v2291_v41 = vsel %vm1588_vm9, %v6089_v57, 0.0  ;;  %v2276_v38 = vadd.f32 %v2264_v10, %v2260_v1 }
 0x485   :  { %v2309_v50 = vsel %vm1588_vm9, %v2305_v21, 0.0  ;;  %v2284_v8 = vadd.f32 %v2280_v59, %v2276_v38 }
 0x486   :  { %v2242_v22 = vpop.f32.mrf.mxu3 }
 0x487   :  { %v2254_v28 = vmul.f32 %v4216_v34, %v2242_v22 }
 0x489   :  { %v6086_v33 = vadd.f32 %v2282_v5, %v2254_v28 }
 0x48b   :  { %v2306_v37 = vmul.f32 %v6086_v33, %v6086_v33  ;;  %v2292_v53 = vsel %vm1588_vm9, %v6086_v33, 0.0 }
 0x48c   :  { %v2293_v11 = vadd.f32 %v2292_v53, %v2291_v41 }
 0x48d   :  { %v2310_v7 = vsel %vm1588_vm9, %v2306_v37, 0.0 }
 0x48e   :  { %v2245_v25 = vpop.f32.mrf.mxu3  ;;  %v2311_v27 = vadd.f32 %v2310_v7, %v2309_v50 }
 0x48f   :  { %v2255_v12 = vmul.f32 %v4216_v34, %v2245_v25 }
 0x491   :  { %v2287_v29 = vadd.f32 %v2283_v6, %v2255_v12  ;;  %v4217_v6 = vld [vmem:[%s6565_s11 + $0x10] ss:$0 sm:$0xff]  ;;  %v4218_v12 = vld [vmem:[%s6565_s11 + $0x11] ss:$0 sm:$0xff] }
 0x493   :  { %v2294_v44 = vsel %vm1588_vm9, %v2287_v29, 0.0  ;;  %v2307_v24 = vmul.f32 %v2287_v29, %v2287_v29 }
 0x494   :  { %v2295_v35 = vadd.f32 %v2294_v44, %v2293_v11 }
 0x495   :  { %v2312_v55 = vsel %vm1588_vm9, %v2307_v24, 0.0 }
 0x496   :  { %v2313_v14 = vadd.f32 %v2312_v55, %v2311_v27  ;;  %v2247_v40 = vpop.f32.mrf.mxu3 }
 0x497   :  { %v2256_v26 = vmul.f32 %v4216_v34, %v2247_v40 }
 0x499   :  { %v2288_v23 = vadd.f32 %v2284_v8, %v2256_v26 }
 0x49b   :  { %v2296_v47 = vsel %vm1588_vm9, %v2288_v23, 0.0  ;;  %v2308_v51 = vmul.f32 %v2288_v23, %v2288_v23 }
 0x49c   :  { %v2297_v45 = vadd.f32 %v2296_v47, %v2295_v35 }
 0x49d   :  { %v2314_v61 = vsel %vm1588_vm9, %v2308_v51, 0.0 }
 0x49e   :  { %v2298_v18 = vrot.slane %v2297_v45, 4  ;;  %v2315_v9 = vadd.f32 %v2314_v61, %v2313_v14 }
 0x4a0   :  { %v2299_v16 = vadd.f32 %v2298_v18, %v2297_v45  ;;  %v2316_v22 = vrot.slane %v2315_v9, 4 }
 0x4a2   :  { %v2300_v43 = vrot.slane %v2299_v16, 2  ;;  %v2317_v62 = vadd.f32 %v2316_v22, %v2315_v9 }
 0x4a4   :  { %v2301_v31 = vadd.f32 %v2300_v43, %v2299_v16  ;;  %v2318_v28 = vrot.slane %v2317_v62, 2 }
 0x4a6   :  { %v2302_v5 = vrot.slane %v2301_v31, 1  ;;  %v2319_v42 = vadd.f32 %v2318_v28, %v2317_v62 }
 0x4a8   :  { %v2303_v39 = vadd.f32 %v2302_v5, %v2301_v31  ;;  %v2320_v34 = vrot.slane %v2319_v42, 1 }
 0x4aa   :  { %v2304_v13 = vmul.f32 %v2303_v39, %v5856_v48  ;;  %v2321_v15 = vadd.f32 %v2320_v34, %v2319_v42 }
 0x4ac   :  { %v2322_v54 = vmul.f32 %v2321_v15, %v5856_v48  ;;  %v2323_v52 = vmul.f32 %v2304_v13, %v2304_v13  ;;  %v2328_v46 = vsub.f32 %v2287_v29, %v2304_v13  ;;  %v2326_v36 = vsub.f32 %v6089_v57, %v2304_v13 }
 0x4ad   :  { %v2329_v25 = vsub.f32 %v2288_v23, %v2304_v13  ;;  %v2327_v57 = vsub.f32 %v6086_v33, %v2304_v13 }
 0x4ae   :  { %v2324_v49 = vsub.f32 %v2322_v54, %v2323_v52 }
 0x4b0   :  { %v2325_v4 = vmax.f32 %v2324_v49, 0.0 }
 0x4b2   :  { %v2330_v63 = vadd.f32 1e-05, %v2325_v4 }
 0x4b4   :  { %4322 = vrsqrt.f32 %v2330_v63  ;;  %vm2337_vm13 = vweird.f32 %v2330_v63 }
 0x4ba   :  { %v4323_v30 = vpop.eup %4322 }
 0x4bb   :  { %v2332_v2 = vmul.f32 %v4323_v30, %v2330_v63  ;;  %vm2338_vm8 = vweird.f32 %v4323_v30 }
 0x4bc   :  { %vm2339_vm3 = vmor %vm2337_vm13, %vm2338_vm8 }
 0x4bd   :  { %v2333_v32 = vmul.f32 %v4323_v30, %v2332_v2 }
 0x4bf   :  { %v2334_v17 = vmul.f32 0.5, %v2333_v32 }
 0x4c1   :  { %v2335_v37 = vsub.f32 1.5, %v2334_v17 }
 0x4c3   :  { %v2336_v0 = vmul.f32 %v4323_v30, %v2335_v37 }
 0x4c5   :  { %v2340_v56 = vsel %vm2339_vm3, %v4323_v30, %v2336_v0 }
 0x4c6   :  { %v2343_v21 = vmul.f32 %v2340_v56, %v2328_v46  ;;  %v2344_v53 = vmul.f32 %v2340_v56, %v2329_v25  ;;  %v2341_v1 = vmul.f32 %v2340_v56, %v2326_v36  ;;  %v2342_v10 = vmul.f32 %v2340_v56, %v2327_v57 }
 0x4c8   :  { %v2351_v41 = vmul.f32 %v4217_v6, %v2344_v53  ;;  %v2350_v7 = vmul.f32 %v4217_v6, %v2343_v21  ;;  %v2348_v29 = vmul.f32 %v4217_v6, %v2341_v1  ;;  %v2349_v11 = vmul.f32 %v4217_v6, %v2342_v10 }
 0x4ca   :  { %v6123_v59 = vadd.f32 %v4218_v12, %v2351_v41  ;;  %v6125_v50 = vadd.f32 %v4218_v12, %v2350_v7  ;;  %v6127_v44 = vadd.f32 %v4218_v12, %v2348_v29  ;;  %v6129_v33 = vadd.f32 %v4218_v12, %v2349_v11 }
 0x4cc   :  { %v6132_v24 = vmul.f32 0.70710677, %v6123_v59  ;;  %v6135_v27 = vmul.f32 0.70710677, %v6125_v50  ;;  %v6138_v35 = vmul.f32 0.70710677, %v6127_v44 }
 0x4cd   :  { %v6141_v38 = vmul.f32 0.70710677, %v6129_v33 }
 0x4ce   :  { %v2374_v55 = vand.u32 2147483647, %v6132_v24  ;;  %v6145_v14 = vand.u32 2147483647, %v6135_v27  ;;  %v6149_v8 = vand.u32 2147483647, %v6138_v35 }
 0x4cf   :  { %v6152_v23 = vand.u32 2147483647, %v6141_v38 }
 0x4d0   :  { %v2378_v40 = vmul.f32 0.3275911, %v2374_v55  ;;  %v2377_v26 = vmul.f32 0.3275911, %v6145_v14  ;;  %v2375_v45 = vmul.f32 0.3275911, %v6149_v8 }
 0x4d1   :  { %v2376_v61 = vmul.f32 0.3275911, %v6152_v23  ;;  %v2482_v62 = vsub.f32 0.0, %v2374_v55  ;;  %v2481_v54 = vsub.f32 0.0, %v6145_v14 }
 0x4d2   :  { %v2382_v47 = vadd.f32 1.0, %v2378_v40  ;;  %v2381_v51 = vadd.f32 1.0, %v2377_v26  ;;  %v2379_v18 = vadd.f32 1.0, %v2375_v45 }
 0x4d3   :  { %v6156_v9 = vadd.f32 1.0, %v2376_v61  ;;  %v2486_v46 = vmul.f32 %v2482_v62, %v2374_v55  ;;  %v2479_v62 = vsub.f32 0.0, %v6149_v8 }
 0x4d4   :  { %4324 = vrcp.f32 %v2382_v47  ;;  %v2422_v28 = vand.u32 2147483647, %v2381_v51  ;;  %v2424_v39 = vand.u32 2147483648, %v2381_v51  ;;  %v2437_v34 = vand.u32 2147483647, %v2382_v47 }
 0x4d5   :  { %4326 = vrcp.f32 %v2381_v51  ;;  %v2439_v13 = vand.u32 2147483648, %v2382_v47  ;;  %vm2418_vm12 = vweird.f32 %v2381_v51  ;;  %vm2433_vm0 = vweird.f32 %v2382_v47 }
 0x4d6   :  { %4328 = vrcp.f32 %v2379_v18  ;;  %vm6160_vm1 = vcmp.eq.f32.partialorder %v2422_v28, 8.507059e+37  ;;  %v2425_v32 = vor.u32 1.1754944e-38, %v2424_v39  ;;  %vm2438_vm5 = vcmp.eq.f32.partialorder %v2437_v34, 8.507059e+37 }
 0x4d7   :  { %4330 = vrcp.f32 %v6156_v9  ;;  %v2440_v17 = vor.u32 1.1754944e-38, %v2439_v13  ;;  %v2392_v25 = vand.u32 2147483647, %v2379_v18  ;;  %v2394_v21 = vand.u32 2147483648, %v2379_v18 }
 0x4d8   :  { %vm2388_vm7 = vweird.f32 %v2379_v18  ;;  %v2407_v7 = vand.u32 2147483647, %v6156_v9  ;;  %v2409_v29 = vand.u32 2147483648, %v6156_v9  ;;  %vm2403_vm13 = vweird.f32 %v6156_v9 }
 0x4d9   :  { %vm2393_vm3 = vcmp.eq.f32.partialorder %v2392_v25, 8.507059e+37  ;;  %v2480_v34 = vsub.f32 0.0, %v6152_v23 }
 0x4da   :  { %v4325_v16 = vpop.eup %4324 }
 0x4db   :  { %v4327_v22 = vpop.eup %4326  ;;  %v2429_v43 = vmul.f32 %v4325_v16, %v2382_v47  ;;  %vm2434_vm11 = vweird.f32 %v4325_v16  ;;  %v2485_v47 = vmul.f32 %v2481_v54, %v6145_v14 }
 0x4dc   :  { %v2414_v31 = vmul.f32 %v4327_v22, %v2381_v51  ;;  %v4329_v52 = vpop.eup %4328  ;;  %vm2419_vm15 = vweird.f32 %v4327_v22  ;;  %vm2435_vm4 = vmor %vm2433_vm0, %vm2434_vm11  ;;  %v2395_v51 = vor.u32 1.1754944e-38, %v2394_v21  ;;  %vm2363_vm0 = vcmp.ge.f32.partialorder %v6138_v35, 0.0 }
 0x4dd   :  { %v2430_v5 = vsub.f32 1.0, %v2429_v43  ;;  %v2384_v63 = vmul.f32 %v4329_v52, %v2379_v18  ;;  %v4331_v30 = vpop.eup %4330  ;;  %vm2420_vm6 = vmor %vm2418_vm12, %vm2419_vm15  ;;  %vm2389_vm10 = vweird.f32 %v4329_v52  ;;  %v2410_v43 = vor.u32 1.1754944e-38, %v2409_v29 }
 0x4de   :  { %v2415_v42 = vsub.f32 1.0, %v2414_v31  ;;  %v2399_v6 = vmul.f32 %v4331_v30, %v6156_v9  ;;  %vm2404_vm14 = vweird.f32 %v4331_v30  ;;  %vm2390_vm8 = vmor %vm2388_vm7, %vm2389_vm10  ;;  %vm2408_vm12 = vcmp.eq.f32.partialorder %v2407_v7, 8.507059e+37 }
 0x4df   :  { %v2431_v15 = vmul.f32 %v4325_v16, %v2430_v5  ;;  %v2385_v0 = vsub.f32 1.0, %v2384_v63  ;;  %vm2405_vm11 = vmor %vm2403_vm13, %vm2404_vm14  ;;  %v2491_v13 = vmul.f32 1.442695, %v2485_v47  ;;  %vm2366_vm15 = vcmp.ge.f32.partialorder %v6132_v24, 0.0 }
 0x4e0   :  { %v2416_v36 = vmul.f32 %v4327_v22, %v2415_v42  ;;  %v2400_v10 = vsub.f32 1.0, %v2399_v6  ;;  %v2493_v42 = vmul.f32 1.442695, %v2486_v46  ;;  %vm2668_vm13 = vcmask 1040384  }
 0x4e1   :  { %v2432_v4 = vadd.f32 %v4325_v16, %v2431_v15  ;;  %v2386_v1 = vmul.f32 %v4329_v52, %v2385_v0 }
 0x4e2   :  { %v2417_v2 = vadd.f32 %v4327_v22, %v2416_v36  ;;  %v2401_v40 = vmul.f32 %v4331_v30, %v2400_v10  ;;  %v2483_v36 = vmul.f32 %v2479_v62, %v6149_v8  ;;  %4332 = vpow2.f32 %v2493_v42 }
 0x4e3   :  { %v2436_v37 = vsel %vm2435_vm4, %v4325_v16, %v2432_v4  ;;  %v2387_v55 = vadd.f32 %v4329_v52, %v2386_v1  ;;  %4334 = vpow2.f32 %v2491_v13  ;;  %v2510_v62 = vmul.f32 0.5, %v6123_v59 }
 0x4e4   :  { %v2421_v57 = vsel %vm2420_vm6, %v4327_v22, %v2417_v2  ;;  %v2441_v56 = vsel %vm2438_vm5, %v2440_v17, %v2436_v37  ;;  %v2402_v18 = vadd.f32 %v4331_v30, %v2401_v40  ;;  %v2487_v0 = vmul.f32 1.442695, %v2483_v36 }
 0x4e5   :  { %v2426_v53 = vsel %vm6160_vm1, %v2425_v32, %v2421_v57  ;;  %v2446_v12 = vmul.f32 1.0614054, %v2441_v56  ;;  %v2391_v61 = vsel %vm2390_vm8, %v4329_v52, %v2387_v55  ;;  %vm2365_vm1 = vcmp.ge.f32.partialorder %v6135_v27, 0.0 }
 0x4e6   :  { %v2445_v41 = vmul.f32 1.0614054, %v2426_v53  ;;  %v2396_v22 = vsel %vm2393_vm3, %v2395_v51, %v2391_v61  ;;  %v2406_v28 = vsel %vm2405_vm11, %v4331_v30, %v2402_v18  ;;  %v2484_v30 = vmul.f32 %v2480_v34, %v6152_v23 }
 0x4e7   :  { %v3984_v11 = vadd.f32 -1.4531521, %v2446_v12  ;;  %v2443_v5 = vmul.f32 1.0614054, %v2396_v22  ;;  %v2411_v39 = vsel %vm2408_vm12, %v2410_v43, %v2406_v28  ;;  %4336 = vpow2.f32 %v2487_v0 }
 0x4e8   :  { %v3983_v26 = vadd.f32 -1.4531521, %v2445_v41  ;;  %v2444_v15 = vmul.f32 1.0614054, %v2411_v39  ;;  %v2489_v12 = vmul.f32 1.442695, %v2484_v30  ;;  %v4333_v41 = vpop.eup %4332 }
 0x4e9   :  { %v2454_v45 = vmul.f32 %v3984_v11, %v2441_v56  ;;  %v3981_v54 = vadd.f32 -1.4531521, %v2443_v5  ;;  %v4335_v29 = vpop.eup %4334  ;;  %v2369_v61 = vsel %vm2365_vm1, 1.0, %v6762_v20  ;;  %vm2364_vm4 = vcmp.ge.f32.partialorder %v6141_v38, 0.0 }
 0x4ea   :  { %v2453_v16 = vmul.f32 %v3983_v26, %v2426_v53  ;;  %v3982_v4 = vadd.f32 -1.4531521, %v2444_v15  ;;  %4338 = vpow2.f32 %v2489_v12  ;;  %v2367_v15 = vsel %vm2363_vm0, 1.0, %v6762_v20 }
 0x4eb   :  { %v2458_v31 = vadd.f32 1.4214138, %v2454_v45  ;;  %v2451_v63 = vmul.f32 %v3981_v54, %v2396_v22  ;;  %v2508_v38 = vmul.f32 0.5, %v6129_v33  ;;  %v2519_v33 = vld [vmem:[%s6563_s9] sm:$0x1]  ;;  %vm6765_vm8 = vcmask 64512  }
 0x4ec   :  { %v2457_v14 = vadd.f32 1.4214138, %v2453_v16  ;;  %v2452_v46 = vmul.f32 %v3982_v4, %v2411_v39  ;;  %vm2661_vm3 = vcmask 15360   ;;  %vm2930_vm11 = vcmask 130048  }
 0x4ed   :  { %v2462_v9 = vmul.f32 %v2458_v31, %v2441_v56  ;;  %v2455_v17 = vadd.f32 1.4214138, %v2451_v63  ;;  %v4337_v43 = vpop.eup %4336  ;;  %v3996_v63 = vld [vmem:[%s6561_s7 + $0x20] sm:$0xf] }
 0x4ee   :  { %v2461_v52 = vmul.f32 %v2457_v14, %v2426_v53  ;;  %v2456_v6 = vadd.f32 1.4214138, %v2452_v46  ;;  %v2509_v14 = vmul.f32 0.5, %v6125_v50  ;;  %v2507_v50 = vmul.f32 0.5, %v6127_v44  ;;  %v3992_v46 = vld [vmem:[%s6561_s7] sm:$0xf] }
 0x4ef   :  { %v3988_v49 = vadd.f32 -0.28449672, %v2462_v9  ;;  %v2459_v57 = vmul.f32 %v2455_v17, %v2396_v22  ;;  %v4163_v17 = vld [vmem:[%s6561_s7 + $0xc] sm:$0xf0] }
 0x4f0   :  { %v3987_v2 = vadd.f32 -0.28449672, %v2461_v52  ;;  %v2460_v8 = vmul.f32 %v2456_v6, %v2411_v39  ;;  %v4339_v5 = vpop.eup %4338 }
 0x4f1   :  { %v2470_v32 = vmul.f32 %v3988_v49, %v2441_v56  ;;  %v3985_v10 = vadd.f32 -0.28449672, %v2459_v57 }
 0x4f2   :  { %v2469_v37 = vmul.f32 %v3987_v2, %v2426_v53  ;;  %v3986_v11 = vadd.f32 -0.28449672, %v2460_v8  ;;  %v4164_v2 = vld [vmem:[%s6561_s7 + $0x2c] sm:$0xf0] }
 0x4f3   :  { %v2474_v25 = vadd.f32 0.2548296, %v2470_v32  ;;  %v2467_v55 = vmul.f32 %v3985_v10, %v2396_v22  ;;  %v3997_v32 = vor.u32 %v4164_v2, %v3996_v63 }
 0x4f4   :  { %v2473_v21 = vadd.f32 0.2548296, %v2469_v37  ;;  %v2468_v47 = vmul.f32 %v3986_v11, %v2411_v39  ;;  %v3993_v37 = vor.u32 %v4163_v17, %v3992_v46 }
 0x4f5   :  { %v2478_v1 = vmul.f32 %v2474_v25, %v2441_v56  ;;  %v2471_v51 = vadd.f32 0.2548296, %v2467_v55  ;;  %v2370_v56 = vsel %vm2366_vm15, 1.0, %v6762_v20 }
 0x4f6   :  { %v2477_v7 = vmul.f32 %v2473_v21, %v2426_v53  ;;  %v2472_v18 = vadd.f32 0.2548296, %v2468_v47  ;;  %v4219_v21 = vld [vmem:[%s6565_s11 + $0x12] ss:$0 sm:$0xff] }
 0x4f7   :  { %v2498_v23 = vmul.f32 %v4333_v41, %v2478_v1  ;;  %v2475_v16 = vmul.f32 %v2471_v51, %v2396_v22 }
 0x4f8   :  { %v2497_v40 = vmul.f32 %v4335_v29, %v2477_v7  ;;  %v2476_v27 = vmul.f32 %v2472_v18, %v2411_v39  ;;  %v2368_v39 = vsel %vm2364_vm4, 1.0, %v6762_v20 }
 0x4f9   :  { %v2502_v26 = vsub.f32 1.0, %v2498_v23  ;;  %v2495_v28 = vmul.f32 %v4337_v43, %v2475_v16 }
 0x4fa   :  { %v2501_v45 = vsub.f32 1.0, %v2497_v40  ;;  %v2496_v9 = vmul.f32 %v4339_v5, %v2476_v27 }
 0x4fb   :  { %v2506_v53 = vmul.f32 %v2502_v26, %v2370_v56  ;;  %v2499_v13 = vsub.f32 1.0, %v2495_v28  ;;  %v2616_v56 = vld [vmem:[%s6559_s5 + $0x8] sm:$0xf] }
 0x4fc   :  { %v2505_v24 = vmul.f32 %v2501_v45, %v2369_v61  ;;  %v2500_v59 = vsub.f32 1.0, %v2496_v9  ;;  %v2626_v61 = vsel %vm1402_vm2, %v2616_v56, 0 }
 0x4fd   :  { %v2514_v31 = vadd.f32 1.0, %v2506_v53  ;;  %v2503_v54 = vmul.f32 %v2499_v13, %v2367_v15  ;;  %2635 = vmatpush.bf16.msra.mxu1 %v2626_v61 }
 0x4fe   :  { %v2513_v42 = vadd.f32 1.0, %v2505_v24  ;;  %v2504_v52 = vmul.f32 %v2500_v59, %v2368_v39 }
 0x4ff   :  { %v6183_v34 = vmul.f32 %v2514_v31, %v2510_v62  ;;  %v2511_v36 = vadd.f32 1.0, %v2503_v54 }
 0x500   :  { %v6186_v22 = vmul.f32 %v2513_v42, %v2509_v14  ;;  %v2512_v49 = vadd.f32 1.0, %v2504_v52 }
 0x501   :  { %v6194_v4 = vmul.f32 %v2511_v36, %v2507_v50 }
 0x502   :  { %v2521_v35 = vpack.c.bf16 %v6183_v34, %v6186_v22  ;;  %v6202_v30 = vmul.f32 %v2512_v49, %v2508_v38  ;;  %v4220_v49 = vld [vmem:[%s6565_s11 + $0x13] ss:$0 sm:$0xff] }
 0x504   :  { %2531 = vmatpush.bf16.msra.mxu0 %v2521_v35  ;;  %v2520_v44 = vpack.c.bf16 %v6202_v30, %v6194_v4 }
 0x508   :  { %2532 = vmatpush.bf16.msra.mxu0 %v2520_v44 }
 0x50b   :  { %3989 = vmatmul.msk.bf16.vlgmr.msra.gmra.mxu0 %vm1588_vm9, %v2519_v33 }
 0x50c   :  { %2569 = vmatpush.bf16.msrb.mxu0 %v3997_v32 }
 0x510   :  { %2570 = vmatpush.bf16.msrb.mxu0 %v3993_v37 }
 0x588   :  { %v2534_v0 = vpop.f32.mrf.mxu0 }
 0x589   :  { %v2538_v25 = vmul.f32 0.0625, %v2534_v0 }
 0x58b   :  { %v2543_v6 = vpack.c.bf16 %v2538_v25, %v2538_v25 }
 0x58d   :  { %3998 = vmatmul.msk.bf16.vlgmr.msrb.gmra.mxu0 %vm1588_vm9, %v2543_v6  ;;  %v4165_v6 = vld [vmem:[%s6564_s10] sm:$0xff] }
 0x590   :  { %v2536_v57 = vpop.f32.mrf.mxu0 }
 0x591   :  { %v4166_v57 = vld [vmem:[%s6564_s10 + $0x8] sm:$0xff] }
 0x60a   :  { %v2572_v12 = vpop.f32.mrf.mxu0 }
 0x60b   :  { %v2573_v1 = vadd.f32 %v4219_v21, %v2572_v12  ;;  %v4018_v21 = vld [vmem:[%s6561_s7 + $0x24] sm:$0xf]  ;;  %v4168_v12 = vld [vmem:[%s6561_s7 + $0x30] sm:$0xf0] }
 0x60d   :  { %v2576_v8 = vmul.f32 0.70710677, %v2573_v1  ;;  %v2613_v52 = vmul.f32 0.5, %v2573_v1  ;;  %v4019_v1 = vor.u32 %v4168_v12, %v4018_v21 }
 0x60f   :  { %v2579_v10 = vand.u32 2147483647, %v2576_v8  ;;  %vm2577_vm14 = vcmp.ge.f32.partialorder %v2576_v8, 0.0  ;;  %2729 = vmatpush.bf16.msra.mxu3 %v4019_v1  ;;  %v4014_v8 = vld [vmem:[%s6561_s7 + $0x4] sm:$0xf] }
 0x610   :  { %v2578_v35 = vsel %vm2577_vm14, 1.0, %v6762_v20 }
 0x611   :  { %v2580_v41 = vmul.f32 0.3275911, %v2579_v10  ;;  %v2606_v16 = vsub.f32 0.0, %v2579_v10 }
 0x612   :  { %v2574_v7 = vpop.f32.mrf.mxu0 }
 0x613   :  { %v2581_v29 = vadd.f32 1.0, %v2580_v41  ;;  %v2607_v62 = vmul.f32 %v2606_v16, %v2579_v10  ;;  %v4167_v10 = vld [vmem:[%s6561_s7 + $0x10] sm:$0xf0] }
 0x614   :  { %v4015_v41 = vor.u32 %v4167_v10, %v4014_v8 }
 0x615   :  { %4340 = vrcp.f32 %v2581_v29  ;;  %v2593_v40 = vand.u32 2147483648, %v2581_v29  ;;  %v2591_v47 = vand.u32 2147483647, %v2581_v29  ;;  %vm2587_vm6 = vweird.f32 %v2581_v29 }
 0x616   :  { %v2608_v28 = vmul.f32 1.442695, %v2607_v62  ;;  %2730 = vmatpush.bf16.msra.mxu3 %v4015_v41 }
 0x617   :  { %v2594_v45 = vor.u32 1.1754944e-38, %v2593_v40  ;;  %vm2592_vm7 = vcmp.eq.f32.partialorder %v2591_v47, 8.507059e+37 }
 0x618   :  { %4342 = vpow2.f32 %v2608_v28 }
 0x61b   :  { %v4341_v23 = vpop.eup %4340 }
 0x61c   :  { %v2583_v11 = vmul.f32 %v4341_v23, %v2581_v29  ;;  %vm2588_vm5 = vweird.f32 %v4341_v23 }
 0x61d   :  { %vm2589_vm10 = vmor %vm2587_vm6, %vm2588_vm5 }
 0x61e   :  { %v2584_v55 = vsub.f32 1.0, %v2583_v11  ;;  %v4343_v15 = vpop.eup %4342 }
 0x620   :  { %v2585_v26 = vmul.f32 %v4341_v23, %v2584_v55 }
 0x622   :  { %v2586_v51 = vadd.f32 %v4341_v23, %v2585_v26 }
 0x624   :  { %v2590_v53 = vsel %vm2589_vm10, %v4341_v23, %v2586_v51 }
 0x625   :  { %v2595_v18 = vsel %vm2592_vm7, %v2594_v45, %v2590_v53  ;;  %v4207_v45 = vld [vmem:[%s6565_s11 + $0x2] ss:$0 sm:$0xff] }
 0x626   :  { %v2597_v43 = vmul.f32 1.0614054, %v2595_v18  ;;  %v1416_v61 = vadd.f32 %v4207_v45, %v6021_v60  ;;  %v1418_v16 = vadd.f32 %v4207_v45, %v6023_v58  ;;  %v1421_v60 = vadd.f32 %v4207_v45, %v6025_v19 }
 0x628   :  { %v3999_v24 = vadd.f32 -1.4531521, %v2597_v43 }
 0x62a   :  { %v2599_v31 = vmul.f32 %v3999_v24, %v2595_v18 }
 0x62c   :  { %v2600_v27 = vadd.f32 1.4214138, %v2599_v31 }
 0x62e   :  { %v2601_v5 = vmul.f32 %v2600_v27, %v2595_v18 }
 0x630   :  { %v4000_v14 = vadd.f32 -0.28449672, %v2601_v5 }
 0x632   :  { %v2603_v42 = vmul.f32 %v4000_v14, %v2595_v18 }
 0x634   :  { %v2604_v9 = vadd.f32 0.2548296, %v2603_v42 }
 0x636   :  { %v2605_v13 = vmul.f32 %v2604_v9, %v2595_v18  ;;  %v1423_v9 = vadd.f32 %v4207_v45, %v6027_v3 }
 0x638   :  { %v2610_v59 = vmul.f32 %v4343_v15, %v2605_v13 }
 0x63a   :  { %v2611_v54 = vsub.f32 1.0, %v2610_v59 }
 0x63c   :  { %v2612_v39 = vmul.f32 %v2611_v54, %v2578_v35 }
 0x63e   :  { %v2614_v50 = vadd.f32 1.0, %v2612_v39 }
 0x640   :  { %v2615_v36 = vmul.f32 %v2614_v50, %v2613_v52  ;;  %v6294_v52 = vld [vmem:[%s6557_s3] sm:$0xf]  ;;  %v6299_v50 = vld [vmem:[%s6557_s3 + $0x4] sm:$0xf] }
 0x642   :  { %v2617_v38 = vpack.c.bf16 %v2615_v36, %v2615_v36 }
 0x644   :  { %4001 = vmatmul.msk.bf16.vlgmr.msra.gmra.mxu1 %vm6765_vm8, %v2617_v38 }
 0x6c1   :  { %v2637_v63 = vpop.f32.mrf.mxu1 }
 0x6c2   :  { %v2638_v2 = vadd.f32 %v4220_v49, %v2637_v63  ;;  %v6307_v49 = vld [vmem:[%s6557_s3 + $0x10] sm:$0xf]  ;;  %v6312_v63 = vld [vmem:[%s6557_s3 + $0x14] sm:$0xf] }
 0x6c4   :  { %v2641_v32 = vsub.f32 0.0, %v2638_v2 }
 0x6c6   :  { %v2642_v44 = vmul.f32 1.442695, %v2641_v32  ;;  %v6326_v32 = vld [vmem:[%s6557_s3 + $0x8] sm:$0xf] }
 0x6c8   :  { %4344 = vpow2.f32 %v2642_v44  ;;  %v6331_v44 = vld [vmem:[%s6557_s3 + $0xc] sm:$0xf] }
 0x6c9   :  { %v2639_v33 = vpop.f32.mrf.mxu1 }
 0x6ca   :  { %v6336_v33 = vld [vmem:[%s6557_s3 + $0x20] sm:$0xf] }
 0x6ce   :  { %v4345_v46 = vpop.eup %4344 }
 0x6cf   :  { %v2644_v17 = vadd.f32 1.0, %v4345_v46  ;;  %v6347_v46 = vld [vmem:[%s6557_s3 + $0x18] sm:$0xf] }
 0x6d1   :  { %4346 = vrcp.f32 %v2644_v17  ;;  %v6352_v17 = vld [vmem:[%s6557_s3 + $0x1c] sm:$0xf] }
 0x6d7   :  { %v4347_v37 = vpop.eup %4346 }
 0x6d8   :  { %v2650_v0 = vpack.c.bf16 %v4347_v37, %v4347_v37  ;;  %v4401_v37 = vmov 16.0  }
 0x6d9   :  { %4348 = vrcp.f32 %v4401_v37 }
 0x6da   :  { %v2670_v25 = vsel %vm2668_vm13, %v2650_v0, 0 }
 0x6db   :  { %2679 = vmatpush.bf16.msra.mxu2 %v2670_v25 }
 0x6de   :  { %4010 = vmatmul.msk.bf16.vlgmr.msra.gmra.mxu2 %vm2661_vm3, %v4165_v6 }
 0x6df   :  { %v4349_v0 = vpop.eup %4348 }
 0x6e0   :  { %v2962_v25 = vmul.f32 16.0, %v4349_v0  ;;  %vm2966_vm12 = vweird.f32 %v4349_v0 }
 0x6e2   :  { %v2963_v6 = vsub.f32 1.0, %v2962_v25 }
 0x6ee   :  { %4011 = vmatmul.msk.bf16.gmra.mxu2 %vm2661_vm3, %v4166_v57  ;;  %v2964_v57 = vmul.f32 %v4349_v0, %v2963_v6 }
 0x6f0   :  { %v2965_v21 = vadd.f32 %v4349_v0, %v2964_v57 }
 0x6f2   :  { %v2967_v12 = vsel %vm2966_vm12, %v4349_v0, %v2965_v21  ;;  %vm6766_vm12 = vcmask 64512  }
 0x761   :  { %v2681_v7 = vpop.f32.mrf.mxu2 }
 0x762   :  { %v2691_v23 = vmul.f32 %v2681_v7, %v6194_v4  ;;  %v4221_v4 = vld [vmem:[%s6565_s11 + $0x14] ss:$0 sm:$0xff] }
 0x769   :  { %v2683_v29 = vpop.f32.mrf.mxu2 }
 0x76a   :  { %v2692_v11 = vmul.f32 %v2683_v29, %v6202_v30 }
 0x76c   :  { %v2699_v55 = vpack.c.bf16 %v2692_v11, %v2691_v23 }
 0x76e   :  { %4020 = vmatmul.msk.bf16.vlgmr.msra.gmra.mxu3 %vm1588_vm9, %v2699_v55 }
 0x771   :  { %v2686_v40 = vpop.f32.mrf.mxu2 }
 0x772   :  { %v2693_v47 = vmul.f32 %v2686_v40, %v6186_v22 }
 0x779   :  { %v2688_v26 = vpop.f32.mrf.mxu2 }
 0x77a   :  { %v2694_v51 = vmul.f32 %v2688_v26, %v6183_v34 }
 0x77c   :  { %v2700_v56 = vpack.c.bf16 %v2694_v51, %v2693_v47 }
 0x77e   :  { %4021 = vmatmul.msk.bf16.gmra.mxu3 %vm1588_vm9, %v2700_v56 }
 0x7f1   :  { %v2732_v30 = vpop.f32.mrf.mxu3 }
 0x7f2   :  { %v2733_v53 = vadd.f32 %v4221_v4, %v2732_v30 }
 0x7f4   :  { %v6260_v18 = vadd.f32 %v2733_v53, %v1416_v61 }
 0x7f6   :  { %v2949_v34 = vsel %vm2930_vm11, %v6260_v18, 0.0  ;;  %v2972_v39 = vmul.f32 %v6260_v18, %v6260_v18 }
 0x7f7   :  { %2950 = vadd.xlane.f32.xlu2 %v2949_v34 }
 0x7f8   :  { %v2976_v38 = vsel %vm2930_vm11, %v2972_v39, 0.0 }
 0x7f9   :  { %v2734_v22 = vpop.f32.mrf.mxu3 }
 0x7fa   :  { %v2735_v43 = vadd.f32 %v4221_v4, %v2734_v22 }
 0x7fc   :  { %v6265_v24 = vadd.f32 %v2735_v43, %v1418_v16 }
 0x7fe   :  { %v2952_v62 = vsel %vm2930_vm11, %v6265_v24, 0.0  ;;  %v2746_v3 = vpack.c.bf16 %v6265_v24, %v6260_v18  ;;  %v2973_v36 = vmul.f32 %v6265_v24, %v6265_v24 }
 0x7ff   :  { %2953 = vadd.xlane.f32.xlu2 %v2952_v62 }
 0x800   :  { %v2979_v2 = vsel %vm2930_vm11, %v2973_v36, 0.0 }
 0x801   :  { %v2737_v31 = vpop.f32.mrf.mxu3 }
 0x802   :  { %v2738_v27 = vadd.f32 %v4221_v4, %v2737_v31 }
 0x804   :  { %v6270_v28 = vadd.f32 %v2738_v27, %v1421_v60 }
 0x806   :  { %v2955_v5 = vsel %vm2930_vm11, %v6270_v28, 0.0  ;;  %v2974_v14 = vmul.f32 %v6270_v28, %v6270_v28 }
 0x807   :  { %2956 = vadd.xlane.f32.xlu0 %v2955_v5 }
 0x808   :  { %v2982_v58 = vsel %vm2930_vm11, %v2974_v14, 0.0 }
 0x809   :  { %v2739_v42 = vpop.f32.mrf.mxu3  ;;  %2983 = vadd.xlane.f32.xlu1 %v2982_v58 }
 0x80a   :  { %v2740_v13 = vadd.f32 %v4221_v4, %v2739_v42  ;;  %v4041_v42 = vld [vmem:[%s6560_s6] sm:$0xf] }
 0x80c   :  { %v6278_v15 = vadd.f32 %v2740_v13, %v1423_v9  ;;  %v4169_v9 = vld [vmem:[%s6560_s6 + $0x4] sm:$0xf0] }
 0x80e   :  { %v2747_v19 = vpack.c.bf16 %v6278_v15, %v6270_v28  ;;  %v2958_v59 = vsel %vm2930_vm11, %v6278_v15, 0.0  ;;  %v2975_v54 = vmul.f32 %v6278_v15, %v6278_v15 }
 0x80f   :  { %2959 = vadd.xlane.f32.xlu0 %v2958_v59 }
 0x810   :  { %2758 = vmatpush.bf16.msra.mxu0 %v2747_v19  ;;  %2776 = vmatpush.bf16.msrb.mxu1 %v2747_v19  ;;  %v2985_v35 = vsel %vm2930_vm11, %v2975_v54, 0.0 }
 0x811   :  { %2830 = vmatpush.bf16.msrb.mxu2 %v2747_v19  ;;  %2848 = vmatpush.bf16.msrb.mxu3 %v2747_v19 }
 0x812   :  { %2986 = vadd.xlane.f32.xlu1 %v2985_v35 }
 0x814   :  { %2759 = vmatpush.bf16.msra.mxu0 %v2746_v3  ;;  %2777 = vmatpush.bf16.msrb.mxu1 %v2746_v3 }
 0x815   :  { %2831 = vmatpush.bf16.msrb.mxu2 %v2746_v3  ;;  %2849 = vmatpush.bf16.msrb.mxu3 %v2746_v3 }
 0x817   :  { %2977 = vadd.xlane.f32.xlu0 %v2976_v38  ;;  %4022 = vmatmul.msk.bf16.vlgmr.msra.gmra.mxu0 %vm1588_vm9, %v6294_v52 }
 0x818   :  { %2794 = vmatpush.bf16.msrb.mxu0 %v2747_v19  ;;  %2812 = vmatpush.bf16.msra.mxu1 %v2747_v19 }
 0x819   :  { %2902 = vmatpush.bf16.msra.mxu2 %v2747_v19  ;;  %4024 = vmatmul.msk.bf16.vlgmr.msrb.gmra.mxu1 %vm1588_vm9, %v6299_v50 }
 0x81a   :  { %4030 = vmatmul.msk.bf16.vlgmr.msrb.gmra.mxu2 %vm1588_vm9, %v6307_v49  ;;  %4032 = vmatmul.msk.bf16.vlgmr.msrb.gmra.mxu3 %vm1588_vm9, %v6312_v63 }
 0x81b   :  { %2980 = vadd.xlane.f32.xlu1 %v2979_v2 }
 0x81c   :  { %2795 = vmatpush.bf16.msrb.mxu0 %v2746_v3  ;;  %2813 = vmatpush.bf16.msra.mxu1 %v2746_v3 }
 0x81d   :  { %2903 = vmatpush.bf16.msra.mxu2 %v2746_v3 }
 0x820   :  { %2866 = vmatpush.bf16.msra.mxu0 %v2747_v19  ;;  %2884 = vmatpush.bf16.msrb.mxu1 %v2747_v19  ;;  %v4042_v19 = vor.u32 %v4169_v9, %v4041_v42 }
 0x822   :  { %2941 = vmatpush.bf16.msra.mxu3 %v4042_v19 }
 0x824   :  { %2867 = vmatpush.bf16.msra.mxu0 %v2746_v3  ;;  %2885 = vmatpush.bf16.msrb.mxu1 %v2746_v3 }
 0x827   :  { %4026 = vmatmul.msk.bf16.vlgmr.msrb.gmra.mxu0 %vm1588_vm9, %v6326_v32 }
 0x829   :  { %4028 = vmatmul.msk.bf16.vlgmr.msra.gmra.mxu1 %vm1588_vm9, %v6331_v44 }
 0x82a   :  { %4038 = vmatmul.msk.bf16.vlgmr.msra.gmra.mxu2 %vm1588_vm9, %v6336_v33 }
 0x837   :  { %4034 = vmatmul.msk.bf16.vlgmr.msra.gmra.mxu0 %vm1588_vm9, %v6347_v46 }
 0x839   :  { %4036 = vmatmul.msk.bf16.vlgmr.msrb.gmra.mxu1 %vm1588_vm9, %v6352_v17 }
 0x86a   :  { %v2951_v41 = vpop.xlane.xlu2 %2950 }
 0x86b   :  { %v6366_v45 = vmul.f32 %v2967_v12, %v2951_v41 }
 0x86d   :  { %v2992_v16 = vmul.f32 %v6366_v45, %v6366_v45 }
 0x872   :  { %v2954_v4 = vpop.xlane.xlu2 %2953 }
 0x873   :  { %v6368_v61 = vmul.f32 %v2967_v12, %v2954_v4 }
 0x875   :  { %v2993_v5 = vmul.f32 %v6368_v61, %v6368_v61 }
 0x87a   :  { %v2957_v1 = vpop.xlane.xlu0 %2956 }
 0x87b   :  { %v6358_v8 = vmul.f32 %v2967_v12, %v2957_v1 }
 0x87c   :  { %v2984_v10 = vpop.xlane.xlu1 %2983 }
 0x87d   :  { %v2994_v7 = vmul.f32 %v6358_v8, %v6358_v8  ;;  %v2990_v29 = vmul.f32 %v2984_v10, %v2967_v12  ;;  %v3006_v1 = vsub.f32 %v6270_v28, %v6358_v8 }
 0x87f   :  { %v2998_v23 = vsub.f32 %v2990_v29, %v2994_v7  ;;  %v4222_v29 = vld [vmem:[%s6565_s11 + $0x16] ss:$0 sm:$0xff] }
 0x881   :  { %v3002_v11 = vmax.f32 %v2998_v23, 0.0 }
 0x882   :  { %v2960_v55 = vpop.xlane.xlu0 %2959 }
 0x883   :  { %v3010_v40 = vadd.f32 1e-05, %v3002_v11  ;;  %v6362_v26 = vmul.f32 %v2967_v12, %v2960_v55 }
 0x885   :  { %4350 = vrsqrt.f32 %v3010_v40  ;;  %v2995_v47 = vmul.f32 %v6362_v26, %v6362_v26  ;;  %v2987_v51 = vpop.xlane.xlu1 %2986  ;;  %vm3038_vm1 = vweird.f32 %v3010_v40  ;;  %v3007_v28 = vsub.f32 %v6278_v15, %v6362_v26 }
 0x886   :  { %v2991_v56 = vmul.f32 %v2987_v51, %v2967_v12 }
 0x888   :  { %v2999_v30 = vsub.f32 %v2991_v56, %v2995_v47 }
 0x88a   :  { %v3003_v53 = vmax.f32 %v2999_v30, 0.0  ;;  %v2978_v34 = vpop.xlane.xlu0 %2977 }
 0x88b   :  { %v4351_v22 = vpop.eup %4350  ;;  %v2988_v43 = vmul.f32 %v2978_v34, %v2967_v12  ;;  %v4223_v34 = vld [vmem:[%s6565_s11 + $0x17] ss:$0 sm:$0xff] }
 0x88c   :  { %v3033_v62 = vmul.f32 %v4351_v22, %v3010_v40  ;;  %v3011_v31 = vadd.f32 1e-05, %v3003_v53  ;;  %vm3039_vm15 = vweird.f32 %v4351_v22 }
 0x88d   :  { %v2996_v60 = vsub.f32 %v2988_v43, %v2992_v16  ;;  %vm3040_vm0 = vmor %vm3038_vm1, %vm3039_vm15 }
 0x88e   :  { %v2981_v27 = vpop.xlane.xlu1 %2980  ;;  %v3034_v14 = vmul.f32 %v4351_v22, %v3033_v62  ;;  %4352 = vrsqrt.f32 %v3011_v31  ;;  %vm3048_vm5 = vweird.f32 %v3011_v31  ;;  %vm6767_vm15 = vmmov %vm6766_vm12 }
 0x88f   :  { %v2989_v58 = vmul.f32 %v2981_v27, %v2967_v12  ;;  %v3000_v13 = vmax.f32 %v2996_v60, 0.0  ;;  %v3004_v27 = vsub.f32 %v6260_v18, %v6366_v45 }
 0x890   :  { %v3035_v59 = vmul.f32 0.5, %v3034_v14 }
 0x891   :  { %v2997_v54 = vsub.f32 %v2989_v58, %v2993_v5  ;;  %v3008_v35 = vadd.f32 1e-05, %v3000_v13 }
 0x892   :  { %v3036_v3 = vsub.f32 1.5, %v3035_v59 }
 0x893   :  { %v3001_v39 = vmax.f32 %v2997_v54, 0.0  ;;  %4354 = vrsqrt.f32 %v3008_v35  ;;  %vm3018_vm7 = vweird.f32 %v3008_v35  ;;  %v3005_v54 = vsub.f32 %v6265_v24, %v6368_v61 }
 0x894   :  { %v4353_v36 = vpop.eup %4352  ;;  %v3037_v2 = vmul.f32 %v4351_v22, %v3036_v3  ;;  %v6380_v0 = vpop.f32.mrf.mxu0 }
 0x895   :  { %v3009_v38 = vadd.f32 1e-05, %v3001_v39  ;;  %v3043_v37 = vmul.f32 %v4353_v36, %v3011_v31  ;;  %vm3049_vm4 = vweird.f32 %v4353_v36 }
 0x896   :  { %v6382_v25 = vpop.f32.mrf.mxu1  ;;  %v3041_v21 = vsel %vm3040_vm0, %v4351_v22, %v3037_v2  ;;  %vm3050_vm6 = vmor %vm3048_vm5, %vm3049_vm4 }
 0x897   :  { %4356 = vrsqrt.f32 %v3009_v38  ;;  %v3044_v6 = vmul.f32 %v4353_v36, %v3043_v37  ;;  %v3054_v23 = vmul.f32 %v3041_v21, %v3006_v1  ;;  %vm3028_vm13 = vweird.f32 %v3009_v38 }
 0x898   :  { %v2909_v1 = vmax.f32 %v6380_v0, %v6382_v25 }
 0x899   :  { %v4355_v57 = vpop.eup %4354  ;;  %v3045_v12 = vmul.f32 0.5, %v3044_v6  ;;  %v3061_v22 = vmul.f32 %v4222_v29, %v3054_v23 }
 0x89a   :  { %v3013_v10 = vmul.f32 %v4355_v57, %v3008_v35  ;;  %vm3019_vm10 = vweird.f32 %v4355_v57 }
 0x89b   :  { %v3046_v41 = vsub.f32 1.5, %v3045_v12  ;;  %vm3020_vm14 = vmor %vm3018_vm7, %vm3019_vm10  ;;  %v3068_v26 = vadd.f32 %v4223_v34, %v3061_v22 }
 0x89c   :  { %v3014_v11 = vmul.f32 %v4355_v57, %v3013_v10  ;;  %v2763_v56 = vpop.f32.mrf.mxu0 }
 0x89d   :  { %v4357_v7 = vpop.eup %4356  ;;  %v6389_v55 = vpop.f32.mrf.mxu2  ;;  %v3047_v47 = vmul.f32 %v4353_v36, %v3046_v41 }
 0x89e   :  { %v6391_v40 = vpop.f32.mrf.mxu3  ;;  %v3023_v51 = vmul.f32 %v4357_v7, %v3009_v38  ;;  %v2781_v4 = vpop.f32.mrf.mxu1  ;;  %v3015_v8 = vmul.f32 0.5, %v3014_v11  ;;  %vm3029_vm8 = vweird.f32 %v4357_v7 }
 0x89f   :  { %v3051_v30 = vsel %vm3050_vm6, %v4353_v36, %v3047_v47  ;;  %vm3030_vm3 = vmor %vm3028_vm13, %vm3029_vm8  ;;  %v2911_v10 = vmax.f32 %v6389_v55, %v6391_v40 }
 0x8a0   :  { %v3024_v53 = vmul.f32 %v4357_v7, %v3023_v51  ;;  %v3055_v16 = vmul.f32 %v3051_v30, %v3007_v28  ;;  %v3016_v43 = vsub.f32 1.5, %v3015_v8 }
 0x8a2   :  { %v3025_v62 = vmul.f32 0.5, %v3024_v53  ;;  %v3062_v31 = vmul.f32 %v4222_v29, %v3055_v16  ;;  %v3017_v60 = vmul.f32 %v4355_v57, %v3016_v43 }
 0x8a4   :  { %v3026_v15 = vsub.f32 1.5, %v3025_v62  ;;  %v3069_v5 = vadd.f32 %v4223_v34, %v3062_v31  ;;  %v3021_v14 = vsel %vm3020_vm14, %v4355_v57, %v3017_v60  ;;  %v2797_v19 = vpop.f32.mrf.mxu0 }
 0x8a5   :  { %v2835_v58 = vpop.f32.mrf.mxu2  ;;  %v3052_v9 = vmul.f32 %v3021_v14, %v3004_v27 }
 0x8a6   :  { %v2853_v42 = vpop.f32.mrf.mxu3  ;;  %v3027_v13 = vmul.f32 %v4357_v7, %v3026_v15  ;;  %v2815_v59 = vpop.f32.mrf.mxu1  ;;  %v3071_v35 = vpack.c.bf16 %v3069_v5, %v3068_v26 }
 0x8a7   :  { %v3059_v18 = vmul.f32 %v4222_v29, %v3052_v9  ;;  %v2910_v24 = vmax.f32 %v2797_v19, %v2815_v59  ;;  %v4225_v9 = vld [vmem:[%s6565_s11 + $0x18] ss:$0 sm:$0xff] }
 0x8a8   :  { %v3031_v3 = vsel %vm3030_vm3, %v4357_v7, %v3027_v13  ;;  %3078 = vmatpush.bf16.msrb.mxu0 %v3071_v35  ;;  %3091 = vmatpush.bf16.msra.mxu1 %v3071_v35 }
 0x8a9   :  { %v3053_v45 = vmul.f32 %v3031_v3, %v3005_v54  ;;  %3104 = vmatpush.bf16.msrb.mxu2 %v3071_v35  ;;  %3117 = vmatpush.bf16.msrb.mxu3 %v3071_v35  ;;  %v3066_v36 = vadd.f32 %v4223_v34, %v3059_v18 }
 0x8ab   :  { %v3060_v39 = vmul.f32 %v4222_v29, %v3053_v45 }
 0x8ac   :  { %v2799_v6 = vpop.f32.mrf.mxu0 }
 0x8ad   :  { %v3067_v2 = vadd.f32 %v4223_v34, %v3060_v39  ;;  %v2905_v37 = vpop.f32.mrf.mxu2 }
 0x8ae   :  { %v2817_v38 = vpop.f32.mrf.mxu1 }
 0x8af   :  { %v3070_v57 = vpack.c.bf16 %v3067_v2, %v3066_v36  ;;  %v3226_v2 = vld [vmem:[%s6566_s12] sm:$0xff]  ;;  %s4406_s12 = smov 88  }
 0x8b1   :  { %3079 = vmatpush.bf16.msrb.mxu0 %v3070_v57  ;;  %3092 = vmatpush.bf16.msra.mxu1 %v3070_v57 }
 0x8b2   :  { %3105 = vmatpush.bf16.msrb.mxu2 %v3070_v57  ;;  %3118 = vmatpush.bf16.msrb.mxu3 %v3070_v57 }
 0x8b4   :  { %4044 = vmatmul.msk.bf16.vlgmr.msrb.gmra.mxu0 %vm1588_vm9, %v6294_v52  ;;  %4045 = vmatmul.msk.bf16.vlgmr.msra.gmra.mxu1 %vm1588_vm9, %v6299_v50  ;;  %v2869_v21 = vpop.f32.mrf.mxu0  ;;  %v2913_v52 = vmax.f32 %v2909_v1, %v2910_v24 }
 0x8b5   :  { %3130 = vmatpush.bf16.msra.mxu0 %v3071_v35  ;;  %3143 = vmatpush.bf16.msrb.mxu1 %v3071_v35  ;;  %v2907_v61 = vpop.f32.mrf.mxu2 }
 0x8b6   :  { %3156 = vmatpush.bf16.msra.mxu2 %v3071_v35  ;;  %v2887_v12 = vpop.f32.mrf.mxu1 }
 0x8b7   :  { %4046 = vmatmul.msk.bf16.vlgmr.msrb.gmra.mxu2 %vm1588_vm9, %v6326_v32  ;;  %v2912_v41 = vmax.f32 %v2869_v21, %v2887_v12 }
 0x8b9   :  { %3131 = vmatpush.bf16.msra.mxu0 %v3070_v57  ;;  %3144 = vmatpush.bf16.msrb.mxu1 %v3070_v57  ;;  %v2914_v7 = vmax.f32 %v2911_v10, %v2912_v41 }
 0x8ba   :  { %3157 = vmatpush.bf16.msra.mxu2 %v3070_v57 }
 0x8bb   :  { %v2915_v29 = vmax.f32 %v2913_v52, %v2914_v7 }
 0x8bc   :  { %v2871_v23 = vpop.f32.mrf.mxu0 }
 0x8bd   :  { %3182 = vmatpush.bf16.msrb.mxu0 %v3071_v35  ;;  %v2916_v32 = vmax.f32 %v2915_v29, %v2905_v37 }
 0x8be   :  { %v2889_v50 = vpop.f32.mrf.mxu1 }
 0x8bf   :  { %v2919_v11 = vpack.c.bf16 %v2916_v32, %v2916_v32 }
 0x8c1   :  { %3183 = vmatpush.bf16.msrb.mxu0 %v3070_v57  ;;  %4043 = vmatmul.msk.bf16.vlgmr.msra.gmra.mxu3 %vm2930_vm11, %v2919_v11 }
 0x8c2   :  { %3169 = vmatpush.bf16.msra.mxu3 %v3071_v35 }
 0x8c4   :  { %4048 = vmatmul.msk.bf16.vlgmr.msra.gmra.mxu0 %vm1588_vm9, %v6307_v49  ;;  %4049 = vmatmul.msk.bf16.vlgmr.msrb.gmra.mxu1 %vm1588_vm9, %v6312_v63 }
 0x8c6   :  { %3170 = vmatpush.bf16.msra.mxu3 %v3070_v57 }
 0x8c7   :  { %4050 = vmatmul.msk.bf16.vlgmr.msra.gmra.mxu2 %vm1588_vm9, %v6347_v46 }
 0x8d1   :  { %4047 = vmatmul.msk.bf16.vlgmr.msrb.gmra.mxu3 %vm1588_vm9, %v6331_v44 }
 0x8d4   :  { %4052 = vmatmul.msk.bf16.vlgmr.msrb.gmra.mxu0 %vm1588_vm9, %v6336_v33  ;;  %v4055_v33 = vld [vmem:[%s6560_s6 + $0x4] sm:$0xf] }
 0x8e1   :  { %4051 = vmatmul.msk.bf16.vlgmr.msra.gmra.mxu3 %vm1588_vm9, %v6352_v17  ;;  %v4170_v17 = vld [vmem:[%s6560_s6 + $0x8] sm:$0xf0] }
 0x8e2   :  { %v4056_v8 = vor.u32 %v4170_v17, %v4055_v33  ;;  %v3285_v17 = vld [vmem:[%s6559_s5 + $0xc] sm:$0xf] }
 0x8e4   :  { %3220 = vmatpush.bf16.msra.mxu1 %v4056_v8  ;;  %v3370_v8 = vsel %vm1402_vm2, %v3285_v17, 0  ;;  %v4178_v17 = vld [vmem:[%s6562_s8 + $0x28] sm:$0xff] }
 0x931   :  { %v3081_v0 = vpop.f32.mrf.mxu0  ;;  %v3094_v25 = vpop.f32.mrf.mxu1 }
 0x932   :  { %v3189_v31 = vmax.f32 %v3081_v0, %v3094_v25 }
 0x939   :  { %v3083_v49 = vpop.f32.mrf.mxu0  ;;  %v3096_v40 = vpop.f32.mrf.mxu1 }
 0x93a   :  { %v3107_v55 = vpop.f32.mrf.mxu2 }
 0x941   :  { %v3133_v46 = vpop.f32.mrf.mxu0  ;;  %v3146_v51 = vpop.f32.mrf.mxu1 }
 0x942   :  { %v3109_v47 = vpop.f32.mrf.mxu2  ;;  %v3191_v60 = vmax.f32 %v3133_v46, %v3146_v51 }
 0x944   :  { %v6425_v56 = vpop.f32.mrf.mxu3 }
 0x949   :  { %v3135_v4 = vpop.f32.mrf.mxu0  ;;  %v3148_v28 = vpop.f32.mrf.mxu1 }
 0x94a   :  { %v3159_v63 = vpop.f32.mrf.mxu2 }
 0x94c   :  { %v2945_v44 = vpop.f32.mrf.mxu3 }
 0x951   :  { %v3185_v53 = vpop.f32.mrf.mxu0 }
 0x952   :  { %v3161_v30 = vpop.f32.mrf.mxu2 }
 0x953   :  { %v3345_v30 = vld [vmem:[%s6559_s5 + $0x10] sm:$0xf] }
 0x954   :  { %v3120_v34 = vpop.f32.mrf.mxu3 }
 0x955   :  { %v3190_v43 = vmax.f32 %v3107_v55, %v3120_v34 }
 0x957   :  { %v3193_v15 = vmax.f32 %v3189_v31, %v3190_v43 }
 0x959   :  { %v3187_v22 = vpop.f32.mrf.mxu0 }
 0x95c   :  { %v3122_v16 = vpop.f32.mrf.mxu3 }
 0x964   :  { %v3172_v62 = vpop.f32.mrf.mxu3 }
 0x965   :  { %v3192_v27 = vmax.f32 %v3159_v63, %v3172_v62 }
 0x967   :  { %v3194_v26 = vmax.f32 %v3191_v60, %v3192_v27 }
 0x969   :  { %v3195_v5 = vmax.f32 %v3193_v15, %v3194_v26  ;;  %v4224_v15 = vld [vmem:[%s6565_s11 + $0x15] ss:$0 sm:$0xff]  ;;  %v4226_v26 = vld [vmem:[%s6565_s11 + $0x19] ss:$0 sm:$0xff] }
 0x96b   :  { %v3196_v14 = vmax.f32 %v3195_v5, %v3185_v53  ;;  %v3351_v53 = vsel %vm1402_vm2, %v3345_v30, 0 }
 0x96c   :  { %v3174_v58 = vpop.f32.mrf.mxu3 }
 0x96d   :  { %v3199_v42 = vpack.c.bf16 %v3196_v14, %v3196_v14  ;;  %v2944_v58 = vadd.f32 %v4224_v15, %v6425_v56 }
 0x96f   :  { %4057 = vmatmul.msk.bf16.vlgmr.msra.gmra.mxu1 %vm2930_vm11, %v3199_v42  ;;  %vm6768_vm11 = vmmov %vm6766_vm12 }
 0x970   :  { %vm6769_vm1 = vmmov %vm6768_vm11 }
 0x971   :  { %vm6770_vm0 = vmmov %vm6769_vm1 }
 0x972   :  { %vm6771_vm4 = vmmov %vm6770_vm0 }
 0x973   :  { %vm6772_vm5 = vmmov %vm6770_vm0 }
 0x974   :  { %vm6773_vm6 = vmmov %vm6770_vm0 }
 0x975   :  { %vm6774_vm10 = vmmov %vm6770_vm0 }
 0x976   :  { %vm6775_vm7 = vmmov %vm6770_vm0 }
 0x977   :  { %vm6776_vm14 = vmmov %vm6770_vm0 }
 0x978   :  { %vm6777_vm8 = vmmov %vm6770_vm0 }
 0x9ec   :  { %v3222_v13 = vpop.f32.mrf.mxu1 }
 0x9ed   :  { %v3223_v19 = vadd.f32 %v4225_v9, %v3222_v13 }
 0x9ef   :  { %v3227_v59 = vpack.c.bf16 %v3223_v19, %v3223_v19 }
 0x9f1   :  { %3287 = vrot.lane.b32.xlu1 %v3227_v59, %s4402_s18  ;;  %3289 = vrot.lane.b32.xlu0 %v3227_v59, %s4403_s19 }
 0x9f2   :  { %3229 = vrot.lane.b32.xlu2 %v3227_v59, %s4404_s2 }
 0x9f4   :  { %v3224_v54 = vpop.f32.mrf.mxu1 }
 0xa4c   :  { %v3230_v35 = vpop.permute.xlu2 %3229 }
 0xa4d   :  { %v3235_v3 = vsel %vm6766_vm12, %v3230_v35, 0 }
 0xa4e   :  { %3244 = vmatpush.bf16.xpose.msrb.mxu2 %v3235_v3 }
 0xa55   :  { %4058 = vmatmul.msk.bf16.vlgmr.msrb.gmra.mxu2 %vm6767_vm15, %v3227_v59 }
 0xa56   :  { %3360 = vmatpush.bf16.msra.mxu2 %v3351_v53 }
 0xa63   :  { %v3290_v18 = vpop.permute.xlu0 %3289  ;;  %v3288_v39 = vpop.permute.xlu1 %3287 }
 0xa64   :  { %v3295_v45 = vsel %vm6768_vm11, %v3290_v18, 0 }
 0xa65   :  { %3304 = vmatpush.bf16.xpose.msra.mxu0 %v3295_v45 }
 0xa6c   :  { %4060 = vmatmul.msk.bf16.vlgmr.msra.gmra.mxu0 %vm6769_vm1, %v3288_v39  ;;  %v4070_v39 = vld [vmem:[%s6561_s7 + $0x28] sm:$0xf] }
 0xad8   :  { %v3246_v36 = vpop.f32.mrf.mxu2 }
 0xad9   :  { %v3250_v37 = vmul.f32 0.25, %v3246_v36  ;;  %v4172_v36 = vld [vmem:[%s6561_s7 + $0x34] sm:$0xf0] }
 0xadb   :  { %v3251_v6 = vadd.f32 %v3250_v37, %v3226_v2  ;;  %v4071_v37 = vor.u32 %v4172_v36, %v4070_v39 }
 0xadd   :  { %v3252_v38 = vsel %vm6770_vm0, %v3251_v6, -inf  ;;  %3456 = vmatpush.bf16.msrb.mxu0 %v4071_v37 }
 0xade   :  { %3253 = vmax.xlane.f32.xlu2 %v3252_v38 }
 0xae0   :  { %v3248_v57 = vpop.f32.mrf.mxu2 }
 0xae9   :  { %v3306_v24 = vpop.f32.mrf.mxu0 }
 0xaea   :  { %v3310_v61 = vmul.f32 0.25, %v3306_v24 }
 0xaec   :  { %v3311_v21 = vadd.f32 %v3310_v61, %v3226_v2  ;;  %v4066_v2 = vld [vmem:[%s6561_s7 + $0x8] sm:$0xf] }
 0xaee   :  { %v3312_v12 = vsel %vm6771_vm4, %v3311_v21, -inf }
 0xaef   :  { %3313 = vmax.xlane.f32.xlu0 %v3312_v12 }
 0xaf1   :  { %v3308_v1 = vpop.f32.mrf.mxu0 }
 0xb03   :  { %3264 = vrot.lane.b32.xlu0 %v3227_v59, %s4405_s21  ;;  %s4407_s21 = smov [#allocation2]  }
 0xb51   :  { %v3254_v10 = vpop.xlane.xlu2 %3253 }
 0xb52   :  { %v3255_v41 = vsub.f32 %v3251_v6, %v3254_v10  ;;  %v4171_v6 = vld [vmem:[%s6561_s7 + $0x14] sm:$0xf0] }
 0xb54   :  { %v3256_v52 = vmul.f32 1.442695, %v3255_v41 }
 0xb56   :  { %4358 = vpow2.f32 %v3256_v52 }
 0xb5c   :  { %v4359_v7 = vpop.eup %4358 }
 0xb5d   :  { %v3258_v29 = vsel %vm6772_vm5, %v4359_v7, 0.0 }
 0xb5e   :  { %3259 = vadd.xlane.f32.xlu1 %v3258_v29 }
 0xb62   :  { %v3314_v32 = vpop.xlane.xlu0 %3313 }
 0xb63   :  { %v3315_v23 = vsub.f32 %v3311_v21, %v3314_v32  ;;  %v4228_v32 = vld [vmem:[%s6565_s11 + $0x1b] ss:$0 sm:$0xff] }
 0xb65   :  { %v3316_v50 = vmul.f32 1.442695, %v3315_v23 }
 0xb67   :  { %4360 = vpow2.f32 %v3316_v50 }
 0xb6d   :  { %v4361_v11 = vpop.eup %4360 }
 0xb6e   :  { %v3318_v0 = vsel %vm6773_vm6, %v4361_v11, 0.0 }
 0xb6f   :  { %3319 = vadd.xlane.f32.xlu2 %v3318_v0 }
 0xb75   :  { %v3265_v25 = vpop.permute.xlu0 %3264 }
 0xb76   :  { %v3270_v55 = vsel %vm1402_vm2, %v3265_v25, 0  ;;  %v4229_v25 = vld [vmem:[%s6565_s11 + $0x1c] ss:$0 sm:$0xff] }
 0xb77   :  { %3279 = vmatpush.bf16.msrb.mxu3 %v3270_v55 }
 0xb7b   :  { %3379 = vmatpush.bf16.msra.mxu3 %v3370_v8 }
 0xb87   :  { %3324 = vrot.lane.b32.xlu2 %v3227_v59, %s4406_s12  ;;  %s3652_s12 = sshll.u32 %s4407_s21, 4  ;;  %s3653_s12 = int_to_ptr.vmem [resolvable:$true] %s3652_s12 }
 0xbd1   :  { %v3260_v49 = vpop.xlane.xlu1 %3259 }
 0xbd2   :  { %4362 = vrcp.f32 %v3260_v49 }
 0xbd8   :  { %v4363_v40 = vpop.eup %4362 }
 0xbd9   :  { %v3262_v47 = vmul.f32 %v4363_v40, %v4359_v7  ;;  %v4227_v7 = vld [vmem:[%s6565_s11 + $0x1a] ss:$0 sm:$0xff] }
 0xbdb   :  { %v3263_v46 = vpack.c.bf16 %v3262_v47, %v3262_v47 }
 0xbdd   :  { %4059 = vmatmul.msk.bf16.vlgmr.msrb.gmra.mxu3 %vm6774_vm10, %v3263_v46 }
 0xbe2   :  { %v3320_v51 = vpop.xlane.xlu2 %3319 }
 0xbe3   :  { %4364 = vrcp.f32 %v3320_v51 }
 0xbe9   :  { %v4365_v63 = vpop.eup %4364 }
 0xbea   :  { %v3322_v4 = vmul.f32 %v4365_v63, %v4361_v11  ;;  %v3325_v28 = vpop.permute.xlu2 %3324 }
 0xbeb   :  { %v3330_v44 = vsel %vm1402_vm2, %v3325_v28, 0  ;;  %v4179_v28 = vld [vmem:[%s6562_s8 + $0x30] sm:$0xff] }
 0xbec   :  { %v3323_v33 = vpack.c.bf16 %v3322_v4, %v3322_v4  ;;  %3339 = vmatpush.bf16.msrb.mxu1 %v3330_v44  ;;  %v4180_v4 = vld [vmem:[%s6562_s8 + $0x38] sm:$0xff] }
 0xbef   :  { %4061 = vmatmul.msk.bf16.vlgmr.msrb.gmra.mxu1 %vm6775_vm7, %v3323_v33 }
 0xbf0   :  { %3572 = vmatpush.bf16.msra.mxu1 %v4180_v4 }
 0xbf4   :  { %3573 = vmatpush.bf16.msra.mxu1 %v4179_v28 }
 0xbf8   :  { %3574 = vmatpush.bf16.msra.mxu1 %v4178_v17 }
 0xc60   :  { %v3281_v34 = vpop.f32.mrf.mxu3 }
 0xc61   :  { %v3286_v22 = vpack.c.bf16 %v3281_v34, %v3281_v34 }
 0xc63   :  { %4063 = vmatmul.msk.bf16.vlgmr.msra.gmra.mxu3 %vm6776_vm14, %v3286_v22  ;;  %v4177_v22 = vld [vmem:[%s6562_s8 + $0x20] sm:$0xff] }
 0xc64   :  { %3575 = vmatpush.bf16.msra.mxu1 %v4177_v22 }
 0xc68   :  { %v3283_v16 = vpop.f32.mrf.mxu3 }
 0xc6c   :  { %v3341_v43 = vpop.f32.mrf.mxu1 }
 0xc6d   :  { %v3346_v62 = vpack.c.bf16 %v3341_v43, %v3341_v43  ;;  %v4176_v43 = vld [vmem:[%s6562_s8 + $0x18] sm:$0xff] }
 0xc6e   :  { %3576 = vmatpush.bf16.msra.mxu1 %v4176_v43 }
 0xc6f   :  { %4062 = vmatmul.msk.bf16.vlgmr.msra.gmra.mxu2 %vm6777_vm8, %v3346_v62 }
 0xc74   :  { %v3343_v31 = vpop.f32.mrf.mxu1 }
 0xce6   :  { %v3381_v60 = vpop.f32.mrf.mxu3 }
 0xcee   :  { %v3383_v27 = vpop.f32.mrf.mxu3 }
 0xcf2   :  { %v3362_v5 = vpop.f32.mrf.mxu2 }
 0xcf3   :  { %v3382_v14 = vadd.f32 %v3381_v60, %v3362_v5 }
 0xcf5   :  { %v3389_v42 = vadd.f32 %v4226_v26, %v3382_v14  ;;  %v4175_v26 = vld [vmem:[%s6562_s8 + $0x10] sm:$0xff] }
 0xcf6   :  { %3577 = vmatpush.bf16.msra.mxu1 %v4175_v26 }
 0xcf7   :  { %v6469_v9 = vadd.f32 %v3389_v42, %v2944_v58  ;;  %v4174_v42 = vld [vmem:[%s6562_s8 + $0x8] sm:$0xff] }
 0xcf9   :  { %v3393_v13 = vsel %vm1588_vm9, %v6469_v9, 0.0  ;;  %v3397_v59 = vmul.f32 %v6469_v9, %v6469_v9 }
 0xcfa   :  { %v3364_v19 = vpop.f32.mrf.mxu2  ;;  %3394 = vadd.xlane.f32.xlu1 %v3393_v13  ;;  %3578 = vmatpush.bf16.msra.mxu1 %v4174_v42 }
 0xcfb   :  { %v3398_v54 = vsel %vm1588_vm9, %v3397_v59, 0.0 }
 0xd02   :  { %3399 = vadd.xlane.f32.xlu1 %v3398_v54  ;;  %v4173_v54 = vld [vmem:[%s6562_s8] sm:$0xff] }
 0xd03   :  { %3579 = vmatpush.bf16.msra.mxu1 %v4173_v54 }
 0xd6d   :  { %v3395_v35 = vpop.xlane.xlu1 %3394 }
 0xd6e   :  { %v3396_v3 = vmul.f32 %v3395_v35, %v5856_v48 }
 0xd70   :  { %v3402_v45 = vmul.f32 %v3396_v3, %v3396_v3  ;;  %v3405_v52 = vsub.f32 %v6469_v9, %v3396_v3 }
 0xd75   :  { %v3400_v18 = vpop.xlane.xlu1 %3399 }
 0xd76   :  { %v3401_v56 = vmul.f32 %v3400_v18, %v5856_v48  ;;  %v4067_v48 = vor.u32 %v4171_v6, %v4066_v2 }
 0xd78   :  { %v3403_v38 = vsub.f32 %v3401_v56, %v3402_v45  ;;  %3457 = vmatpush.bf16.msrb.mxu0 %v4067_v48 }
 0xd7a   :  { %v3404_v57 = vmax.f32 %v3403_v38, 0.0 }
 0xd7c   :  { %v3406_v24 = vadd.f32 1e-05, %v3404_v57 }
 0xd7e   :  { %4366 = vrsqrt.f32 %v3406_v24  ;;  %vm3413_vm3 = vweird.f32 %v3406_v24 }
 0xd84   :  { %v4367_v61 = vpop.eup %4366 }
 0xd85   :  { %v3408_v21 = vmul.f32 %v4367_v61, %v3406_v24  ;;  %vm3414_vm13 = vweird.f32 %v4367_v61  ;;  %v4114_v24 = vld [vmem:[%s6561_s7 + $0x2c] sm:$0xf] }
 0xd86   :  { %vm3415_vm12 = vmor %vm3413_vm3, %vm3414_vm13 }
 0xd87   :  { %v3409_v12 = vmul.f32 %v4367_v61, %v3408_v21 }
 0xd89   :  { %v3410_v1 = vmul.f32 0.5, %v3409_v12 }
 0xd8b   :  { %v3411_v10 = vsub.f32 1.5, %v3410_v1 }
 0xd8d   :  { %v3412_v41 = vmul.f32 %v4367_v61, %v3411_v10 }
 0xd8f   :  { %v3416_v29 = vsel %vm3415_vm12, %v4367_v61, %v3412_v41  ;;  %v4182_v61 = vld [vmem:[%s6561_s7 + $0x38] sm:$0xf0] }
 0xd90   :  { %v3417_v23 = vmul.f32 %v3416_v29, %v3405_v52  ;;  %v4115_v21 = vor.u32 %v4182_v61, %v4114_v24  ;;  %v3586_v29 = vld [vmem:[%s6563_s9 + $0x1] sm:$0x1] }
 0xd92   :  { %v3421_v50 = vmul.f32 %v4227_v7, %v3417_v23  ;;  %3638 = vmatpush.bf16.msrb.mxu3 %v4115_v21  ;;  %v4181_v23 = vld [vmem:[%s6561_s7 + $0x18] sm:$0xf0] }
 0xd94   :  { %v3425_v11 = vadd.f32 %v4228_v32, %v3421_v50  ;;  %v4110_v32 = vld [vmem:[%s6561_s7 + $0xc] sm:$0xf] }
 0xd96   :  { %v3430_v0 = vpack.c.bf16 %v3425_v11, %v3425_v11 }
 0xd98   :  { %4072 = vmatmul.msk.bf16.vlgmr.msrb.gmra.mxu0 %vm1588_vm9, %v3430_v0 }
 0xe15   :  { %v3459_v55 = vpop.f32.mrf.mxu0 }
 0xe16   :  { %v3460_v49 = vadd.f32 %v4229_v25, %v3459_v55  ;;  %v4231_v55 = vld [vmem:[%s6565_s11 + $0x1e] ss:$0 sm:$0xff] }
 0xe18   :  { %v3463_v40 = vmul.f32 0.70710677, %v3460_v49  ;;  %v3500_v6 = vmul.f32 0.5, %v3460_v49 }
 0xe1a   :  { %v3466_v47 = vand.u32 2147483647, %v3463_v40  ;;  %vm3464_vm4 = vcmp.ge.f32.partialorder %v3463_v40, 0.0 }
 0xe1b   :  { %v3465_v2 = vsel %vm3464_vm4, 1.0, %v6762_v20  ;;  %v4230_v20 = vld [vmem:[%s6565_s11 + $0x1d] ss:$0 sm:$0xff] }
 0xe1c   :  { %v3467_v46 = vmul.f32 0.3275911, %v3466_v47  ;;  %v3493_v27 = vsub.f32 0.0, %v3466_v47 }
 0xe1d   :  { %v3461_v51 = vpop.f32.mrf.mxu0 }
 0xe1e   :  { %v3468_v63 = vadd.f32 1.0, %v3467_v46  ;;  %v3494_v14 = vmul.f32 %v3493_v27, %v3466_v47 }
 0xe20   :  { %4368 = vrcp.f32 %v3468_v63  ;;  %v3480_v30 = vand.u32 2147483648, %v3468_v63  ;;  %v3478_v34 = vand.u32 2147483647, %v3468_v63  ;;  %vm3474_vm11 = vweird.f32 %v3468_v63 }
 0xe21   :  { %v3495_v19 = vmul.f32 1.442695, %v3494_v14 }
 0xe22   :  { %v3481_v62 = vor.u32 1.1754944e-38, %v3480_v30  ;;  %vm3479_vm0 = vcmp.eq.f32.partialorder %v3478_v34, 8.507059e+37 }
 0xe23   :  { %4370 = vpow2.f32 %v3495_v19 }
 0xe26   :  { %v4369_v44 = vpop.eup %4368 }
 0xe27   :  { %v3470_v33 = vmul.f32 %v4369_v44, %v3468_v63  ;;  %vm3475_vm15 = vweird.f32 %v4369_v44 }
 0xe28   :  { %vm3476_vm1 = vmor %vm3474_vm11, %vm3475_vm15 }
 0xe29   :  { %v3471_v8 = vsub.f32 1.0, %v3470_v33  ;;  %v4371_v56 = vpop.eup %4370 }
 0xe2b   :  { %v3472_v53 = vmul.f32 %v4369_v44, %v3471_v8 }
 0xe2d   :  { %v3473_v16 = vadd.f32 %v4369_v44, %v3472_v53 }
 0xe2f   :  { %v3477_v31 = vsel %vm3476_vm1, %v4369_v44, %v3473_v16 }
 0xe30   :  { %v3482_v60 = vsel %vm3479_vm0, %v3481_v62, %v3477_v31 }
 0xe31   :  { %v3484_v15 = vmul.f32 1.0614054, %v3482_v60 }
 0xe33   :  { %v4073_v5 = vadd.f32 -1.4531521, %v3484_v15 }
 0xe35   :  { %v3486_v58 = vmul.f32 %v4073_v5, %v3482_v60 }
 0xe37   :  { %v3487_v13 = vadd.f32 1.4214138, %v3486_v58 }
 0xe39   :  { %v3488_v59 = vmul.f32 %v3487_v13, %v3482_v60 }
 0xe3b   :  { %v4074_v35 = vadd.f32 -0.28449672, %v3488_v59 }
 0xe3d   :  { %v3490_v3 = vmul.f32 %v4074_v35, %v3482_v60 }
 0xe3f   :  { %v3491_v18 = vadd.f32 0.2548296, %v3490_v3 }
 0xe41   :  { %v3492_v45 = vmul.f32 %v3491_v18, %v3482_v60 }
 0xe43   :  { %v3497_v39 = vmul.f32 %v4371_v56, %v3492_v45 }
 0xe45   :  { %v3498_v36 = vsub.f32 1.0, %v3497_v39 }
 0xe47   :  { %v3499_v37 = vmul.f32 %v3498_v36, %v3465_v2 }
 0xe49   :  { %v3501_v38 = vadd.f32 1.0, %v3499_v37 }
 0xe4b   :  { %v3502_v48 = vmul.f32 %v3501_v38, %v3500_v6 }
 0xe4d   :  { %v3519_v57 = vpack.c.bf16 %v3502_v48, %v3502_v48 }
 0xe4f   :  { %3580 = vmatmul.bf16.vlgmr.msra.gmra.mxu1 %v3519_v57 }
 0xecc   :  { %v3581_v12 = vpop.f32.mrf.mxu1 }
 0xecd   :  { %v3582_v1 = vadd.f32 %v4230_v20, %v3581_v12 }
 0xecf   :  { %v3585_v10 = vadd.f32 %v3582_v1, %v6469_v9  ;;  %v4111_v9 = vor.u32 %v4181_v23, %v4110_v32 }
 0xed1   :  { %v3587_v41 = vpack.c.bf16 %v3585_v10, %v3585_v10  ;;  %3639 = vmatpush.bf16.msrb.mxu3 %v4111_v9 }
 0xed3   :  { %v3592_v52 = vsel %vm1402_vm2, %v3587_v41, 0  ;;  %vm3645_vm2 = vcmask 74752  }
 0xed4   :  { %v3583_v7 = vpop.f32.mrf.mxu1  ;;  %3601 = vmatpush.bf16.msrb.mxu2 %v3592_v52 }
 0xed7   :  { %4107 = vmatmul.msk.bf16.vlgmr.msrb.gmra.mxu2 %vm6772_vm5, %v3586_v29 }
 0xf5a   :  { %v3603_v50 = vpop.f32.mrf.mxu2 }
 0xf5b   :  { %v3607_v11 = vmul.f32 0.25, %v3603_v50 }
 0xf5d   :  { %v3612_v0 = vpack.c.bf16 %v3607_v11, %v3607_v11 }
 0xf5f   :  { %4116 = vmatmul.msk.bf16.vlgmr.msrb.gmra.mxu3 %vm1588_vm9, %v3612_v0 }
 0xf62   :  { %v3605_v25 = vpop.f32.mrf.mxu2 }
 0xfe2   :  { %v3641_v49 = vpop.f32.mrf.mxu3 }
 0xfe3   :  { %v3642_v40 = vadd.f32 %v4231_v55, %v3641_v49 }
 0xfe5   :  { %3646 = vst.msk [vmem:[#allocation2] sm:$0x3] %vm3645_vm2, %v3642_v40 }
 0xfe6   :  { %3657 = dma.vmem_to_hbm [thread:$0]  %s3653_s12, 32, %s3655_s24, [#allocation3]  }
 0xfea   :  { %v3643_v47 = vpop.f32.mrf.mxu3 }
 0xfeb   :  { %4396 = dma.done.wait [#allocation3], 32  }
 0xfec   :  { %4397 = vsyncadd [#allocation3], 4294967264 }
 0xfed   :  { %3662 = vsyncpa [#allocation3], 1 }

</bundles_post_ra>
